<compile_context>
chip_gen: v7x
topology: tpu7x:2x2x1
jax: 0.10.0
libtpu: 0.0.40
codegen_flags: <defaults>
</compile_context>

<pallas_src>
import functools

import jax
import jax.numpy as jnp
from jax import lax
from jax.experimental import pallas as pl
from jax.experimental.pallas import tpu as pltpu

BN_EPS = 1e-5
LEAKY_SLOPE = 0.2
LANE = 128


# ------------------------------- helpers --------------------------------------
def _round_up(x, m):
    return ((x + m - 1) // m) * m


@functools.lru_cache(maxsize=None)
def _vmem_limit_bytes():
    """Per-chip VMEM budget: ~75% of capacity, capped at 100 MiB (reviews #6-#8)."""
    try:
        cap = int(pltpu.get_tpu_info().vmem_capacity_bytes)
    except Exception:
        cap = 64 * 1024 * 1024        # conservative fallback (v7x per-core size)
    return int(min(cap * 3 // 4, 100 * 1024 * 1024))


# ----------------------------- Pallas kernels ----------------------------------
def _conv_taps(phase_vals, w_ref, ow, mimg):
    """Sum of 16 shifted-window dots == Conv2d(4,4,stride=2,pad=1) for one image.

    phase_vals[r][s] is the flattened phase tensor value of shape (R, C) where
    R = (OH+1)*(OW+1)+1; the LHS for tap (kh=2a+r, kw=2b+s) is the contiguous
    row window [a*(OW+1)+b : a*(OW+1)+b + mimg).  Output rows are laid out as
    (oh, ow') with ow' in [0, OW]; column ow'==OW is junk and dropped later.
    """
    n = w_ref.shape[-1]
    acc = jnp.zeros((mimg, n), jnp.float32)
    for a in (0, 1):
        for r in (0, 1):
            for b in (0, 1):
                for s in (0, 1):
                    start = a * (ow + 1) + b
                    lhs = phase_vals[r][s][start:start + mimg, :]
                    tap = (2 * a + r) * 4 + (2 * b + s)
                    acc = acc + jnp.dot(lhs, w_ref[tap],
                                        preferred_element_type=jnp.float32)
    return acc


def _conv_kernel(p00, p01, p10, p11, w_ref, o_ref, *, ow, mimg, act):
    """Conv (full reduction per grid step) + fused activation epilogue."""
    pv = ((p00[0], p01[0]), (p10[0], p11[0]))
    acc = _conv_taps(pv, w_ref, ow, mimg)
    if act == "leaky":
        acc = jnp.where(acc > 0, acc, LEAKY_SLOPE * acc)
    elif act == "sigmoid":
        acc = jax.nn.sigmoid(acc)
    o_ref[0, :, :] = acc.astype(o_ref.dtype)


def _conv_stats_kernel(mask_ref, p00, p01, p10, p11, w_ref,
                       y_ref, sum_ref, sq_ref, *, ow, mimg):
    """Conv + per-image partial sum / sum-of-squares for training-mode BN."""
    pv = ((p00[0], p01[0]), (p10[0], p11[0]))
    acc = _conv_taps(pv, w_ref, ow, mimg)
    y_ref[0, :, :] = acc.astype(y_ref.dtype)          # pre-BN activation in bf16
    ym = acc * mask_ref[...]                          # zero out junk-column rows
    sum_ref[0, :, :] = jnp.sum(ym, axis=0, keepdims=True)
    sq_ref[0, :, :] = jnp.sum(ym * acc, axis=0, keepdims=True)


def _bn_act_kernel(y_ref, scale_ref, shift_ref, o_ref):
    """Per-channel affine (folded BN) + LeakyReLU, tiled over M."""
    y = y_ref[...].astype(jnp.float32) * scale_ref[...] + shift_ref[...]
    o_ref[...] = jnp.where(y > 0, y, LEAKY_SLOPE * y).astype(o_ref.dtype)


# ----------------------------- Pallas wrappers ----------------------------------
def _conv_call(phases, wmat, *, ow, mimg, act, out_dtype):
    B, R, C = phases[0].shape
    N = wmat.shape[-1]
    kernel = functools.partial(_conv_kernel, ow=ow, mimg=mimg, act=act)
    phase_spec = pl.BlockSpec((1, R, C), lambda b: (b, 0, 0))
    w_spec = pl.BlockSpec((16, C, N), lambda b: (0, 0, 0))
    cost = pl.CostEstimate(
        flops=32 * B * mimg * C * N,
        transcendentals=(B * mimg * N if act == "sigmoid" else 0),
        bytes_accessed=4 * B * R * C * 2 + 16 * C * N * 2
        + B * mimg * N * jnp.dtype(out_dtype).itemsize)
    return pl.pallas_call(
        kernel,
        out_shape=jax.ShapeDtypeStruct((B, mimg, N), out_dtype),
        grid_spec=pltpu.PrefetchScalarGridSpec(
            num_scalar_prefetch=0,
            grid=(B,),
            in_specs=[phase_spec] * 4 + [w_spec],
            out_specs=pl.BlockSpec((1, mimg, N), lambda b: (b, 0, 0))),
        compiler_params=pltpu.CompilerParams(
            dimension_semantics=("parallel",),
            vmem_limit_bytes=_vmem_limit_bytes()),
        cost_estimate=cost,
    )(*phases, wmat)


def _conv_stats_call(mask, phases, wmat, *, ow, mimg):
    B, R, C = phases[0].shape
    N = wmat.shape[-1]
    kernel = functools.partial(_conv_stats_kernel, ow=ow, mimg=mimg)
    phase_spec = pl.BlockSpec((1, R, C), lambda b: (b, 0, 0))
    w_spec = pl.BlockSpec((16, C, N), lambda b: (0, 0, 0))
    mask_spec = pl.BlockSpec((mimg, 1), lambda b: (0, 0))
    cost = pl.CostEstimate(
        flops=32 * B * mimg * C * N + 4 * B * mimg * N,
        transcendentals=0,
        bytes_accessed=4 * B * R * C * 2 + 16 * C * N * 2
        + B * mimg * N * 2 + 2 * B * N * 4)
    return pl.pallas_call(
        kernel,
        out_shape=(jax.ShapeDtypeStruct((B, mimg, N), jnp.bfloat16),
                   jax.ShapeDtypeStruct((B, 1, N), jnp.float32),
                   jax.ShapeDtypeStruct((B, 1, N), jnp.float32)),
        grid_spec=pltpu.PrefetchScalarGridSpec(
            num_scalar_prefetch=0,
            grid=(B,),
            in_specs=[mask_spec] + [phase_spec] * 4 + [w_spec],
            out_specs=[pl.BlockSpec((1, mimg, N), lambda b: (b, 0, 0)),
                       pl.BlockSpec((1, 1, N), lambda b: (b, 0, 0)),
                       pl.BlockSpec((1, 1, N), lambda b: (b, 0, 0))]),
        compiler_params=pltpu.CompilerParams(
            dimension_semantics=("parallel",),
            vmem_limit_bytes=_vmem_limit_bytes()),
        cost_estimate=cost,
    )(mask, *phases, wmat)


def _bn_act(y, scale, shift):
    """y: (M, N) bf16 pre-BN; returns LeakyReLU(y*scale+shift) as bf16."""
    M, N = y.shape
    TM = min(2048, _round_up(M, 8))
    Mp = _round_up(M, TM)           # pad M so the tile always divides (graceful)
    if Mp != M:
        y = jnp.pad(y, ((0, Mp - M), (0, 0)))
    out = pl.pallas_call(
        _bn_act_kernel,
        out_shape=jax.ShapeDtypeStruct((Mp, N), jnp.bfloat16),
        grid_spec=pltpu.PrefetchScalarGridSpec(
            num_scalar_prefetch=0,
            grid=(Mp // TM,),
            in_specs=[pl.BlockSpec((TM, N), lambda i: (i, 0)),
                      pl.BlockSpec((1, N), lambda i: (0, 0)),
                      pl.BlockSpec((1, N), lambda i: (0, 0))],
            out_specs=pl.BlockSpec((TM, N), lambda i: (i, 0))),
        compiler_params=pltpu.CompilerParams(
            dimension_semantics=("parallel",),
            vmem_limit_bytes=_vmem_limit_bytes()),
    )(y, scale, shift)
    return out[:M]


# ------------------------------- glue (JAX) ------------------------------------
def _prep_weight(w, cpad, npad):
    """OIHW conv weight -> (16, cpad, npad) bf16 tap matrix (tap = kh*4 + kw)."""
    cout, cin = w.shape[0], w.shape[1]
    wt = jnp.transpose(w, (2, 3, 1, 0))                       # (4, 4, Cin, Cout)
    wt = jnp.pad(wt, ((0, 0), (0, 0), (0, cpad - cin), (0, npad - cout)))
    return wt.reshape(16, cpad, npad).astype(jnp.bfloat16)


def conv_layer(x, w, *, gamma=None, beta=None, act="leaky"):
    """Conv2d(4,2,1,bias=False) [+ training-mode BN] [+ activation].

    x: NHWC bf16 with channels padded to a multiple of 8 (padded channels are
    exactly zero).  Returns (B, OH, OW, Cout_pad) with Cout_pad = round128(Cout);
    padded output channels are exactly zero (weight pad columns are zero)."""
    B, H, W, C = x.shape
    cout, cin = w.shape[0], w.shape[1]
    assert C == _round_up(cin, 8), (C, cin)
    OH, OW = H // 2, W // 2
    mimg = OH * (OW + 1)            # per-image output rows, incl. one junk column
    npad = _round_up(cout, LANE)
    wmat = _prep_weight(w, C, npad)

    # Stride-2 phase split of the zero-padded activation (~1x activation bytes),
    # flattened per image and padded with one zero row so every tap window is a
    # contiguous static slice inside the kernel.
    xp = jnp.pad(x, ((0, 0), (1, 1), (1, 1), (0, 0)))
    phases = [
        jnp.pad(xp[:, r::2, s::2, :].reshape(B, (OH + 1) * (OW + 1), C),
                ((0, 0), (0, 1), (0, 0)))
        for r in (0, 1) for s in (0, 1)
    ]

    if gamma is None:
        out_dtype = jnp.float32 if act == "sigmoid" else jnp.bfloat16
        y = _conv_call(phases, wmat, ow=OW, mimg=mimg, act=act,
                       out_dtype=out_dtype)
    else:
        # rows with ow' == OW are the junk column -> excluded from BN statistics
        mask = (jnp.arange(mimg) % (OW + 1) != OW).astype(jnp.float32)
        y, s, sq = _conv_stats_call(mask.reshape(mimg, 1), phases, wmat,
                                    ow=OW, mimg=mimg)
        count = B * OH * OW
        ssum = jnp.sum(s, axis=0)[0]                 # reduce per-image partials
        ssq = jnp.sum(sq, axis=0)[0]
        mean = ssum / count
        # E[y^2]-E[y]^2 in f32 with a >=0 clamp (see review note on cancellation).
        var = jnp.maximum(ssq / count - mean * mean, 0.0)
        g = jnp.pad(gamma.astype(jnp.float32), (0, npad - cout),
                    constant_values=1.0)
        bta = jnp.pad(beta.astype(jnp.float32), (0, npad - cout))
        # Padded channels get a large scale (1/sqrt(eps)) applied to exactly-zero
        # columns -> stays exactly zero; they are also cropped before next layer.
        scale = g * lax.rsqrt(var + BN_EPS)
        shift = bta - mean * scale
        y = _bn_act(y.reshape(B * mimg, npad), scale.reshape(1, npad),
                    shift.reshape(1, npad)).reshape(B, mimg, npad)

    # Drop the junk column; caller crops channels to the true count.
    return y.reshape(B, OH, OW + 1, npad)[:, :, :OW, :]


def discriminator_forward(x_nchw, params):
    """Pallas Discriminator.forward: (B, 1, H, W) -> (B*h'*w',)."""
    x = jnp.transpose(x_nchw, (0, 2, 3, 1)).astype(jnp.bfloat16)
    c0 = x.shape[-1]
    x = jnp.pad(x, ((0, 0), (0, 0), (0, 0), (0, _round_up(c0, 8) - c0)))

    def crop_c(h, cout):
        return h[..., :_round_up(cout, 8)]

    h = conv_layer(x, params["w1"], act="leaky")
    h = crop_c(h, params["w1"].shape[0])
    h = conv_layer(h, params["w2"], gamma=params["g2"], beta=params["b2"])
    h = crop_c(h, params["w2"].shape[0])
    h = conv_layer(h, params["w3"], gamma=params["g3"], beta=params["b3"])
    h = crop_c(h, params["w3"].shape[0])
    h = conv_layer(h, params["w4"], act="sigmoid")
    # .view(-1, 1).squeeze(1): the last layer's true Cout is 1 -> channel 0.
    return h[..., 0].reshape(-1)


# --------------------------- pure-JAX reference ---------------------------------
def _conv_ref(x, w):
    return lax.conv_general_dilated(
        x, w, window_strides=(2, 2), padding=[(1, 1), (1, 1)],
        dimension_numbers=("NCHW", "OIHW", "NCHW"))


def _bn_ref(x, gamma, beta):
    mean = jnp.mean(x, axis=(0, 2, 3), keepdims=True)
    var = jnp.mean((x - mean) ** 2, axis=(0, 2, 3), keepdims=True)
    xn = (x - mean) * lax.rsqrt(var + BN_EPS)
    return xn * gamma.reshape(1, -1, 1, 1) + beta.reshape(1, -1, 1, 1)


def discriminator_ref(x, params):
    leaky = lambda v: jnp.where(v > 0, v, LEAKY_SLOPE * v)
    h = leaky(_conv_ref(x, params["w1"]))
    h = leaky(_bn_ref(_conv_ref(h, params["w2"]), params["g2"], params["b2"]))
    h = leaky(_bn_ref(_conv_ref(h, params["w3"]), params["g3"], params["b3"]))
    h = jax.nn.sigmoid(_conv_ref(h, params["w4"]))
    return h.reshape(-1)


# --------------------------------- main ------------------------------------------
def make_params(key, hidden):
    ks = jax.random.split(key, 4)
    std = 0.05
    return {
        "w1": std * jax.random.normal(ks[0], (hidden, 1, 4, 4), jnp.float32),
        "w2": std * jax.random.normal(ks[1], (2 * hidden, hidden, 4, 4), jnp.float32),
        "w3": std * jax.random.normal(ks[2], (4 * hidden, 2 * hidden, 4, 4), jnp.float32),
        "w4": std * jax.random.normal(ks[3], (1, 4 * hidden, 4, 4), jnp.float32),
        "g2": jnp.ones((2 * hidden,), jnp.float32),
        "b2": jnp.zeros((2 * hidden,), jnp.float32),
        "g3": jnp.ones((4 * hidden,), jnp.float32),
        "b3": jnp.zeros((4 * hidden,), jnp.float32),
    }


if __name__ == "__main__":
    key = jax.random.PRNGKey(0)
    kx, kp = jax.random.split(key)

    B, hidden, H, W = 2, 8, 16, 16          # 16 -> 8 -> 4 -> 2 -> 1 spatial
    x = jax.random.normal(kx, (B, 1, H, W), jnp.float32)
    params = make_params(kp, hidden)

    fwd = jax.jit(discriminator_forward)
    out = jax.block_until_ready(fwd(x, params))
    ref = jax.block_until_ready(discriminator_ref(x, params))

    assert out.shape == (B,), f"bad output shape {out.shape}"
    assert jnp.allclose(out, ref, rtol=2e-2, atol=2e-2), (out, ref)

    print("KERNEL_OK")
</pallas_src>

<mosaic_0001>
module attributes {stable_mosaic.version = 11 : i64} {
  func.func @_conv_kernel(%arg0: i32, %arg1: memref<1x82x8xbf16, #tpu.memory_space<vmem>>, %arg2: memref<1x82x8xbf16, #tpu.memory_space<vmem>>, %arg3: memref<1x82x8xbf16, #tpu.memory_space<vmem>>, %arg4: memref<1x82x8xbf16, #tpu.memory_space<vmem>>, %arg5: memref<16x8x128xbf16, #tpu.memory_space<vmem>>, %arg6: memref<1x72x128xbf16, #tpu.memory_space<vmem>>) attributes {dimension_semantics = [#tpu.dimension_semantics<parallel>], iteration_bounds = array<i64: 2>, scalar_prefetch = 0 : i64, scratch_operands = 0 : i64, tpu.core_type = #tpu.core_type<tc>, window_params = [{transform_indices = @transform_0, window_bounds = array<i64: 1, 82, 8>}, {transform_indices = @transform_1, window_bounds = array<i64: 1, 82, 8>}, {transform_indices = @transform_2, window_bounds = array<i64: 1, 82, 8>}, {transform_indices = @transform_3, window_bounds = array<i64: 1, 82, 8>}, {pipeline_mode = #tpu.pipeline_mode<synchronous>, transform_indices = @transform_4, window_bounds = array<i64: 16, 8, 128>}, {transform_indices = @transform_5, window_bounds = array<i64: 1, 72, 128>}]} {
    %c0 = arith.constant 0 : index
    %c0_0 = arith.constant 0 : index
    %c0_1 = arith.constant 0 : index
    %0 = vector.load %arg1[%c0, %c0_0, %c0_1] : memref<1x82x8xbf16, #tpu.memory_space<vmem>>, vector<1x82x8xbf16>
    %1 = vector.shape_cast %0 : vector<1x82x8xbf16> to vector<82x8xbf16>
    %c0_2 = arith.constant 0 : index
    %c0_3 = arith.constant 0 : index
    %c0_4 = arith.constant 0 : index
    %2 = vector.load %arg2[%c0_2, %c0_3, %c0_4] : memref<1x82x8xbf16, #tpu.memory_space<vmem>>, vector<1x82x8xbf16>
    %3 = vector.shape_cast %2 : vector<1x82x8xbf16> to vector<82x8xbf16>
    %c0_5 = arith.constant 0 : index
    %c0_6 = arith.constant 0 : index
    %c0_7 = arith.constant 0 : index
    %4 = vector.load %arg3[%c0_5, %c0_6, %c0_7] : memref<1x82x8xbf16, #tpu.memory_space<vmem>>, vector<1x82x8xbf16>
    %5 = vector.shape_cast %4 : vector<1x82x8xbf16> to vector<82x8xbf16>
    %c0_8 = arith.constant 0 : index
    %c0_9 = arith.constant 0 : index
    %c0_10 = arith.constant 0 : index
    %6 = vector.load %arg4[%c0_8, %c0_9, %c0_10] : memref<1x82x8xbf16, #tpu.memory_space<vmem>>, vector<1x82x8xbf16>
    %7 = vector.shape_cast %6 : vector<1x82x8xbf16> to vector<82x8xbf16>
    %cst = arith.constant 0.000000e+00 : f32
    %8 = vector.broadcast %cst : f32 to vector<72x128xf32>
    %9 = vector.extract_strided_slice %1 {offsets = [0, 0], sizes = [72, 8], strides = [1, 1]} : vector<82x8xbf16> to vector<72x8xbf16>
    %c0_11 = arith.constant 0 : index
    %c0_12 = arith.constant 0 : index
    %c0_13 = arith.constant 0 : index
    %10 = vector.load %arg5[%c0_11, %c0_12, %c0_13] : memref<16x8x128xbf16, #tpu.memory_space<vmem>>, vector<1x8x128xbf16>
    %11 = vector.shape_cast %10 : vector<1x8x128xbf16> to vector<8x128xbf16>
    %cst_14 = arith.constant dense<0.000000e+00> : vector<72x128xf32>
    %12 = tpu.matmul %9, %11, %cst_14 {dimension_numbers = #tpu.dot_dimension_numbers<[1], [0], [0], [1], [0, 0, 1, 1], [], []>} : vector<72x8xbf16>, vector<8x128xbf16>, vector<72x128xf32> -> vector<72x128xf32>
    %13 = arith.addf %8, %12 : vector<72x128xf32>
    %14 = vector.extract_strided_slice %3 {offsets = [0, 0], sizes = [72, 8], strides = [1, 1]} : vector<82x8xbf16> to vector<72x8xbf16>
    %c1 = arith.constant 1 : index
    %c0_15 = arith.constant 0 : index
    %c0_16 = arith.constant 0 : index
    %15 = vector.load %arg5[%c1, %c0_15, %c0_16] : memref<16x8x128xbf16, #tpu.memory_space<vmem>>, vector<1x8x128xbf16>
    %16 = vector.shape_cast %15 : vector<1x8x128xbf16> to vector<8x128xbf16>
    %cst_17 = arith.constant dense<0.000000e+00> : vector<72x128xf32>
    %17 = tpu.matmul %14, %16, %cst_17 {dimension_numbers = #tpu.dot_dimension_numbers<[1], [0], [0], [1], [0, 0, 1, 1], [], []>} : vector<72x8xbf16>, vector<8x128xbf16>, vector<72x128xf32> -> vector<72x128xf32>
    %18 = arith.addf %13, %17 : vector<72x128xf32>
    %19 = vector.extract_strided_slice %1 {offsets = [1, 0], sizes = [72, 8], strides = [1, 1]} : vector<82x8xbf16> to vector<72x8xbf16>
    %c2 = arith.constant 2 : index
    %c0_18 = arith.constant 0 : index
    %c0_19 = arith.constant 0 : index
    %20 = vector.load %arg5[%c2, %c0_18, %c0_19] : memref<16x8x128xbf16, #tpu.memory_space<vmem>>, vector<1x8x128xbf16>
    %21 = vector.shape_cast %20 : vector<1x8x128xbf16> to vector<8x128xbf16>
    %cst_20 = arith.constant dense<0.000000e+00> : vector<72x128xf32>
    %22 = tpu.matmul %19, %21, %cst_20 {dimension_numbers = #tpu.dot_dimension_numbers<[1], [0], [0], [1], [0, 0, 1, 1], [], []>} : vector<72x8xbf16>, vector<8x128xbf16>, vector<72x128xf32> -> vector<72x128xf32>
    %23 = arith.addf %18, %22 : vector<72x128xf32>
    %24 = vector.extract_strided_slice %3 {offsets = [1, 0], sizes = [72, 8], strides = [1, 1]} : vector<82x8xbf16> to vector<72x8xbf16>
    %c3 = arith.constant 3 : index
    %c0_21 = arith.constant 0 : index
    %c0_22 = arith.constant 0 : index
    %25 = vector.load %arg5[%c3, %c0_21, %c0_22] : memref<16x8x128xbf16, #tpu.memory_space<vmem>>, vector<1x8x128xbf16>
    %26 = vector.shape_cast %25 : vector<1x8x128xbf16> to vector<8x128xbf16>
    %cst_23 = arith.constant dense<0.000000e+00> : vector<72x128xf32>
    %27 = tpu.matmul %24, %26, %cst_23 {dimension_numbers = #tpu.dot_dimension_numbers<[1], [0], [0], [1], [0, 0, 1, 1], [], []>} : vector<72x8xbf16>, vector<8x128xbf16>, vector<72x128xf32> -> vector<72x128xf32>
    %28 = arith.addf %23, %27 : vector<72x128xf32>
    %29 = vector.extract_strided_slice %5 {offsets = [0, 0], sizes = [72, 8], strides = [1, 1]} : vector<82x8xbf16> to vector<72x8xbf16>
    %c4 = arith.constant 4 : index
    %c0_24 = arith.constant 0 : index
    %c0_25 = arith.constant 0 : index
    %30 = vector.load %arg5[%c4, %c0_24, %c0_25] : memref<16x8x128xbf16, #tpu.memory_space<vmem>>, vector<1x8x128xbf16>
    %31 = vector.shape_cast %30 : vector<1x8x128xbf16> to vector<8x128xbf16>
    %cst_26 = arith.constant dense<0.000000e+00> : vector<72x128xf32>
    %32 = tpu.matmul %29, %31, %cst_26 {dimension_numbers = #tpu.dot_dimension_numbers<[1], [0], [0], [1], [0, 0, 1, 1], [], []>} : vector<72x8xbf16>, vector<8x128xbf16>, vector<72x128xf32> -> vector<72x128xf32>
    %33 = arith.addf %28, %32 : vector<72x128xf32>
    %34 = vector.extract_strided_slice %7 {offsets = [0, 0], sizes = [72, 8], strides = [1, 1]} : vector<82x8xbf16> to vector<72x8xbf16>
    %c5 = arith.constant 5 : index
    %c0_27 = arith.constant 0 : index
    %c0_28 = arith.constant 0 : index
    %35 = vector.load %arg5[%c5, %c0_27, %c0_28] : memref<16x8x128xbf16, #tpu.memory_space<vmem>>, vector<1x8x128xbf16>
    %36 = vector.shape_cast %35 : vector<1x8x128xbf16> to vector<8x128xbf16>
    %cst_29 = arith.constant dense<0.000000e+00> : vector<72x128xf32>
    %37 = tpu.matmul %34, %36, %cst_29 {dimension_numbers = #tpu.dot_dimension_numbers<[1], [0], [0], [1], [0, 0, 1, 1], [], []>} : vector<72x8xbf16>, vector<8x128xbf16>, vector<72x128xf32> -> vector<72x128xf32>
    %38 = arith.addf %33, %37 : vector<72x128xf32>
    %39 = vector.extract_strided_slice %5 {offsets = [1, 0], sizes = [72, 8], strides = [1, 1]} : vector<82x8xbf16> to vector<72x8xbf16>
    %c6 = arith.constant 6 : index
    %c0_30 = arith.constant 0 : index
    %c0_31 = arith.constant 0 : index
    %40 = vector.load %arg5[%c6, %c0_30, %c0_31] : memref<16x8x128xbf16, #tpu.memory_space<vmem>>, vector<1x8x128xbf16>
    %41 = vector.shape_cast %40 : vector<1x8x128xbf16> to vector<8x128xbf16>
    %cst_32 = arith.constant dense<0.000000e+00> : vector<72x128xf32>
    %42 = tpu.matmul %39, %41, %cst_32 {dimension_numbers = #tpu.dot_dimension_numbers<[1], [0], [0], [1], [0, 0, 1, 1], [], []>} : vector<72x8xbf16>, vector<8x128xbf16>, vector<72x128xf32> -> vector<72x128xf32>
    %43 = arith.addf %38, %42 : vector<72x128xf32>
    %44 = vector.extract_strided_slice %7 {offsets = [1, 0], sizes = [72, 8], strides = [1, 1]} : vector<82x8xbf16> to vector<72x8xbf16>
    %c7 = arith.constant 7 : index
    %c0_33 = arith.constant 0 : index
    %c0_34 = arith.constant 0 : index
    %45 = vector.load %arg5[%c7, %c0_33, %c0_34] : memref<16x8x128xbf16, #tpu.memory_space<vmem>>, vector<1x8x128xbf16>
    %46 = vector.shape_cast %45 : vector<1x8x128xbf16> to vector<8x128xbf16>
    %cst_35 = arith.constant dense<0.000000e+00> : vector<72x128xf32>
    %47 = tpu.matmul %44, %46, %cst_35 {dimension_numbers = #tpu.dot_dimension_numbers<[1], [0], [0], [1], [0, 0, 1, 1], [], []>} : vector<72x8xbf16>, vector<8x128xbf16>, vector<72x128xf32> -> vector<72x128xf32>
    %48 = arith.addf %43, %47 : vector<72x128xf32>
    %49 = vector.extract_strided_slice %1 {offsets = [9, 0], sizes = [72, 8], strides = [1, 1]} : vector<82x8xbf16> to vector<72x8xbf16>
    %c8 = arith.constant 8 : index
    %c0_36 = arith.constant 0 : index
    %c0_37 = arith.constant 0 : index
    %50 = vector.load %arg5[%c8, %c0_36, %c0_37] : memref<16x8x128xbf16, #tpu.memory_space<vmem>>, vector<1x8x128xbf16>
    %51 = vector.shape_cast %50 : vector<1x8x128xbf16> to vector<8x128xbf16>
    %cst_38 = arith.constant dense<0.000000e+00> : vector<72x128xf32>
    %52 = tpu.matmul %49, %51, %cst_38 {dimension_numbers = #tpu.dot_dimension_numbers<[1], [0], [0], [1], [0, 0, 1, 1], [], []>} : vector<72x8xbf16>, vector<8x128xbf16>, vector<72x128xf32> -> vector<72x128xf32>
    %53 = arith.addf %48, %52 : vector<72x128xf32>
    %54 = vector.extract_strided_slice %3 {offsets = [9, 0], sizes = [72, 8], strides = [1, 1]} : vector<82x8xbf16> to vector<72x8xbf16>
    %c9 = arith.constant 9 : index
    %c0_39 = arith.constant 0 : index
    %c0_40 = arith.constant 0 : index
    %55 = vector.load %arg5[%c9, %c0_39, %c0_40] : memref<16x8x128xbf16, #tpu.memory_space<vmem>>, vector<1x8x128xbf16>
    %56 = vector.shape_cast %55 : vector<1x8x128xbf16> to vector<8x128xbf16>
    %cst_41 = arith.constant dense<0.000000e+00> : vector<72x128xf32>
    %57 = tpu.matmul %54, %56, %cst_41 {dimension_numbers = #tpu.dot_dimension_numbers<[1], [0], [0], [1], [0, 0, 1, 1], [], []>} : vector<72x8xbf16>, vector<8x128xbf16>, vector<72x128xf32> -> vector<72x128xf32>
    %58 = arith.addf %53, %57 : vector<72x128xf32>
    %59 = vector.extract_strided_slice %1 {offsets = [10, 0], sizes = [72, 8], strides = [1, 1]} : vector<82x8xbf16> to vector<72x8xbf16>
    %c10 = arith.constant 10 : index
    %c0_42 = arith.constant 0 : index
    %c0_43 = arith.constant 0 : index
    %60 = vector.load %arg5[%c10, %c0_42, %c0_43] : memref<16x8x128xbf16, #tpu.memory_space<vmem>>, vector<1x8x128xbf16>
    %61 = vector.shape_cast %60 : vector<1x8x128xbf16> to vector<8x128xbf16>
    %cst_44 = arith.constant dense<0.000000e+00> : vector<72x128xf32>
    %62 = tpu.matmul %59, %61, %cst_44 {dimension_numbers = #tpu.dot_dimension_numbers<[1], [0], [0], [1], [0, 0, 1, 1], [], []>} : vector<72x8xbf16>, vector<8x128xbf16>, vector<72x128xf32> -> vector<72x128xf32>
    %63 = arith.addf %58, %62 : vector<72x128xf32>
    %64 = vector.extract_strided_slice %3 {offsets = [10, 0], sizes = [72, 8], strides = [1, 1]} : vector<82x8xbf16> to vector<72x8xbf16>
    %c11 = arith.constant 11 : index
    %c0_45 = arith.constant 0 : index
    %c0_46 = arith.constant 0 : index
    %65 = vector.load %arg5[%c11, %c0_45, %c0_46] : memref<16x8x128xbf16, #tpu.memory_space<vmem>>, vector<1x8x128xbf16>
    %66 = vector.shape_cast %65 : vector<1x8x128xbf16> to vector<8x128xbf16>
    %cst_47 = arith.constant dense<0.000000e+00> : vector<72x128xf32>
    %67 = tpu.matmul %64, %66, %cst_47 {dimension_numbers = #tpu.dot_dimension_numbers<[1], [0], [0], [1], [0, 0, 1, 1], [], []>} : vector<72x8xbf16>, vector<8x128xbf16>, vector<72x128xf32> -> vector<72x128xf32>
    %68 = arith.addf %63, %67 : vector<72x128xf32>
    %69 = vector.extract_strided_slice %5 {offsets = [9, 0], sizes = [72, 8], strides = [1, 1]} : vector<82x8xbf16> to vector<72x8xbf16>
    %c12 = arith.constant 12 : index
    %c0_48 = arith.constant 0 : index
    %c0_49 = arith.constant 0 : index
    %70 = vector.load %arg5[%c12, %c0_48, %c0_49] : memref<16x8x128xbf16, #tpu.memory_space<vmem>>, vector<1x8x128xbf16>
    %71 = vector.shape_cast %70 : vector<1x8x128xbf16> to vector<8x128xbf16>
    %cst_50 = arith.constant dense<0.000000e+00> : vector<72x128xf32>
    %72 = tpu.matmul %69, %71, %cst_50 {dimension_numbers = #tpu.dot_dimension_numbers<[1], [0], [0], [1], [0, 0, 1, 1], [], []>} : vector<72x8xbf16>, vector<8x128xbf16>, vector<72x128xf32> -> vector<72x128xf32>
    %73 = arith.addf %68, %72 : vector<72x128xf32>
    %74 = vector.extract_strided_slice %7 {offsets = [9, 0], sizes = [72, 8], strides = [1, 1]} : vector<82x8xbf16> to vector<72x8xbf16>
    %c13 = arith.constant 13 : index
    %c0_51 = arith.constant 0 : index
    %c0_52 = arith.constant 0 : index
    %75 = vector.load %arg5[%c13, %c0_51, %c0_52] : memref<16x8x128xbf16, #tpu.memory_space<vmem>>, vector<1x8x128xbf16>
    %76 = vector.shape_cast %75 : vector<1x8x128xbf16> to vector<8x128xbf16>
    %cst_53 = arith.constant dense<0.000000e+00> : vector<72x128xf32>
    %77 = tpu.matmul %74, %76, %cst_53 {dimension_numbers = #tpu.dot_dimension_numbers<[1], [0], [0], [1], [0, 0, 1, 1], [], []>} : vector<72x8xbf16>, vector<8x128xbf16>, vector<72x128xf32> -> vector<72x128xf32>
    %78 = arith.addf %73, %77 : vector<72x128xf32>
    %79 = vector.extract_strided_slice %5 {offsets = [10, 0], sizes = [72, 8], strides = [1, 1]} : vector<82x8xbf16> to vector<72x8xbf16>
    %c14 = arith.constant 14 : index
    %c0_54 = arith.constant 0 : index
    %c0_55 = arith.constant 0 : index
    %80 = vector.load %arg5[%c14, %c0_54, %c0_55] : memref<16x8x128xbf16, #tpu.memory_space<vmem>>, vector<1x8x128xbf16>
    %81 = vector.shape_cast %80 : vector<1x8x128xbf16> to vector<8x128xbf16>
    %cst_56 = arith.constant dense<0.000000e+00> : vector<72x128xf32>
    %82 = tpu.matmul %79, %81, %cst_56 {dimension_numbers = #tpu.dot_dimension_numbers<[1], [0], [0], [1], [0, 0, 1, 1], [], []>} : vector<72x8xbf16>, vector<8x128xbf16>, vector<72x128xf32> -> vector<72x128xf32>
    %83 = arith.addf %78, %82 : vector<72x128xf32>
    %84 = vector.extract_strided_slice %7 {offsets = [10, 0], sizes = [72, 8], strides = [1, 1]} : vector<82x8xbf16> to vector<72x8xbf16>
    %c15 = arith.constant 15 : index
    %c0_57 = arith.constant 0 : index
    %c0_58 = arith.constant 0 : index
    %85 = vector.load %arg5[%c15, %c0_57, %c0_58] : memref<16x8x128xbf16, #tpu.memory_space<vmem>>, vector<1x8x128xbf16>
    %86 = vector.shape_cast %85 : vector<1x8x128xbf16> to vector<8x128xbf16>
    %cst_59 = arith.constant dense<0.000000e+00> : vector<72x128xf32>
    %87 = tpu.matmul %84, %86, %cst_59 {dimension_numbers = #tpu.dot_dimension_numbers<[1], [0], [0], [1], [0, 0, 1, 1], [], []>} : vector<72x8xbf16>, vector<8x128xbf16>, vector<72x128xf32> -> vector<72x128xf32>
    %88 = arith.addf %83, %87 : vector<72x128xf32>
    %cst_60 = arith.constant 0.000000e+00 : f32
    %89 = vector.broadcast %cst_60 : f32 to vector<72x128xf32>
    %90 = arith.cmpf ogt, %88, %89 : vector<72x128xf32>
    %cst_61 = arith.constant 2.000000e-01 : f32
    %91 = vector.broadcast %cst_61 : f32 to vector<72x128xf32>
    %92 = arith.mulf %91, %88 : vector<72x128xf32>
    %93 = arith.select %90, %88, %92 : vector<72x128xi1>, vector<72x128xf32>
    %94 = arith.truncf %93 : vector<72x128xf32> to vector<72x128xbf16>
    %c0_62 = arith.constant 0 : index
    %c0_63 = arith.constant 0 : index
    %c0_64 = arith.constant 0 : index
    %95 = vector.load %arg6[%c0_62, %c0_63, %c0_64] : memref<1x72x128xbf16, #tpu.memory_space<vmem>>, vector<1x72x128xbf16>
    %96 = vector.shape_cast %95 : vector<1x72x128xbf16> to vector<72x128xbf16>
    %97 = vector.shape_cast %94 : vector<72x128xbf16> to vector<1x72x128xbf16>
    tpu.vector_store %arg6[%c0_62, %c0_63, %c0_64], %97 {strides = array<i32>} : memref<1x72x128xbf16, #tpu.memory_space<vmem>>, vector<1x72x128xbf16>,
    return
  }
  func.func @transform_0(%arg0: i32) -> (i32, i32, i32) {
    %c0_i32 = arith.constant 0 : i32
    %c0_i32_0 = arith.constant 0 : i32
    %c0_i32_1 = arith.constant 0 : i32
    return %arg0, %c0_i32, %c0_i32_0 : i32, i32, i32
  }
  func.func @transform_1(%arg0: i32) -> (i32, i32, i32) {
    %c0_i32 = arith.constant 0 : i32
    %c0_i32_0 = arith.constant 0 : i32
    %c0_i32_1 = arith.constant 0 : i32
    return %arg0, %c0_i32, %c0_i32_0 : i32, i32, i32
  }
  func.func @transform_2(%arg0: i32) -> (i32, i32, i32) {
    %c0_i32 = arith.constant 0 : i32
    %c0_i32_0 = arith.constant 0 : i32
    %c0_i32_1 = arith.constant 0 : i32
    return %arg0, %c0_i32, %c0_i32_0 : i32, i32, i32
  }
  func.func @transform_3(%arg0: i32) -> (i32, i32, i32) {
    %c0_i32 = arith.constant 0 : i32
    %c0_i32_0 = arith.constant 0 : i32
    %c0_i32_1 = arith.constant 0 : i32
    return %arg0, %c0_i32, %c0_i32_0 : i32, i32, i32
  }
  func.func @transform_4(%arg0: i32) -> (i32, i32, i32) {
    %c0_i32 = arith.constant 0 : i32
    %c0_i32_0 = arith.constant 0 : i32
    %c0_i32_1 = arith.constant 0 : i32
    %c0_i32_2 = arith.constant 0 : i32
    return %c0_i32, %c0_i32_0, %c0_i32_1 : i32, i32, i32
  }
  func.func @transform_5(%arg0: i32) -> (i32, i32, i32) {
    %c0_i32 = arith.constant 0 : i32
    %c0_i32_0 = arith.constant 0 : i32
    %c0_i32_1 = arith.constant 0 : i32
    return %arg0, %c0_i32, %c0_i32_0 : i32, i32, i32
  }
}

module attributes {stable_mosaic.version = 11 : i64} {
  func.func @_conv_stats_kernel(%arg0: i32, %arg1: memref<20x1xf32, #tpu.memory_space<vmem>>, %arg2: memref<1x26x8xbf16, #tpu.memory_space<vmem>>, %arg3: memref<1x26x8xbf16, #tpu.memory_space<vmem>>, %arg4: memref<1x26x8xbf16, #tpu.memory_space<vmem>>, %arg5: memref<1x26x8xbf16, #tpu.memory_space<vmem>>, %arg6: memref<16x8x128xbf16, #tpu.memory_space<vmem>>, %arg7: memref<1x20x128xbf16, #tpu.memory_space<vmem>>, %arg8: memref<1x1x128xf32, #tpu.memory_space<vmem>>, %arg9: memref<1x1x128xf32, #tpu.memory_space<vmem>>) attributes {dimension_semantics = [#tpu.dimension_semantics<parallel>], iteration_bounds = array<i64: 2>, scalar_prefetch = 0 : i64, scratch_operands = 0 : i64, tpu.core_type = #tpu.core_type<tc>, window_params = [{pipeline_mode = #tpu.pipeline_mode<synchronous>, transform_indices = @transform_0, window_bounds = array<i64: 20, 1>}, {transform_indices = @transform_1, window_bounds = array<i64: 1, 26, 8>}, {transform_indices = @transform_2, window_bounds = array<i64: 1, 26, 8>}, {transform_indices = @transform_3, window_bounds = array<i64: 1, 26, 8>}, {transform_indices = @transform_4, window_bounds = array<i64: 1, 26, 8>}, {pipeline_mode = #tpu.pipeline_mode<synchronous>, transform_indices = @transform_5, window_bounds = array<i64: 16, 8, 128>}, {transform_indices = @transform_6, window_bounds = array<i64: 1, 20, 128>}, {transform_indices = @transform_7, window_bounds = array<i64: 1, 1, 128>}, {transform_indices = @transform_8, window_bounds = array<i64: 1, 1, 128>}]} {
    %c0 = arith.constant 0 : index
    %c0_0 = arith.constant 0 : index
    %c0_1 = arith.constant 0 : index
    %0 = vector.load %arg2[%c0, %c0_0, %c0_1] : memref<1x26x8xbf16, #tpu.memory_space<vmem>>, vector<1x26x8xbf16>
    %1 = vector.shape_cast %0 : vector<1x26x8xbf16> to vector<26x8xbf16>
    %c0_2 = arith.constant 0 : index
    %c0_3 = arith.constant 0 : index
    %c0_4 = arith.constant 0 : index
    %2 = vector.load %arg3[%c0_2, %c0_3, %c0_4] : memref<1x26x8xbf16, #tpu.memory_space<vmem>>, vector<1x26x8xbf16>
    %3 = vector.shape_cast %2 : vector<1x26x8xbf16> to vector<26x8xbf16>
    %c0_5 = arith.constant 0 : index
    %c0_6 = arith.constant 0 : index
    %c0_7 = arith.constant 0 : index
    %4 = vector.load %arg4[%c0_5, %c0_6, %c0_7] : memref<1x26x8xbf16, #tpu.memory_space<vmem>>, vector<1x26x8xbf16>
    %5 = vector.shape_cast %4 : vector<1x26x8xbf16> to vector<26x8xbf16>
    %c0_8 = arith.constant 0 : index
    %c0_9 = arith.constant 0 : index
    %c0_10 = arith.constant 0 : index
    %6 = vector.load %arg5[%c0_8, %c0_9, %c0_10] : memref<1x26x8xbf16, #tpu.memory_space<vmem>>, vector<1x26x8xbf16>
    %7 = vector.shape_cast %6 : vector<1x26x8xbf16> to vector<26x8xbf16>
    %cst = arith.constant 0.000000e+00 : f32
    %8 = vector.broadcast %cst : f32 to vector<20x128xf32>
    %9 = vector.extract_strided_slice %1 {offsets = [0, 0], sizes = [20, 8], strides = [1, 1]} : vector<26x8xbf16> to vector<20x8xbf16>
    %c0_11 = arith.constant 0 : index
    %c0_12 = arith.constant 0 : index
    %c0_13 = arith.constant 0 : index
    %10 = vector.load %arg6[%c0_11, %c0_12, %c0_13] : memref<16x8x128xbf16, #tpu.memory_space<vmem>>, vector<1x8x128xbf16>
    %11 = vector.shape_cast %10 : vector<1x8x128xbf16> to vector<8x128xbf16>
    %cst_14 = arith.constant dense<0.000000e+00> : vector<20x128xf32>
    %12 = tpu.matmul %9, %11, %cst_14 {dimension_numbers = #tpu.dot_dimension_numbers<[1], [0], [0], [1], [0, 0, 1, 1], [], []>} : vector<20x8xbf16>, vector<8x128xbf16>, vector<20x128xf32> -> vector<20x128xf32>
    %13 = arith.addf %8, %12 : vector<20x128xf32>
    %14 = vector.extract_strided_slice %3 {offsets = [0, 0], sizes = [20, 8], strides = [1, 1]} : vector<26x8xbf16> to vector<20x8xbf16>
    %c1 = arith.constant 1 : index
    %c0_15 = arith.constant 0 : index
    %c0_16 = arith.constant 0 : index
    %15 = vector.load %arg6[%c1, %c0_15, %c0_16] : memref<16x8x128xbf16, #tpu.memory_space<vmem>>, vector<1x8x128xbf16>
    %16 = vector.shape_cast %15 : vector<1x8x128xbf16> to vector<8x128xbf16>
    %cst_17 = arith.constant dense<0.000000e+00> : vector<20x128xf32>
    %17 = tpu.matmul %14, %16, %cst_17 {dimension_numbers = #tpu.dot_dimension_numbers<[1], [0], [0], [1], [0, 0, 1, 1], [], []>} : vector<20x8xbf16>, vector<8x128xbf16>, vector<20x128xf32> -> vector<20x128xf32>
    %18 = arith.addf %13, %17 : vector<20x128xf32>
    %19 = vector.extract_strided_slice %1 {offsets = [1, 0], sizes = [20, 8], strides = [1, 1]} : vector<26x8xbf16> to vector<20x8xbf16>
    %c2 = arith.constant 2 : index
    %c0_18 = arith.constant 0 : index
    %c0_19 = arith.constant 0 : index
    %20 = vector.load %arg6[%c2, %c0_18, %c0_19] : memref<16x8x128xbf16, #tpu.memory_space<vmem>>, vector<1x8x128xbf16>
    %21 = vector.shape_cast %20 : vector<1x8x128xbf16> to vector<8x128xbf16>
    %cst_20 = arith.constant dense<0.000000e+00> : vector<20x128xf32>
    %22 = tpu.matmul %19, %21, %cst_20 {dimension_numbers = #tpu.dot_dimension_numbers<[1], [0], [0], [1], [0, 0, 1, 1], [], []>} : vector<20x8xbf16>, vector<8x128xbf16>, vector<20x128xf32> -> vector<20x128xf32>
    %23 = arith.addf %18, %22 : vector<20x128xf32>
    %24 = vector.extract_strided_slice %3 {offsets = [1, 0], sizes = [20, 8], strides = [1, 1]} : vector<26x8xbf16> to vector<20x8xbf16>
    %c3 = arith.constant 3 : index
    %c0_21 = arith.constant 0 : index
    %c0_22 = arith.constant 0 : index
    %25 = vector.load %arg6[%c3, %c0_21, %c0_22] : memref<16x8x128xbf16, #tpu.memory_space<vmem>>, vector<1x8x128xbf16>
    %26 = vector.shape_cast %25 : vector<1x8x128xbf16> to vector<8x128xbf16>
    %cst_23 = arith.constant dense<0.000000e+00> : vector<20x128xf32>
    %27 = tpu.matmul %24, %26, %cst_23 {dimension_numbers = #tpu.dot_dimension_numbers<[1], [0], [0], [1], [0, 0, 1, 1], [], []>} : vector<20x8xbf16>, vector<8x128xbf16>, vector<20x128xf32> -> vector<20x128xf32>
    %28 = arith.addf %23, %27 : vector<20x128xf32>
    %29 = vector.extract_strided_slice %5 {offsets = [0, 0], sizes = [20, 8], strides = [1, 1]} : vector<26x8xbf16> to vector<20x8xbf16>
    %c4 = arith.constant 4 : index
    %c0_24 = arith.constant 0 : index
    %c0_25 = arith.constant 0 : index
    %30 = vector.load %arg6[%c4, %c0_24, %c0_25] : memref<16x8x128xbf16, #tpu.memory_space<vmem>>, vector<1x8x128xbf16>
    %31 = vector.shape_cast %30 : vector<1x8x128xbf16> to vector<8x128xbf16>
    %cst_26 = arith.constant dense<0.000000e+00> : vector<20x128xf32>
    %32 = tpu.matmul %29, %31, %cst_26 {dimension_numbers = #tpu.dot_dimension_numbers<[1], [0], [0], [1], [0, 0, 1, 1], [], []>} : vector<20x8xbf16>, vector<8x128xbf16>, vector<20x128xf32> -> vector<20x128xf32>
    %33 = arith.addf %28, %32 : vector<20x128xf32>
    %34 = vector.extract_strided_slice %7 {offsets = [0, 0], sizes = [20, 8], strides = [1, 1]} : vector<26x8xbf16> to vector<20x8xbf16>
    %c5 = arith.constant 5 : index
    %c0_27 = arith.constant 0 : index
    %c0_28 = arith.constant 0 : index
    %35 = vector.load %arg6[%c5, %c0_27, %c0_28] : memref<16x8x128xbf16, #tpu.memory_space<vmem>>, vector<1x8x128xbf16>
    %36 = vector.shape_cast %35 : vector<1x8x128xbf16> to vector<8x128xbf16>
    %cst_29 = arith.constant dense<0.000000e+00> : vector<20x128xf32>
    %37 = tpu.matmul %34, %36, %cst_29 {dimension_numbers = #tpu.dot_dimension_numbers<[1], [0], [0], [1], [0, 0, 1, 1], [], []>} : vector<20x8xbf16>, vector<8x128xbf16>, vector<20x128xf32> -> vector<20x128xf32>
    %38 = arith.addf %33, %37 : vector<20x128xf32>
    %39 = vector.extract_strided_slice %5 {offsets = [1, 0], sizes = [20, 8], strides = [1, 1]} : vector<26x8xbf16> to vector<20x8xbf16>
    %c6 = arith.constant 6 : index
    %c0_30 = arith.constant 0 : index
    %c0_31 = arith.constant 0 : index
    %40 = vector.load %arg6[%c6, %c0_30, %c0_31] : memref<16x8x128xbf16, #tpu.memory_space<vmem>>, vector<1x8x128xbf16>
    %41 = vector.shape_cast %40 : vector<1x8x128xbf16> to vector<8x128xbf16>
    %cst_32 = arith.constant dense<0.000000e+00> : vector<20x128xf32>
    %42 = tpu.matmul %39, %41, %cst_32 {dimension_numbers = #tpu.dot_dimension_numbers<[1], [0], [0], [1], [0, 0, 1, 1], [], []>} : vector<20x8xbf16>, vector<8x128xbf16>, vector<20x128xf32> -> vector<20x128xf32>
    %43 = arith.addf %38, %42 : vector<20x128xf32>
    %44 = vector.extract_strided_slice %7 {offsets = [1, 0], sizes = [20, 8], strides = [1, 1]} : vector<26x8xbf16> to vector<20x8xbf16>
    %c7 = arith.constant 7 : index
    %c0_33 = arith.constant 0 : index
    %c0_34 = arith.constant 0 : index
    %45 = vector.load %arg6[%c7, %c0_33, %c0_34] : memref<16x8x128xbf16, #tpu.memory_space<vmem>>, vector<1x8x128xbf16>
    %46 = vector.shape_cast %45 : vector<1x8x128xbf16> to vector<8x128xbf16>
    %cst_35 = arith.constant dense<0.000000e+00> : vector<20x128xf32>
    %47 = tpu.matmul %44, %46, %cst_35 {dimension_numbers = #tpu.dot_dimension_numbers<[1], [0], [0], [1], [0, 0, 1, 1], [], []>} : vector<20x8xbf16>, vector<8x128xbf16>, vector<20x128xf32> -> vector<20x128xf32>
    %48 = arith.addf %43, %47 : vector<20x128xf32>
    %49 = vector.extract_strided_slice %1 {offsets = [5, 0], sizes = [20, 8], strides = [1, 1]} : vector<26x8xbf16> to vector<20x8xbf16>
    %c8 = arith.constant 8 : index
    %c0_36 = arith.constant 0 : index
    %c0_37 = arith.constant 0 : index
    %50 = vector.load %arg6[%c8, %c0_36, %c0_37] : memref<16x8x128xbf16, #tpu.memory_space<vmem>>, vector<1x8x128xbf16>
    %51 = vector.shape_cast %50 : vector<1x8x128xbf16> to vector<8x128xbf16>
    %cst_38 = arith.constant dense<0.000000e+00> : vector<20x128xf32>
    %52 = tpu.matmul %49, %51, %cst_38 {dimension_numbers = #tpu.dot_dimension_numbers<[1], [0], [0], [1], [0, 0, 1, 1], [], []>} : vector<20x8xbf16>, vector<8x128xbf16>, vector<20x128xf32> -> vector<20x128xf32>
    %53 = arith.addf %48, %52 : vector<20x128xf32>
    %54 = vector.extract_strided_slice %3 {offsets = [5, 0], sizes = [20, 8], strides = [1, 1]} : vector<26x8xbf16> to vector<20x8xbf16>
    %c9 = arith.constant 9 : index
    %c0_39 = arith.constant 0 : index
    %c0_40 = arith.constant 0 : index
    %55 = vector.load %arg6[%c9, %c0_39, %c0_40] : memref<16x8x128xbf16, #tpu.memory_space<vmem>>, vector<1x8x128xbf16>
    %56 = vector.shape_cast %55 : vector<1x8x128xbf16> to vector<8x128xbf16>
    %cst_41 = arith.constant dense<0.000000e+00> : vector<20x128xf32>
    %57 = tpu.matmul %54, %56, %cst_41 {dimension_numbers = #tpu.dot_dimension_numbers<[1], [0], [0], [1], [0, 0, 1, 1], [], []>} : vector<20x8xbf16>, vector<8x128xbf16>, vector<20x128xf32> -> vector<20x128xf32>
    %58 = arith.addf %53, %57 : vector<20x128xf32>
    %59 = vector.extract_strided_slice %1 {offsets = [6, 0], sizes = [20, 8], strides = [1, 1]} : vector<26x8xbf16> to vector<20x8xbf16>
    %c10 = arith.constant 10 : index
    %c0_42 = arith.constant 0 : index
    %c0_43 = arith.constant 0 : index
    %60 = vector.load %arg6[%c10, %c0_42, %c0_43] : memref<16x8x128xbf16, #tpu.memory_space<vmem>>, vector<1x8x128xbf16>
    %61 = vector.shape_cast %60 : vector<1x8x128xbf16> to vector<8x128xbf16>
    %cst_44 = arith.constant dense<0.000000e+00> : vector<20x128xf32>
    %62 = tpu.matmul %59, %61, %cst_44 {dimension_numbers = #tpu.dot_dimension_numbers<[1], [0], [0], [1], [0, 0, 1, 1], [], []>} : vector<20x8xbf16>, vector<8x128xbf16>, vector<20x128xf32> -> vector<20x128xf32>
    %63 = arith.addf %58, %62 : vector<20x128xf32>
    %64 = vector.extract_strided_slice %3 {offsets = [6, 0], sizes = [20, 8], strides = [1, 1]} : vector<26x8xbf16> to vector<20x8xbf16>
    %c11 = arith.constant 11 : index
    %c0_45 = arith.constant 0 : index
    %c0_46 = arith.constant 0 : index
    %65 = vector.load %arg6[%c11, %c0_45, %c0_46] : memref<16x8x128xbf16, #tpu.memory_space<vmem>>, vector<1x8x128xbf16>
    %66 = vector.shape_cast %65 : vector<1x8x128xbf16> to vector<8x128xbf16>
    %cst_47 = arith.constant dense<0.000000e+00> : vector<20x128xf32>
    %67 = tpu.matmul %64, %66, %cst_47 {dimension_numbers = #tpu.dot_dimension_numbers<[1], [0], [0], [1], [0, 0, 1, 1], [], []>} : vector<20x8xbf16>, vector<8x128xbf16>, vector<20x128xf32> -> vector<20x128xf32>
    %68 = arith.addf %63, %67 : vector<20x128xf32>
    %69 = vector.extract_strided_slice %5 {offsets = [5, 0], sizes = [20, 8], strides = [1, 1]} : vector<26x8xbf16> to vector<20x8xbf16>
    %c12 = arith.constant 12 : index
    %c0_48 = arith.constant 0 : index
    %c0_49 = arith.constant 0 : index
    %70 = vector.load %arg6[%c12, %c0_48, %c0_49] : memref<16x8x128xbf16, #tpu.memory_space<vmem>>, vector<1x8x128xbf16>
    %71 = vector.shape_cast %70 : vector<1x8x128xbf16> to vector<8x128xbf16>
    %cst_50 = arith.constant dense<0.000000e+00> : vector<20x128xf32>
    %72 = tpu.matmul %69, %71, %cst_50 {dimension_numbers = #tpu.dot_dimension_numbers<[1], [0], [0], [1], [0, 0, 1, 1], [], []>} : vector<20x8xbf16>, vector<8x128xbf16>, vector<20x128xf32> -> vector<20x128xf32>
    %73 = arith.addf %68, %72 : vector<20x128xf32>
    %74 = vector.extract_strided_slice %7 {offsets = [5, 0], sizes = [20, 8], strides = [1, 1]} : vector<26x8xbf16> to vector<20x8xbf16>
    %c13 = arith.constant 13 : index
    %c0_51 = arith.constant 0 : index
    %c0_52 = arith.constant 0 : index
    %75 = vector.load %arg6[%c13, %c0_51, %c0_52] : memref<16x8x128xbf16, #tpu.memory_space<vmem>>, vector<1x8x128xbf16>
    %76 = vector.shape_cast %75 : vector<1x8x128xbf16> to vector<8x128xbf16>
    %cst_53 = arith.constant dense<0.000000e+00> : vector<20x128xf32>
    %77 = tpu.matmul %74, %76, %cst_53 {dimension_numbers = #tpu.dot_dimension_numbers<[1], [0], [0], [1], [0, 0, 1, 1], [], []>} : vector<20x8xbf16>, vector<8x128xbf16>, vector<20x128xf32> -> vector<20x128xf32>
    %78 = arith.addf %73, %77 : vector<20x128xf32>
    %79 = vector.extract_strided_slice %5 {offsets = [6, 0], sizes = [20, 8], strides = [1, 1]} : vector<26x8xbf16> to vector<20x8xbf16>
    %c14 = arith.constant 14 : index
    %c0_54 = arith.constant 0 : index
    %c0_55 = arith.constant 0 : index
    %80 = vector.load %arg6[%c14, %c0_54, %c0_55] : memref<16x8x128xbf16, #tpu.memory_space<vmem>>, vector<1x8x128xbf16>
    %81 = vector.shape_cast %80 : vector<1x8x128xbf16> to vector<8x128xbf16>
    %cst_56 = arith.constant dense<0.000000e+00> : vector<20x128xf32>
    %82 = tpu.matmul %79, %81, %cst_56 {dimension_numbers = #tpu.dot_dimension_numbers<[1], [0], [0], [1], [0, 0, 1, 1], [], []>} : vector<20x8xbf16>, vector<8x128xbf16>, vector<20x128xf32> -> vector<20x128xf32>
    %83 = arith.addf %78, %82 : vector<20x128xf32>
    %84 = vector.extract_strided_slice %7 {offsets = [6, 0], sizes = [20, 8], strides = [1, 1]} : vector<26x8xbf16> to vector<20x8xbf16>
    %c15 = arith.constant 15 : index
    %c0_57 = arith.constant 0 : index
    %c0_58 = arith.constant 0 : index
    %85 = vector.load %arg6[%c15, %c0_57, %c0_58] : memref<16x8x128xbf16, #tpu.memory_space<vmem>>, vector<1x8x128xbf16>
    %86 = vector.shape_cast %85 : vector<1x8x128xbf16> to vector<8x128xbf16>
    %cst_59 = arith.constant dense<0.000000e+00> : vector<20x128xf32>
    %87 = tpu.matmul %84, %86, %cst_59 {dimension_numbers = #tpu.dot_dimension_numbers<[1], [0], [0], [1], [0, 0, 1, 1], [], []>} : vector<20x8xbf16>, vector<8x128xbf16>, vector<20x128xf32> -> vector<20x128xf32>
    %88 = arith.addf %83, %87 : vector<20x128xf32>
    %89 = arith.truncf %88 : vector<20x128xf32> to vector<20x128xbf16>
    %c0_60 = arith.constant 0 : index
    %c0_61 = arith.constant 0 : index
    %c0_62 = arith.constant 0 : index
    %90 = vector.load %arg7[%c0_60, %c0_61, %c0_62] : memref<1x20x128xbf16, #tpu.memory_space<vmem>>, vector<1x20x128xbf16>
    %91 = vector.shape_cast %90 : vector<1x20x128xbf16> to vector<20x128xbf16>
    %92 = vector.shape_cast %89 : vector<20x128xbf16> to vector<1x20x128xbf16>
    tpu.vector_store %arg7[%c0_60, %c0_61, %c0_62], %92 {strides = array<i32>} : memref<1x20x128xbf16, #tpu.memory_space<vmem>>, vector<1x20x128xbf16>,
    %c0_63 = arith.constant 0 : index
    %c0_64 = arith.constant 0 : index
    %93 = vector.load %arg1[%c0_63, %c0_64] : memref<20x1xf32, #tpu.memory_space<vmem>>, vector<20x1xf32>
    %94 = vector.broadcast %93 : vector<20x1xf32> to vector<20x128xf32>
    %95 = arith.mulf %88, %94 : vector<20x128xf32>
    %cst_65 = arith.constant dense<0.000000e+00> : vector<128xf32>
    %96 = vector.multi_reduction <add>, %95, %cst_65 [0] : vector<20x128xf32> to vector<128xf32>
    %97 = vector.shape_cast %96 : vector<128xf32> to vector<1x128xf32>
    %c0_66 = arith.constant 0 : index
    %c0_67 = arith.constant 0 : index
    %c0_68 = arith.constant 0 : index
    %98 = vector.load %arg8[%c0_66, %c0_67, %c0_68] : memref<1x1x128xf32, #tpu.memory_space<vmem>>, vector<1x1x128xf32>
    %99 = vector.shape_cast %98 : vector<1x1x128xf32> to vector<1x128xf32>
    %100 = vector.shape_cast %97 : vector<1x128xf32> to vector<1x1x128xf32>
    tpu.vector_store %arg8[%c0_66, %c0_67, %c0_68], %100 {strides = array<i32>} : memref<1x1x128xf32, #tpu.memory_space<vmem>>, vector<1x1x128xf32>,
    %101 = arith.mulf %95, %88 : vector<20x128xf32>
    %cst_69 = arith.constant dense<0.000000e+00> : vector<128xf32>
    %102 = vector.multi_reduction <add>, %101, %cst_69 [0] : vector<20x128xf32> to vector<128xf32>
    %103 = vector.shape_cast %102 : vector<128xf32> to vector<1x128xf32>
    %c0_70 = arith.constant 0 : index
    %c0_71 = arith.constant 0 : index
    %c0_72 = arith.constant 0 : index
    %104 = vector.load %arg9[%c0_70, %c0_71, %c0_72] : memref<1x1x128xf32, #tpu.memory_space<vmem>>, vector<1x1x128xf32>
    %105 = vector.shape_cast %104 : vector<1x1x128xf32> to vector<1x128xf32>
    %106 = vector.shape_cast %103 : vector<1x128xf32> to vector<1x1x128xf32>
    tpu.vector_store %arg9[%c0_70, %c0_71, %c0_72], %106 {strides = array<i32>} : memref<1x1x128xf32, #tpu.memory_space<vmem>>, vector<1x1x128xf32>,
    return
  }
  func.func @transform_0(%arg0: i32) -> (i32, i32) {
    %c0_i32 = arith.constant 0 : i32
    %c0_i32_0 = arith.constant 0 : i32
    %c0_i32_1 = arith.constant 0 : i32
    return %c0_i32, %c0_i32_0 : i32, i32
  }
  func.func @transform_1(%arg0: i32) -> (i32, i32, i32) {
    %c0_i32 = arith.constant 0 : i32
    %c0_i32_0 = arith.constant 0 : i32
    %c0_i32_1 = arith.constant 0 : i32
    return %arg0, %c0_i32, %c0_i32_0 : i32, i32, i32
  }
  func.func @transform_2(%arg0: i32) -> (i32, i32, i32) {
    %c0_i32 = arith.constant 0 : i32
    %c0_i32_0 = arith.constant 0 : i32
    %c0_i32_1 = arith.constant 0 : i32
    return %arg0, %c0_i32, %c0_i32_0 : i32, i32, i32
  }
  func.func @transform_3(%arg0: i32) -> (i32, i32, i32) {
    %c0_i32 = arith.constant 0 : i32
    %c0_i32_0 = arith.constant 0 : i32
    %c0_i32_1 = arith.constant 0 : i32
    return %arg0, %c0_i32, %c0_i32_0 : i32, i32, i32
  }
  func.func @transform_4(%arg0: i32) -> (i32, i32, i32) {
    %c0_i32 = arith.constant 0 : i32
    %c0_i32_0 = arith.constant 0 : i32
    %c0_i32_1 = arith.constant 0 : i32
    return %arg0, %c0_i32, %c0_i32_0 : i32, i32, i32
  }
  func.func @transform_5(%arg0: i32) -> (i32, i32, i32) {
    %c0_i32 = arith.constant 0 : i32
    %c0_i32_0 = arith.constant 0 : i32
    %c0_i32_1 = arith.constant 0 : i32
    %c0_i32_2 = arith.constant 0 : i32
    return %c0_i32, %c0_i32_0, %c0_i32_1 : i32, i32, i32
  }
  func.func @transform_6(%arg0: i32) -> (i32, i32, i32) {
    %c0_i32 = arith.constant 0 : i32
    %c0_i32_0 = arith.constant 0 : i32
    %c0_i32_1 = arith.constant 0 : i32
    return %arg0, %c0_i32, %c0_i32_0 : i32, i32, i32
  }
  func.func @transform_7(%arg0: i32) -> (i32, i32, i32) {
    %c0_i32 = arith.constant 0 : i32
    %c0_i32_0 = arith.constant 0 : i32
    %c0_i32_1 = arith.constant 0 : i32
    return %arg0, %c0_i32, %c0_i32_0 : i32, i32, i32
  }
  func.func @transform_8(%arg0: i32) -> (i32, i32, i32) {
    %c0_i32 = arith.constant 0 : i32
    %c0_i32_0 = arith.constant 0 : i32
    %c0_i32_1 = arith.constant 0 : i32
    return %arg0, %c0_i32, %c0_i32_0 : i32, i32, i32
  }
}

module attributes {stable_mosaic.version = 11 : i64} {
  func.func @_bn_act_kernel(%arg0: i32, %arg1: memref<40x128xbf16, #tpu.memory_space<vmem>>, %arg2: memref<1x128xf32, #tpu.memory_space<vmem>>, %arg3: memref<1x128xf32, #tpu.memory_space<vmem>>, %arg4: memref<40x128xbf16, #tpu.memory_space<vmem>>) attributes {dimension_semantics = [#tpu.dimension_semantics<parallel>], iteration_bounds = array<i64: 1>, scalar_prefetch = 0 : i64, scratch_operands = 0 : i64, tpu.core_type = #tpu.core_type<tc>, window_params = [{transform_indices = @transform_0, window_bounds = array<i64: 40, 128>}, {pipeline_mode = #tpu.pipeline_mode<synchronous>, transform_indices = @transform_1, window_bounds = array<i64: 1, 128>}, {pipeline_mode = #tpu.pipeline_mode<synchronous>, transform_indices = @transform_2, window_bounds = array<i64: 1, 128>}, {transform_indices = @transform_3, window_bounds = array<i64: 40, 128>}]} {
    %c0 = arith.constant 0 : index
    %c0_0 = arith.constant 0 : index
    %0 = vector.load %arg1[%c0, %c0_0] : memref<40x128xbf16, #tpu.memory_space<vmem>>, vector<40x128xbf16>
    %1 = arith.extf %0 : vector<40x128xbf16> to vector<40x128xf32>
    %c0_1 = arith.constant 0 : index
    %c0_2 = arith.constant 0 : index
    %2 = vector.load %arg2[%c0_1, %c0_2] : memref<1x128xf32, #tpu.memory_space<vmem>>, vector<1x128xf32>
    %3 = vector.broadcast %2 : vector<1x128xf32> to vector<40x128xf32>
    %4 = arith.mulf %1, %3 : vector<40x128xf32>
    %c0_3 = arith.constant 0 : index
    %c0_4 = arith.constant 0 : index
    %5 = vector.load %arg3[%c0_3, %c0_4] : memref<1x128xf32, #tpu.memory_space<vmem>>, vector<1x128xf32>
    %6 = vector.broadcast %5 : vector<1x128xf32> to vector<40x128xf32>
    %7 = arith.addf %4, %6 : vector<40x128xf32>
    %cst = arith.constant 0.000000e+00 : f32
    %8 = vector.broadcast %cst : f32 to vector<40x128xf32>
    %9 = arith.cmpf ogt, %7, %8 : vector<40x128xf32>
    %cst_5 = arith.constant 2.000000e-01 : f32
    %10 = vector.broadcast %cst_5 : f32 to vector<40x128xf32>
    %11 = arith.mulf %10, %7 : vector<40x128xf32>
    %12 = arith.select %9, %7, %11 : vector<40x128xi1>, vector<40x128xf32>
    %13 = arith.truncf %12 : vector<40x128xf32> to vector<40x128xbf16>
    %c0_6 = arith.constant 0 : index
    %c0_7 = arith.constant 0 : index
    %14 = vector.load %arg4[%c0_6, %c0_7] : memref<40x128xbf16, #tpu.memory_space<vmem>>, vector<40x128xbf16>
    tpu.vector_store %arg4[%c0_6, %c0_7], %13 {strides = array<i32>} : memref<40x128xbf16, #tpu.memory_space<vmem>>, vector<40x128xbf16>,
    return
  }
  func.func @transform_0(%arg0: i32) -> (i32, i32) {
    %c0_i32 = arith.constant 0 : i32
    %c0_i32_0 = arith.constant 0 : i32
    return %arg0, %c0_i32 : i32, i32
  }
  func.func @transform_1(%arg0: i32) -> (i32, i32) {
    %c0_i32 = arith.constant 0 : i32
    %c0_i32_0 = arith.constant 0 : i32
    %c0_i32_1 = arith.constant 0 : i32
    return %c0_i32, %c0_i32_0 : i32, i32
  }
  func.func @transform_2(%arg0: i32) -> (i32, i32) {
    %c0_i32 = arith.constant 0 : i32
    %c0_i32_0 = arith.constant 0 : i32
    %c0_i32_1 = arith.constant 0 : i32
    return %c0_i32, %c0_i32_0 : i32, i32
  }
  func.func @transform_3(%arg0: i32) -> (i32, i32) {
    %c0_i32 = arith.constant 0 : i32
    %c0_i32_0 = arith.constant 0 : i32
    return %arg0, %c0_i32 : i32, i32
  }
}

module attributes {stable_mosaic.version = 11 : i64} {
  func.func @_conv_stats_kernel(%arg0: i32, %arg1: memref<6x1xf32, #tpu.memory_space<vmem>>, %arg2: memref<1x10x16xbf16, #tpu.memory_space<vmem>>, %arg3: memref<1x10x16xbf16, #tpu.memory_space<vmem>>, %arg4: memref<1x10x16xbf16, #tpu.memory_space<vmem>>, %arg5: memref<1x10x16xbf16, #tpu.memory_space<vmem>>, %arg6: memref<16x16x128xbf16, #tpu.memory_space<vmem>>, %arg7: memref<1x6x128xbf16, #tpu.memory_space<vmem>>, %arg8: memref<1x1x128xf32, #tpu.memory_space<vmem>>, %arg9: memref<1x1x128xf32, #tpu.memory_space<vmem>>) attributes {dimension_semantics = [#tpu.dimension_semantics<parallel>], iteration_bounds = array<i64: 2>, scalar_prefetch = 0 : i64, scratch_operands = 0 : i64, tpu.core_type = #tpu.core_type<tc>, window_params = [{pipeline_mode = #tpu.pipeline_mode<synchronous>, transform_indices = @transform_0, window_bounds = array<i64: 6, 1>}, {transform_indices = @transform_1, window_bounds = array<i64: 1, 10, 16>}, {transform_indices = @transform_2, window_bounds = array<i64: 1, 10, 16>}, {transform_indices = @transform_3, window_bounds = array<i64: 1, 10, 16>}, {transform_indices = @transform_4, window_bounds = array<i64: 1, 10, 16>}, {pipeline_mode = #tpu.pipeline_mode<synchronous>, transform_indices = @transform_5, window_bounds = array<i64: 16, 16, 128>}, {transform_indices = @transform_6, window_bounds = array<i64: 1, 6, 128>}, {transform_indices = @transform_7, window_bounds = array<i64: 1, 1, 128>}, {transform_indices = @transform_8, window_bounds = array<i64: 1, 1, 128>}]} {
    %c0 = arith.constant 0 : index
    %c0_0 = arith.constant 0 : index
    %c0_1 = arith.constant 0 : index
    %0 = vector.load %arg2[%c0, %c0_0, %c0_1] : memref<1x10x16xbf16, #tpu.memory_space<vmem>>, vector<1x10x16xbf16>
    %1 = vector.shape_cast %0 : vector<1x10x16xbf16> to vector<10x16xbf16>
    %c0_2 = arith.constant 0 : index
    %c0_3 = arith.constant 0 : index
    %c0_4 = arith.constant 0 : index
    %2 = vector.load %arg3[%c0_2, %c0_3, %c0_4] : memref<1x10x16xbf16, #tpu.memory_space<vmem>>, vector<1x10x16xbf16>
    %3 = vector.shape_cast %2 : vector<1x10x16xbf16> to vector<10x16xbf16>
    %c0_5 = arith.constant 0 : index
    %c0_6 = arith.constant 0 : index
    %c0_7 = arith.constant 0 : index
    %4 = vector.load %arg4[%c0_5, %c0_6, %c0_7] : memref<1x10x16xbf16, #tpu.memory_space<vmem>>, vector<1x10x16xbf16>
    %5 = vector.shape_cast %4 : vector<1x10x16xbf16> to vector<10x16xbf16>
    %c0_8 = arith.constant 0 : index
    %c0_9 = arith.constant 0 : index
    %c0_10 = arith.constant 0 : index
    %6 = vector.load %arg5[%c0_8, %c0_9, %c0_10] : memref<1x10x16xbf16, #tpu.memory_space<vmem>>, vector<1x10x16xbf16>
    %7 = vector.shape_cast %6 : vector<1x10x16xbf16> to vector<10x16xbf16>
    %cst = arith.constant 0.000000e+00 : f32
    %8 = vector.broadcast %cst : f32 to vector<6x128xf32>
    %9 = vector.extract_strided_slice %1 {offsets = [0, 0], sizes = [6, 16], strides = [1, 1]} : vector<10x16xbf16> to vector<6x16xbf16>
    %c0_11 = arith.constant 0 : index
    %c0_12 = arith.constant 0 : index
    %c0_13 = arith.constant 0 : index
    %10 = vector.load %arg6[%c0_11, %c0_12, %c0_13] : memref<16x16x128xbf16, #tpu.memory_space<vmem>>, vector<1x16x128xbf16>
    %11 = vector.shape_cast %10 : vector<1x16x128xbf16> to vector<16x128xbf16>
    %cst_14 = arith.constant dense<0.000000e+00> : vector<6x128xf32>
    %12 = tpu.matmul %9, %11, %cst_14 {dimension_numbers = #tpu.dot_dimension_numbers<[1], [0], [0], [1], [0, 0, 1, 1], [], []>} : vector<6x16xbf16>, vector<16x128xbf16>, vector<6x128xf32> -> vector<6x128xf32>
    %13 = arith.addf %8, %12 : vector<6x128xf32>
    %14 = vector.extract_strided_slice %3 {offsets = [0, 0], sizes = [6, 16], strides = [1, 1]} : vector<10x16xbf16> to vector<6x16xbf16>
    %c1 = arith.constant 1 : index
    %c0_15 = arith.constant 0 : index
    %c0_16 = arith.constant 0 : index
    %15 = vector.load %arg6[%c1, %c0_15, %c0_16] : memref<16x16x128xbf16, #tpu.memory_space<vmem>>, vector<1x16x128xbf16>
    %16 = vector.shape_cast %15 : vector<1x16x128xbf16> to vector<16x128xbf16>
    %cst_17 = arith.constant dense<0.000000e+00> : vector<6x128xf32>
    %17 = tpu.matmul %14, %16, %cst_17 {dimension_numbers = #tpu.dot_dimension_numbers<[1], [0], [0], [1], [0, 0, 1, 1], [], []>} : vector<6x16xbf16>, vector<16x128xbf16>, vector<6x128xf32> -> vector<6x128xf32>
    %18 = arith.addf %13, %17 : vector<6x128xf32>
    %19 = vector.extract_strided_slice %1 {offsets = [1, 0], sizes = [6, 16], strides = [1, 1]} : vector<10x16xbf16> to vector<6x16xbf16>
    %c2 = arith.constant 2 : index
    %c0_18 = arith.constant 0 : index
    %c0_19 = arith.constant 0 : index
    %20 = vector.load %arg6[%c2, %c0_18, %c0_19] : memref<16x16x128xbf16, #tpu.memory_space<vmem>>, vector<1x16x128xbf16>
    %21 = vector.shape_cast %20 : vector<1x16x128xbf16> to vector<16x128xbf16>
    %cst_20 = arith.constant dense<0.000000e+00> : vector<6x128xf32>
    %22 = tpu.matmul %19, %21, %cst_20 {dimension_numbers = #tpu.dot_dimension_numbers<[1], [0], [0], [1], [0, 0, 1, 1], [], []>} : vector<6x16xbf16>, vector<16x128xbf16>, vector<6x128xf32> -> vector<6x128xf32>
    %23 = arith.addf %18, %22 : vector<6x128xf32>
    %24 = vector.extract_strided_slice %3 {offsets = [1, 0], sizes = [6, 16], strides = [1, 1]} : vector<10x16xbf16> to vector<6x16xbf16>
    %c3 = arith.constant 3 : index
    %c0_21 = arith.constant 0 : index
    %c0_22 = arith.constant 0 : index
    %25 = vector.load %arg6[%c3, %c0_21, %c0_22] : memref<16x16x128xbf16, #tpu.memory_space<vmem>>, vector<1x16x128xbf16>
    %26 = vector.shape_cast %25 : vector<1x16x128xbf16> to vector<16x128xbf16>
    %cst_23 = arith.constant dense<0.000000e+00> : vector<6x128xf32>
    %27 = tpu.matmul %24, %26, %cst_23 {dimension_numbers = #tpu.dot_dimension_numbers<[1], [0], [0], [1], [0, 0, 1, 1], [], []>} : vector<6x16xbf16>, vector<16x128xbf16>, vector<6x128xf32> -> vector<6x128xf32>
    %28 = arith.addf %23, %27 : vector<6x128xf32>
    %29 = vector.extract_strided_slice %5 {offsets = [0, 0], sizes = [6, 16], strides = [1, 1]} : vector<10x16xbf16> to vector<6x16xbf16>
    %c4 = arith.constant 4 : index
    %c0_24 = arith.constant 0 : index
    %c0_25 = arith.constant 0 : index
    %30 = vector.load %arg6[%c4, %c0_24, %c0_25] : memref<16x16x128xbf16, #tpu.memory_space<vmem>>, vector<1x16x128xbf16>
    %31 = vector.shape_cast %30 : vector<1x16x128xbf16> to vector<16x128xbf16>
    %cst_26 = arith.constant dense<0.000000e+00> : vector<6x128xf32>
    %32 = tpu.matmul %29, %31, %cst_26 {dimension_numbers = #tpu.dot_dimension_numbers<[1], [0], [0], [1], [0, 0, 1, 1], [], []>} : vector<6x16xbf16>, vector<16x128xbf16>, vector<6x128xf32> -> vector<6x128xf32>
    %33 = arith.addf %28, %32 : vector<6x128xf32>
    %34 = vector.extract_strided_slice %7 {offsets = [0, 0], sizes = [6, 16], strides = [1, 1]} : vector<10x16xbf16> to vector<6x16xbf16>
    %c5 = arith.constant 5 : index
    %c0_27 = arith.constant 0 : index
    %c0_28 = arith.constant 0 : index
    %35 = vector.load %arg6[%c5, %c0_27, %c0_28] : memref<16x16x128xbf16, #tpu.memory_space<vmem>>, vector<1x16x128xbf16>
    %36 = vector.shape_cast %35 : vector<1x16x128xbf16> to vector<16x128xbf16>
    %cst_29 = arith.constant dense<0.000000e+00> : vector<6x128xf32>
    %37 = tpu.matmul %34, %36, %cst_29 {dimension_numbers = #tpu.dot_dimension_numbers<[1], [0], [0], [1], [0, 0, 1, 1], [], []>} : vector<6x16xbf16>, vector<16x128xbf16>, vector<6x128xf32> -> vector<6x128xf32>
    %38 = arith.addf %33, %37 : vector<6x128xf32>
    %39 = vector.extract_strided_slice %5 {offsets = [1, 0], sizes = [6, 16], strides = [1, 1]} : vector<10x16xbf16> to vector<6x16xbf16>
    %c6 = arith.constant 6 : index
    %c0_30 = arith.constant 0 : index
    %c0_31 = arith.constant 0 : index
    %40 = vector.load %arg6[%c6, %c0_30, %c0_31] : memref<16x16x128xbf16, #tpu.memory_space<vmem>>, vector<1x16x128xbf16>
    %41 = vector.shape_cast %40 : vector<1x16x128xbf16> to vector<16x128xbf16>
    %cst_32 = arith.constant dense<0.000000e+00> : vector<6x128xf32>
    %42 = tpu.matmul %39, %41, %cst_32 {dimension_numbers = #tpu.dot_dimension_numbers<[1], [0], [0], [1], [0, 0, 1, 1], [], []>} : vector<6x16xbf16>, vector<16x128xbf16>, vector<6x128xf32> -> vector<6x128xf32>
    %43 = arith.addf %38, %42 : vector<6x128xf32>
    %44 = vector.extract_strided_slice %7 {offsets = [1, 0], sizes = [6, 16], strides = [1, 1]} : vector<10x16xbf16> to vector<6x16xbf16>
    %c7 = arith.constant 7 : index
    %c0_33 = arith.constant 0 : index
    %c0_34 = arith.constant 0 : index
    %45 = vector.load %arg6[%c7, %c0_33, %c0_34] : memref<16x16x128xbf16, #tpu.memory_space<vmem>>, vector<1x16x128xbf16>
    %46 = vector.shape_cast %45 : vector<1x16x128xbf16> to vector<16x128xbf16>
    %cst_35 = arith.constant dense<0.000000e+00> : vector<6x128xf32>
    %47 = tpu.matmul %44, %46, %cst_35 {dimension_numbers = #tpu.dot_dimension_numbers<[1], [0], [0], [1], [0, 0, 1, 1], [], []>} : vector<6x16xbf16>, vector<16x128xbf16>, vector<6x128xf32> -> vector<6x128xf32>
    %48 = arith.addf %43, %47 : vector<6x128xf32>
    %49 = vector.extract_strided_slice %1 {offsets = [3, 0], sizes = [6, 16], strides = [1, 1]} : vector<10x16xbf16> to vector<6x16xbf16>
    %c8 = arith.constant 8 : index
    %c0_36 = arith.constant 0 : index
    %c0_37 = arith.constant 0 : index
    %50 = vector.load %arg6[%c8, %c0_36, %c0_37] : memref<16x16x128xbf16, #tpu.memory_space<vmem>>, vector<1x16x128xbf16>
    %51 = vector.shape_cast %50 : vector<1x16x128xbf16> to vector<16x128xbf16>
    %cst_38 = arith.constant dense<0.000000e+00> : vector<6x128xf32>
    %52 = tpu.matmul %49, %51, %cst_38 {dimension_numbers = #tpu.dot_dimension_numbers<[1], [0], [0], [1], [0, 0, 1, 1], [], []>} : vector<6x16xbf16>, vector<16x128xbf16>, vector<6x128xf32> -> vector<6x128xf32>
    %53 = arith.addf %48, %52 : vector<6x128xf32>
    %54 = vector.extract_strided_slice %3 {offsets = [3, 0], sizes = [6, 16], strides = [1, 1]} : vector<10x16xbf16> to vector<6x16xbf16>
    %c9 = arith.constant 9 : index
    %c0_39 = arith.constant 0 : index
    %c0_40 = arith.constant 0 : index
    %55 = vector.load %arg6[%c9, %c0_39, %c0_40] : memref<16x16x128xbf16, #tpu.memory_space<vmem>>, vector<1x16x128xbf16>
    %56 = vector.shape_cast %55 : vector<1x16x128xbf16> to vector<16x128xbf16>
    %cst_41 = arith.constant dense<0.000000e+00> : vector<6x128xf32>
    %57 = tpu.matmul %54, %56, %cst_41 {dimension_numbers = #tpu.dot_dimension_numbers<[1], [0], [0], [1], [0, 0, 1, 1], [], []>} : vector<6x16xbf16>, vector<16x128xbf16>, vector<6x128xf32> -> vector<6x128xf32>
    %58 = arith.addf %53, %57 : vector<6x128xf32>
    %59 = vector.extract_strided_slice %1 {offsets = [4, 0], sizes = [6, 16], strides = [1, 1]} : vector<10x16xbf16> to vector<6x16xbf16>
    %c10 = arith.constant 10 : index
    %c0_42 = arith.constant 0 : index
    %c0_43 = arith.constant 0 : index
    %60 = vector.load %arg6[%c10, %c0_42, %c0_43] : memref<16x16x128xbf16, #tpu.memory_space<vmem>>, vector<1x16x128xbf16>
    %61 = vector.shape_cast %60 : vector<1x16x128xbf16> to vector<16x128xbf16>
    %cst_44 = arith.constant dense<0.000000e+00> : vector<6x128xf32>
    %62 = tpu.matmul %59, %61, %cst_44 {dimension_numbers = #tpu.dot_dimension_numbers<[1], [0], [0], [1], [0, 0, 1, 1], [], []>} : vector<6x16xbf16>, vector<16x128xbf16>, vector<6x128xf32> -> vector<6x128xf32>
    %63 = arith.addf %58, %62 : vector<6x128xf32>
    %64 = vector.extract_strided_slice %3 {offsets = [4, 0], sizes = [6, 16], strides = [1, 1]} : vector<10x16xbf16> to vector<6x16xbf16>
    %c11 = arith.constant 11 : index
    %c0_45 = arith.constant 0 : index
    %c0_46 = arith.constant 0 : index
    %65 = vector.load %arg6[%c11, %c0_45, %c0_46] : memref<16x16x128xbf16, #tpu.memory_space<vmem>>, vector<1x16x128xbf16>
    %66 = vector.shape_cast %65 : vector<1x16x128xbf16> to vector<16x128xbf16>
    %cst_47 = arith.constant dense<0.000000e+00> : vector<6x128xf32>
    %67 = tpu.matmul %64, %66, %cst_47 {dimension_numbers = #tpu.dot_dimension_numbers<[1], [0], [0], [1], [0, 0, 1, 1], [], []>} : vector<6x16xbf16>, vector<16x128xbf16>, vector<6x128xf32> -> vector<6x128xf32>
    %68 = arith.addf %63, %67 : vector<6x128xf32>
    %69 = vector.extract_strided_slice %5 {offsets = [3, 0], sizes = [6, 16], strides = [1, 1]} : vector<10x16xbf16> to vector<6x16xbf16>
    %c12 = arith.constant 12 : index
    %c0_48 = arith.constant 0 : index
    %c0_49 = arith.constant 0 : index
    %70 = vector.load %arg6[%c12, %c0_48, %c0_49] : memref<16x16x128xbf16, #tpu.memory_space<vmem>>, vector<1x16x128xbf16>
    %71 = vector.shape_cast %70 : vector<1x16x128xbf16> to vector<16x128xbf16>
    %cst_50 = arith.constant dense<0.000000e+00> : vector<6x128xf32>
    %72 = tpu.matmul %69, %71, %cst_50 {dimension_numbers = #tpu.dot_dimension_numbers<[1], [0], [0], [1], [0, 0, 1, 1], [], []>} : vector<6x16xbf16>, vector<16x128xbf16>, vector<6x128xf32> -> vector<6x128xf32>
    %73 = arith.addf %68, %72 : vector<6x128xf32>
    %74 = vector.extract_strided_slice %7 {offsets = [3, 0], sizes = [6, 16], strides = [1, 1]} : vector<10x16xbf16> to vector<6x16xbf16>
    %c13 = arith.constant 13 : index
    %c0_51 = arith.constant 0 : index
    %c0_52 = arith.constant 0 : index
    %75 = vector.load %arg6[%c13, %c0_51, %c0_52] : memref<16x16x128xbf16, #tpu.memory_space<vmem>>, vector<1x16x128xbf16>
    %76 = vector.shape_cast %75 : vector<1x16x128xbf16> to vector<16x128xbf16>
    %cst_53 = arith.constant dense<0.000000e+00> : vector<6x128xf32>
    %77 = tpu.matmul %74, %76, %cst_53 {dimension_numbers = #tpu.dot_dimension_numbers<[1], [0], [0], [1], [0, 0, 1, 1], [], []>} : vector<6x16xbf16>, vector<16x128xbf16>, vector<6x128xf32> -> vector<6x128xf32>
    %78 = arith.addf %73, %77 : vector<6x128xf32>
    %79 = vector.extract_strided_slice %5 {offsets = [4, 0], sizes = [6, 16], strides = [1, 1]} : vector<10x16xbf16> to vector<6x16xbf16>
    %c14 = arith.constant 14 : index
    %c0_54 = arith.constant 0 : index
    %c0_55 = arith.constant 0 : index
    %80 = vector.load %arg6[%c14, %c0_54, %c0_55] : memref<16x16x128xbf16, #tpu.memory_space<vmem>>, vector<1x16x128xbf16>
    %81 = vector.shape_cast %80 : vector<1x16x128xbf16> to vector<16x128xbf16>
    %cst_56 = arith.constant dense<0.000000e+00> : vector<6x128xf32>
    %82 = tpu.matmul %79, %81, %cst_56 {dimension_numbers = #tpu.dot_dimension_numbers<[1], [0], [0], [1], [0, 0, 1, 1], [], []>} : vector<6x16xbf16>, vector<16x128xbf16>, vector<6x128xf32> -> vector<6x128xf32>
    %83 = arith.addf %78, %82 : vector<6x128xf32>
    %84 = vector.extract_strided_slice %7 {offsets = [4, 0], sizes = [6, 16], strides = [1, 1]} : vector<10x16xbf16> to vector<6x16xbf16>
    %c15 = arith.constant 15 : index
    %c0_57 = arith.constant 0 : index
    %c0_58 = arith.constant 0 : index
    %85 = vector.load %arg6[%c15, %c0_57, %c0_58] : memref<16x16x128xbf16, #tpu.memory_space<vmem>>, vector<1x16x128xbf16>
    %86 = vector.shape_cast %85 : vector<1x16x128xbf16> to vector<16x128xbf16>
    %cst_59 = arith.constant dense<0.000000e+00> : vector<6x128xf32>
    %87 = tpu.matmul %84, %86, %cst_59 {dimension_numbers = #tpu.dot_dimension_numbers<[1], [0], [0], [1], [0, 0, 1, 1], [], []>} : vector<6x16xbf16>, vector<16x128xbf16>, vector<6x128xf32> -> vector<6x128xf32>
    %88 = arith.addf %83, %87 : vector<6x128xf32>
    %89 = arith.truncf %88 : vector<6x128xf32> to vector<6x128xbf16>
    %c0_60 = arith.constant 0 : index
    %c0_61 = arith.constant 0 : index
    %c0_62 = arith.constant 0 : index
    %90 = vector.load %arg7[%c0_60, %c0_61, %c0_62] : memref<1x6x128xbf16, #tpu.memory_space<vmem>>, vector<1x6x128xbf16>
    %91 = vector.shape_cast %90 : vector<1x6x128xbf16> to vector<6x128xbf16>
    %92 = vector.shape_cast %89 : vector<6x128xbf16> to vector<1x6x128xbf16>
    tpu.vector_store %arg7[%c0_60, %c0_61, %c0_62], %92 {strides = array<i32>} : memref<1x6x128xbf16, #tpu.memory_space<vmem>>, vector<1x6x128xbf16>,
    %c0_63 = arith.constant 0 : index
    %c0_64 = arith.constant 0 : index
    %93 = vector.load %arg1[%c0_63, %c0_64] : memref<6x1xf32, #tpu.memory_space<vmem>>, vector<6x1xf32>
    %94 = vector.broadcast %93 : vector<6x1xf32> to vector<6x128xf32>
    %95 = arith.mulf %88, %94 : vector<6x128xf32>
    %cst_65 = arith.constant dense<0.000000e+00> : vector<128xf32>
    %96 = vector.multi_reduction <add>, %95, %cst_65 [0] : vector<6x128xf32> to vector<128xf32>
    %97 = vector.shape_cast %96 : vector<128xf32> to vector<1x128xf32>
    %c0_66 = arith.constant 0 : index
    %c0_67 = arith.constant 0 : index
    %c0_68 = arith.constant 0 : index
    %98 = vector.load %arg8[%c0_66, %c0_67, %c0_68] : memref<1x1x128xf32, #tpu.memory_space<vmem>>, vector<1x1x128xf32>
    %99 = vector.shape_cast %98 : vector<1x1x128xf32> to vector<1x128xf32>
    %100 = vector.shape_cast %97 : vector<1x128xf32> to vector<1x1x128xf32>
    tpu.vector_store %arg8[%c0_66, %c0_67, %c0_68], %100 {strides = array<i32>} : memref<1x1x128xf32, #tpu.memory_space<vmem>>, vector<1x1x128xf32>,
    %101 = arith.mulf %95, %88 : vector<6x128xf32>
    %cst_69 = arith.constant dense<0.000000e+00> : vector<128xf32>
    %102 = vector.multi_reduction <add>, %101, %cst_69 [0] : vector<6x128xf32> to vector<128xf32>
    %103 = vector.shape_cast %102 : vector<128xf32> to vector<1x128xf32>
    %c0_70 = arith.constant 0 : index
    %c0_71 = arith.constant 0 : index
    %c0_72 = arith.constant 0 : index
    %104 = vector.load %arg9[%c0_70, %c0_71, %c0_72] : memref<1x1x128xf32, #tpu.memory_space<vmem>>, vector<1x1x128xf32>
    %105 = vector.shape_cast %104 : vector<1x1x128xf32> to vector<1x128xf32>
    %106 = vector.shape_cast %103 : vector<1x128xf32> to vector<1x1x128xf32>
    tpu.vector_store %arg9[%c0_70, %c0_71, %c0_72], %106 {strides = array<i32>} : memref<1x1x128xf32, #tpu.memory_space<vmem>>, vector<1x1x128xf32>,
    return
  }
  func.func @transform_0(%arg0: i32) -> (i32, i32) {
    %c0_i32 = arith.constant 0 : i32
    %c0_i32_0 = arith.constant 0 : i32
    %c0_i32_1 = arith.constant 0 : i32
    return %c0_i32, %c0_i32_0 : i32, i32
  }
  func.func @transform_1(%arg0: i32) -> (i32, i32, i32) {
    %c0_i32 = arith.constant 0 : i32
    %c0_i32_0 = arith.constant 0 : i32
    %c0_i32_1 = arith.constant 0 : i32
    return %arg0, %c0_i32, %c0_i32_0 : i32, i32, i32
  }
  func.func @transform_2(%arg0: i32) -> (i32, i32, i32) {
    %c0_i32 = arith.constant 0 : i32
    %c0_i32_0 = arith.constant 0 : i32
    %c0_i32_1 = arith.constant 0 : i32
    return %arg0, %c0_i32, %c0_i32_0 : i32, i32, i32
  }
  func.func @transform_3(%arg0: i32) -> (i32, i32, i32) {
    %c0_i32 = arith.constant 0 : i32
    %c0_i32_0 = arith.constant 0 : i32
    %c0_i32_1 = arith.constant 0 : i32
    return %arg0, %c0_i32, %c0_i32_0 : i32, i32, i32
  }
  func.func @transform_4(%arg0: i32) -> (i32, i32, i32) {
    %c0_i32 = arith.constant 0 : i32
    %c0_i32_0 = arith.constant 0 : i32
    %c0_i32_1 = arith.constant 0 : i32
    return %arg0, %c0_i32, %c0_i32_0 : i32, i32, i32
  }
  func.func @transform_5(%arg0: i32) -> (i32, i32, i32) {
    %c0_i32 = arith.constant 0 : i32
    %c0_i32_0 = arith.constant 0 : i32
    %c0_i32_1 = arith.constant 0 : i32
    %c0_i32_2 = arith.constant 0 : i32
    return %c0_i32, %c0_i32_0, %c0_i32_1 : i32, i32, i32
  }
  func.func @transform_6(%arg0: i32) -> (i32, i32, i32) {
    %c0_i32 = arith.constant 0 : i32
    %c0_i32_0 = arith.constant 0 : i32
    %c0_i32_1 = arith.constant 0 : i32
    return %arg0, %c0_i32, %c0_i32_0 : i32, i32, i32
  }
  func.func @transform_7(%arg0: i32) -> (i32, i32, i32) {
    %c0_i32 = arith.constant 0 : i32
    %c0_i32_0 = arith.constant 0 : i32
    %c0_i32_1 = arith.constant 0 : i32
    return %arg0, %c0_i32, %c0_i32_0 : i32, i32, i32
  }
  func.func @transform_8(%arg0: i32) -> (i32, i32, i32) {
    %c0_i32 = arith.constant 0 : i32
    %c0_i32_0 = arith.constant 0 : i32
    %c0_i32_1 = arith.constant 0 : i32
    return %arg0, %c0_i32, %c0_i32_0 : i32, i32, i32
  }
}

module attributes {stable_mosaic.version = 11 : i64} {
  func.func @_bn_act_kernel(%arg0: i32, %arg1: memref<16x128xbf16, #tpu.memory_space<vmem>>, %arg2: memref<1x128xf32, #tpu.memory_space<vmem>>, %arg3: memref<1x128xf32, #tpu.memory_space<vmem>>, %arg4: memref<16x128xbf16, #tpu.memory_space<vmem>>) attributes {dimension_semantics = [#tpu.dimension_semantics<parallel>], iteration_bounds = array<i64: 1>, scalar_prefetch = 0 : i64, scratch_operands = 0 : i64, tpu.core_type = #tpu.core_type<tc>, window_params = [{transform_indices = @transform_0, window_bounds = array<i64: 16, 128>}, {pipeline_mode = #tpu.pipeline_mode<synchronous>, transform_indices = @transform_1, window_bounds = array<i64: 1, 128>}, {pipeline_mode = #tpu.pipeline_mode<synchronous>, transform_indices = @transform_2, window_bounds = array<i64: 1, 128>}, {transform_indices = @transform_3, window_bounds = array<i64: 16, 128>}]} {
    %c0 = arith.constant 0 : index
    %c0_0 = arith.constant 0 : index
    %0 = vector.load %arg1[%c0, %c0_0] : memref<16x128xbf16, #tpu.memory_space<vmem>>, vector<16x128xbf16>
    %1 = arith.extf %0 : vector<16x128xbf16> to vector<16x128xf32>
    %c0_1 = arith.constant 0 : index
    %c0_2 = arith.constant 0 : index
    %2 = vector.load %arg2[%c0_1, %c0_2] : memref<1x128xf32, #tpu.memory_space<vmem>>, vector<1x128xf32>
    %3 = vector.broadcast %2 : vector<1x128xf32> to vector<16x128xf32>
    %4 = arith.mulf %1, %3 : vector<16x128xf32>
    %c0_3 = arith.constant 0 : index
    %c0_4 = arith.constant 0 : index
    %5 = vector.load %arg3[%c0_3, %c0_4] : memref<1x128xf32, #tpu.memory_space<vmem>>, vector<1x128xf32>
    %6 = vector.broadcast %5 : vector<1x128xf32> to vector<16x128xf32>
    %7 = arith.addf %4, %6 : vector<16x128xf32>
    %cst = arith.constant 0.000000e+00 : f32
    %8 = vector.broadcast %cst : f32 to vector<16x128xf32>
    %9 = arith.cmpf ogt, %7, %8 : vector<16x128xf32>
    %cst_5 = arith.constant 2.000000e-01 : f32
    %10 = vector.broadcast %cst_5 : f32 to vector<16x128xf32>
    %11 = arith.mulf %10, %7 : vector<16x128xf32>
    %12 = arith.select %9, %7, %11 : vector<16x128xi1>, vector<16x128xf32>
    %13 = arith.truncf %12 : vector<16x128xf32> to vector<16x128xbf16>
    %c0_6 = arith.constant 0 : index
    %c0_7 = arith.constant 0 : index
    %14 = vector.load %arg4[%c0_6, %c0_7] : memref<16x128xbf16, #tpu.memory_space<vmem>>, vector<16x128xbf16>
    tpu.vector_store %arg4[%c0_6, %c0_7], %13 {strides = array<i32>} : memref<16x128xbf16, #tpu.memory_space<vmem>>, vector<16x128xbf16>,
    return
  }
  func.func @transform_0(%arg0: i32) -> (i32, i32) {
    %c0_i32 = arith.constant 0 : i32
    %c0_i32_0 = arith.constant 0 : i32
    return %arg0, %c0_i32 : i32, i32
  }
  func.func @transform_1(%arg0: i32) -> (i32, i32) {
    %c0_i32 = arith.constant 0 : i32
    %c0_i32_0 = arith.constant 0 : i32
    %c0_i32_1 = arith.constant 0 : i32
    return %c0_i32, %c0_i32_0 : i32, i32
  }
  func.func @transform_2(%arg0: i32) -> (i32, i32) {
    %c0_i32 = arith.constant 0 : i32
    %c0_i32_0 = arith.constant 0 : i32
    %c0_i32_1 = arith.constant 0 : i32
    return %c0_i32, %c0_i32_0 : i32, i32
  }
  func.func @transform_3(%arg0: i32) -> (i32, i32) {
    %c0_i32 = arith.constant 0 : i32
    %c0_i32_0 = arith.constant 0 : i32
    return %arg0, %c0_i32 : i32, i32
  }
}

module attributes {stable_mosaic.version = 11 : i64} {
  func.func @_conv_kernel(%arg0: i32, %arg1: memref<1x5x32xbf16, #tpu.memory_space<vmem>>, %arg2: memref<1x5x32xbf16, #tpu.memory_space<vmem>>, %arg3: memref<1x5x32xbf16, #tpu.memory_space<vmem>>, %arg4: memref<1x5x32xbf16, #tpu.memory_space<vmem>>, %arg5: memref<16x32x128xbf16, #tpu.memory_space<vmem>>, %arg6: memref<1x2x128xf32, #tpu.memory_space<vmem>>) attributes {dimension_semantics = [#tpu.dimension_semantics<parallel>], iteration_bounds = array<i64: 2>, scalar_prefetch = 0 : i64, scratch_operands = 0 : i64, tpu.core_type = #tpu.core_type<tc>, window_params = [{transform_indices = @transform_0, window_bounds = array<i64: 1, 5, 32>}, {transform_indices = @transform_1, window_bounds = array<i64: 1, 5, 32>}, {transform_indices = @transform_2, window_bounds = array<i64: 1, 5, 32>}, {transform_indices = @transform_3, window_bounds = array<i64: 1, 5, 32>}, {pipeline_mode = #tpu.pipeline_mode<synchronous>, transform_indices = @transform_4, window_bounds = array<i64: 16, 32, 128>}, {transform_indices = @transform_5, window_bounds = array<i64: 1, 2, 128>}]} {
    %c0 = arith.constant 0 : index
    %c0_0 = arith.constant 0 : index
    %c0_1 = arith.constant 0 : index
    %0 = vector.load %arg1[%c0, %c0_0, %c0_1] : memref<1x5x32xbf16, #tpu.memory_space<vmem>>, vector<1x5x32xbf16>
    %1 = vector.shape_cast %0 : vector<1x5x32xbf16> to vector<5x32xbf16>
    %c0_2 = arith.constant 0 : index
    %c0_3 = arith.constant 0 : index
    %c0_4 = arith.constant 0 : index
    %2 = vector.load %arg2[%c0_2, %c0_3, %c0_4] : memref<1x5x32xbf16, #tpu.memory_space<vmem>>, vector<1x5x32xbf16>
    %3 = vector.shape_cast %2 : vector<1x5x32xbf16> to vector<5x32xbf16>
    %c0_5 = arith.constant 0 : index
    %c0_6 = arith.constant 0 : index
    %c0_7 = arith.constant 0 : index
    %4 = vector.load %arg3[%c0_5, %c0_6, %c0_7] : memref<1x5x32xbf16, #tpu.memory_space<vmem>>, vector<1x5x32xbf16>
    %5 = vector.shape_cast %4 : vector<1x5x32xbf16> to vector<5x32xbf16>
    %c0_8 = arith.constant 0 : index
    %c0_9 = arith.constant 0 : index
    %c0_10 = arith.constant 0 : index
    %6 = vector.load %arg4[%c0_8, %c0_9, %c0_10] : memref<1x5x32xbf16, #tpu.memory_space<vmem>>, vector<1x5x32xbf16>
    %7 = vector.shape_cast %6 : vector<1x5x32xbf16> to vector<5x32xbf16>
    %cst = arith.constant 0.000000e+00 : f32
    %8 = vector.broadcast %cst : f32 to vector<2x128xf32>
    %9 = vector.extract_strided_slice %1 {offsets = [0, 0], sizes = [2, 32], strides = [1, 1]} : vector<5x32xbf16> to vector<2x32xbf16>
    %c0_11 = arith.constant 0 : index
    %c0_12 = arith.constant 0 : index
    %c0_13 = arith.constant 0 : index
    %10 = vector.load %arg5[%c0_11, %c0_12, %c0_13] : memref<16x32x128xbf16, #tpu.memory_space<vmem>>, vector<1x32x128xbf16>
    %11 = vector.shape_cast %10 : vector<1x32x128xbf16> to vector<32x128xbf16>
    %cst_14 = arith.constant dense<0.000000e+00> : vector<2x128xf32>
    %12 = tpu.matmul %9, %11, %cst_14 {dimension_numbers = #tpu.dot_dimension_numbers<[1], [0], [0], [1], [0, 0, 1, 1], [], []>} : vector<2x32xbf16>, vector<32x128xbf16>, vector<2x128xf32> -> vector<2x128xf32>
    %13 = arith.addf %8, %12 : vector<2x128xf32>
    %14 = vector.extract_strided_slice %3 {offsets = [0, 0], sizes = [2, 32], strides = [1, 1]} : vector<5x32xbf16> to vector<2x32xbf16>
    %c1 = arith.constant 1 : index
    %c0_15 = arith.constant 0 : index
    %c0_16 = arith.constant 0 : index
    %15 = vector.load %arg5[%c1, %c0_15, %c0_16] : memref<16x32x128xbf16, #tpu.memory_space<vmem>>, vector<1x32x128xbf16>
    %16 = vector.shape_cast %15 : vector<1x32x128xbf16> to vector<32x128xbf16>
    %cst_17 = arith.constant dense<0.000000e+00> : vector<2x128xf32>
    %17 = tpu.matmul %14, %16, %cst_17 {dimension_numbers = #tpu.dot_dimension_numbers<[1], [0], [0], [1], [0, 0, 1, 1], [], []>} : vector<2x32xbf16>, vector<32x128xbf16>, vector<2x128xf32> -> vector<2x128xf32>
    %18 = arith.addf %13, %17 : vector<2x128xf32>
    %19 = vector.extract_strided_slice %1 {offsets = [1, 0], sizes = [2, 32], strides = [1, 1]} : vector<5x32xbf16> to vector<2x32xbf16>
    %c2 = arith.constant 2 : index
    %c0_18 = arith.constant 0 : index
    %c0_19 = arith.constant 0 : index
    %20 = vector.load %arg5[%c2, %c0_18, %c0_19] : memref<16x32x128xbf16, #tpu.memory_space<vmem>>, vector<1x32x128xbf16>
    %21 = vector.shape_cast %20 : vector<1x32x128xbf16> to vector<32x128xbf16>
    %cst_20 = arith.constant dense<0.000000e+00> : vector<2x128xf32>
    %22 = tpu.matmul %19, %21, %cst_20 {dimension_numbers = #tpu.dot_dimension_numbers<[1], [0], [0], [1], [0, 0, 1, 1], [], []>} : vector<2x32xbf16>, vector<32x128xbf16>, vector<2x128xf32> -> vector<2x128xf32>
    %23 = arith.addf %18, %22 : vector<2x128xf32>
    %24 = vector.extract_strided_slice %3 {offsets = [1, 0], sizes = [2, 32], strides = [1, 1]} : vector<5x32xbf16> to vector<2x32xbf16>
    %c3 = arith.constant 3 : index
    %c0_21 = arith.constant 0 : index
    %c0_22 = arith.constant 0 : index
    %25 = vector.load %arg5[%c3, %c0_21, %c0_22] : memref<16x32x128xbf16, #tpu.memory_space<vmem>>, vector<1x32x128xbf16>
    %26 = vector.shape_cast %25 : vector<1x32x128xbf16> to vector<32x128xbf16>
    %cst_23 = arith.constant dense<0.000000e+00> : vector<2x128xf32>
    %27 = tpu.matmul %24, %26, %cst_23 {dimension_numbers = #tpu.dot_dimension_numbers<[1], [0], [0], [1], [0, 0, 1, 1], [], []>} : vector<2x32xbf16>, vector<32x128xbf16>, vector<2x128xf32> -> vector<2x128xf32>
    %28 = arith.addf %23, %27 : vector<2x128xf32>
    %29 = vector.extract_strided_slice %5 {offsets = [0, 0], sizes = [2, 32], strides = [1, 1]} : vector<5x32xbf16> to vector<2x32xbf16>
    %c4 = arith.constant 4 : index
    %c0_24 = arith.constant 0 : index
    %c0_25 = arith.constant 0 : index
    %30 = vector.load %arg5[%c4, %c0_24, %c0_25] : memref<16x32x128xbf16, #tpu.memory_space<vmem>>, vector<1x32x128xbf16>
    %31 = vector.shape_cast %30 : vector<1x32x128xbf16> to vector<32x128xbf16>
    %cst_26 = arith.constant dense<0.000000e+00> : vector<2x128xf32>
    %32 = tpu.matmul %29, %31, %cst_26 {dimension_numbers = #tpu.dot_dimension_numbers<[1], [0], [0], [1], [0, 0, 1, 1], [], []>} : vector<2x32xbf16>, vector<32x128xbf16>, vector<2x128xf32> -> vector<2x128xf32>
    %33 = arith.addf %28, %32 : vector<2x128xf32>
    %34 = vector.extract_strided_slice %7 {offsets = [0, 0], sizes = [2, 32], strides = [1, 1]} : vector<5x32xbf16> to vector<2x32xbf16>
    %c5 = arith.constant 5 : index
    %c0_27 = arith.constant 0 : index
    %c0_28 = arith.constant 0 : index
    %35 = vector.load %arg5[%c5, %c0_27, %c0_28] : memref<16x32x128xbf16, #tpu.memory_space<vmem>>, vector<1x32x128xbf16>
    %36 = vector.shape_cast %35 : vector<1x32x128xbf16> to vector<32x128xbf16>
    %cst_29 = arith.constant dense<0.000000e+00> : vector<2x128xf32>
    %37 = tpu.matmul %34, %36, %cst_29 {dimension_numbers = #tpu.dot_dimension_numbers<[1], [0], [0], [1], [0, 0, 1, 1], [], []>} : vector<2x32xbf16>, vector<32x128xbf16>, vector<2x128xf32> -> vector<2x128xf32>
    %38 = arith.addf %33, %37 : vector<2x128xf32>
    %39 = vector.extract_strided_slice %5 {offsets = [1, 0], sizes = [2, 32], strides = [1, 1]} : vector<5x32xbf16> to vector<2x32xbf16>
    %c6 = arith.constant 6 : index
    %c0_30 = arith.constant 0 : index
    %c0_31 = arith.constant 0 : index
    %40 = vector.load %arg5[%c6, %c0_30, %c0_31] : memref<16x32x128xbf16, #tpu.memory_space<vmem>>, vector<1x32x128xbf16>
    %41 = vector.shape_cast %40 : vector<1x32x128xbf16> to vector<32x128xbf16>
    %cst_32 = arith.constant dense<0.000000e+00> : vector<2x128xf32>
    %42 = tpu.matmul %39, %41, %cst_32 {dimension_numbers = #tpu.dot_dimension_numbers<[1], [0], [0], [1], [0, 0, 1, 1], [], []>} : vector<2x32xbf16>, vector<32x128xbf16>, vector<2x128xf32> -> vector<2x128xf32>
    %43 = arith.addf %38, %42 : vector<2x128xf32>
    %44 = vector.extract_strided_slice %7 {offsets = [1, 0], sizes = [2, 32], strides = [1, 1]} : vector<5x32xbf16> to vector<2x32xbf16>
    %c7 = arith.constant 7 : index
    %c0_33 = arith.constant 0 : index
    %c0_34 = arith.constant 0 : index
    %45 = vector.load %arg5[%c7, %c0_33, %c0_34] : memref<16x32x128xbf16, #tpu.memory_space<vmem>>, vector<1x32x128xbf16>
    %46 = vector.shape_cast %45 : vector<1x32x128xbf16> to vector<32x128xbf16>
    %cst_35 = arith.constant dense<0.000000e+00> : vector<2x128xf32>
    %47 = tpu.matmul %44, %46, %cst_35 {dimension_numbers = #tpu.dot_dimension_numbers<[1], [0], [0], [1], [0, 0, 1, 1], [], []>} : vector<2x32xbf16>, vector<32x128xbf16>, vector<2x128xf32> -> vector<2x128xf32>
    %48 = arith.addf %43, %47 : vector<2x128xf32>
    %49 = vector.extract_strided_slice %1 {offsets = [2, 0], sizes = [2, 32], strides = [1, 1]} : vector<5x32xbf16> to vector<2x32xbf16>
    %c8 = arith.constant 8 : index
    %c0_36 = arith.constant 0 : index
    %c0_37 = arith.constant 0 : index
    %50 = vector.load %arg5[%c8, %c0_36, %c0_37] : memref<16x32x128xbf16, #tpu.memory_space<vmem>>, vector<1x32x128xbf16>
    %51 = vector.shape_cast %50 : vector<1x32x128xbf16> to vector<32x128xbf16>
    %cst_38 = arith.constant dense<0.000000e+00> : vector<2x128xf32>
    %52 = tpu.matmul %49, %51, %cst_38 {dimension_numbers = #tpu.dot_dimension_numbers<[1], [0], [0], [1], [0, 0, 1, 1], [], []>} : vector<2x32xbf16>, vector<32x128xbf16>, vector<2x128xf32> -> vector<2x128xf32>
    %53 = arith.addf %48, %52 : vector<2x128xf32>
    %54 = vector.extract_strided_slice %3 {offsets = [2, 0], sizes = [2, 32], strides = [1, 1]} : vector<5x32xbf16> to vector<2x32xbf16>
    %c9 = arith.constant 9 : index
    %c0_39 = arith.constant 0 : index
    %c0_40 = arith.constant 0 : index
    %55 = vector.load %arg5[%c9, %c0_39, %c0_40] : memref<16x32x128xbf16, #tpu.memory_space<vmem>>, vector<1x32x128xbf16>
    %56 = vector.shape_cast %55 : vector<1x32x128xbf16> to vector<32x128xbf16>
    %cst_41 = arith.constant dense<0.000000e+00> : vector<2x128xf32>
    %57 = tpu.matmul %54, %56, %cst_41 {dimension_numbers = #tpu.dot_dimension_numbers<[1], [0], [0], [1], [0, 0, 1, 1], [], []>} : vector<2x32xbf16>, vector<32x128xbf16>, vector<2x128xf32> -> vector<2x128xf32>
    %58 = arith.addf %53, %57 : vector<2x128xf32>
    %59 = vector.extract_strided_slice %1 {offsets = [3, 0], sizes = [2, 32], strides = [1, 1]} : vector<5x32xbf16> to vector<2x32xbf16>
    %c10 = arith.constant 10 : index
    %c0_42 = arith.constant 0 : index
    %c0_43 = arith.constant 0 : index
    %60 = vector.load %arg5[%c10, %c0_42, %c0_43] : memref<16x32x128xbf16, #tpu.memory_space<vmem>>, vector<1x32x128xbf16>
    %61 = vector.shape_cast %60 : vector<1x32x128xbf16> to vector<32x128xbf16>
    %cst_44 = arith.constant dense<0.000000e+00> : vector<2x128xf32>
    %62 = tpu.matmul %59, %61, %cst_44 {dimension_numbers = #tpu.dot_dimension_numbers<[1], [0], [0], [1], [0, 0, 1, 1], [], []>} : vector<2x32xbf16>, vector<32x128xbf16>, vector<2x128xf32> -> vector<2x128xf32>
    %63 = arith.addf %58, %62 : vector<2x128xf32>
    %64 = vector.extract_strided_slice %3 {offsets = [3, 0], sizes = [2, 32], strides = [1, 1]} : vector<5x32xbf16> to vector<2x32xbf16>
    %c11 = arith.constant 11 : index
    %c0_45 = arith.constant 0 : index
    %c0_46 = arith.constant 0 : index
    %65 = vector.load %arg5[%c11, %c0_45, %c0_46] : memref<16x32x128xbf16, #tpu.memory_space<vmem>>, vector<1x32x128xbf16>
    %66 = vector.shape_cast %65 : vector<1x32x128xbf16> to vector<32x128xbf16>
    %cst_47 = arith.constant dense<0.000000e+00> : vector<2x128xf32>
    %67 = tpu.matmul %64, %66, %cst_47 {dimension_numbers = #tpu.dot_dimension_numbers<[1], [0], [0], [1], [0, 0, 1, 1], [], []>} : vector<2x32xbf16>, vector<32x128xbf16>, vector<2x128xf32> -> vector<2x128xf32>
    %68 = arith.addf %63, %67 : vector<2x128xf32>
    %69 = vector.extract_strided_slice %5 {offsets = [2, 0], sizes = [2, 32], strides = [1, 1]} : vector<5x32xbf16> to vector<2x32xbf16>
    %c12 = arith.constant 12 : index
    %c0_48 = arith.constant 0 : index
    %c0_49 = arith.constant 0 : index
    %70 = vector.load %arg5[%c12, %c0_48, %c0_49] : memref<16x32x128xbf16, #tpu.memory_space<vmem>>, vector<1x32x128xbf16>
    %71 = vector.shape_cast %70 : vector<1x32x128xbf16> to vector<32x128xbf16>
    %cst_50 = arith.constant dense<0.000000e+00> : vector<2x128xf32>
    %72 = tpu.matmul %69, %71, %cst_50 {dimension_numbers = #tpu.dot_dimension_numbers<[1], [0], [0], [1], [0, 0, 1, 1], [], []>} : vector<2x32xbf16>, vector<32x128xbf16>, vector<2x128xf32> -> vector<2x128xf32>
    %73 = arith.addf %68, %72 : vector<2x128xf32>
    %74 = vector.extract_strided_slice %7 {offsets = [2, 0], sizes = [2, 32], strides = [1, 1]} : vector<5x32xbf16> to vector<2x32xbf16>
    %c13 = arith.constant 13 : index
    %c0_51 = arith.constant 0 : index
    %c0_52 = arith.constant 0 : index
    %75 = vector.load %arg5[%c13, %c0_51, %c0_52] : memref<16x32x128xbf16, #tpu.memory_space<vmem>>, vector<1x32x128xbf16>
    %76 = vector.shape_cast %75 : vector<1x32x128xbf16> to vector<32x128xbf16>
    %cst_53 = arith.constant dense<0.000000e+00> : vector<2x128xf32>
    %77 = tpu.matmul %74, %76, %cst_53 {dimension_numbers = #tpu.dot_dimension_numbers<[1], [0], [0], [1], [0, 0, 1, 1], [], []>} : vector<2x32xbf16>, vector<32x128xbf16>, vector<2x128xf32> -> vector<2x128xf32>
    %78 = arith.addf %73, %77 : vector<2x128xf32>
    %79 = vector.extract_strided_slice %5 {offsets = [3, 0], sizes = [2, 32], strides = [1, 1]} : vector<5x32xbf16> to vector<2x32xbf16>
    %c14 = arith.constant 14 : index
    %c0_54 = arith.constant 0 : index
    %c0_55 = arith.constant 0 : index
    %80 = vector.load %arg5[%c14, %c0_54, %c0_55] : memref<16x32x128xbf16, #tpu.memory_space<vmem>>, vector<1x32x128xbf16>
    %81 = vector.shape_cast %80 : vector<1x32x128xbf16> to vector<32x128xbf16>
    %cst_56 = arith.constant dense<0.000000e+00> : vector<2x128xf32>
    %82 = tpu.matmul %79, %81, %cst_56 {dimension_numbers = #tpu.dot_dimension_numbers<[1], [0], [0], [1], [0, 0, 1, 1], [], []>} : vector<2x32xbf16>, vector<32x128xbf16>, vector<2x128xf32> -> vector<2x128xf32>
    %83 = arith.addf %78, %82 : vector<2x128xf32>
    %84 = vector.extract_strided_slice %7 {offsets = [3, 0], sizes = [2, 32], strides = [1, 1]} : vector<5x32xbf16> to vector<2x32xbf16>
    %c15 = arith.constant 15 : index
    %c0_57 = arith.constant 0 : index
    %c0_58 = arith.constant 0 : index
    %85 = vector.load %arg5[%c15, %c0_57, %c0_58] : memref<16x32x128xbf16, #tpu.memory_space<vmem>>, vector<1x32x128xbf16>
    %86 = vector.shape_cast %85 : vector<1x32x128xbf16> to vector<32x128xbf16>
    %cst_59 = arith.constant dense<0.000000e+00> : vector<2x128xf32>
    %87 = tpu.matmul %84, %86, %cst_59 {dimension_numbers = #tpu.dot_dimension_numbers<[1], [0], [0], [1], [0, 0, 1, 1], [], []>} : vector<2x32xbf16>, vector<32x128xbf16>, vector<2x128xf32> -> vector<2x128xf32>
    %88 = arith.addf %83, %87 : vector<2x128xf32>
    %89 = arith.negf %88 : vector<2x128xf32>
    %90 = math.exp %89 : vector<2x128xf32>
    %cst_60 = arith.constant 1.000000e+00 : f32
    %91 = vector.broadcast %cst_60 : f32 to vector<2x128xf32>
    %92 = arith.addf %91, %90 : vector<2x128xf32>
    %93 = arith.divf %91, %92 : vector<2x128xf32>
    %c0_61 = arith.constant 0 : index
    %c0_62 = arith.constant 0 : index
    %c0_63 = arith.constant 0 : index
    %94 = vector.load %arg6[%c0_61, %c0_62, %c0_63] : memref<1x2x128xf32, #tpu.memory_space<vmem>>, vector<1x2x128xf32>
    %95 = vector.shape_cast %94 : vector<1x2x128xf32> to vector<2x128xf32>
    %96 = vector.shape_cast %93 : vector<2x128xf32> to vector<1x2x128xf32>
    tpu.vector_store %arg6[%c0_61, %c0_62, %c0_63], %96 {strides = array<i32>} : memref<1x2x128xf32, #tpu.memory_space<vmem>>, vector<1x2x128xf32>,
    return
  }
  func.func @transform_0(%arg0: i32) -> (i32, i32, i32) {
    %c0_i32 = arith.constant 0 : i32
    %c0_i32_0 = arith.constant 0 : i32
    %c0_i32_1 = arith.constant 0 : i32
    return %arg0, %c0_i32, %c0_i32_0 : i32, i32, i32
  }
  func.func @transform_1(%arg0: i32) -> (i32, i32, i32) {
    %c0_i32 = arith.constant 0 : i32
    %c0_i32_0 = arith.constant 0 : i32
    %c0_i32_1 = arith.constant 0 : i32
    return %arg0, %c0_i32, %c0_i32_0 : i32, i32, i32
  }
  func.func @transform_2(%arg0: i32) -> (i32, i32, i32) {
    %c0_i32 = arith.constant 0 : i32
    %c0_i32_0 = arith.constant 0 : i32
    %c0_i32_1 = arith.constant 0 : i32
    return %arg0, %c0_i32, %c0_i32_0 : i32, i32, i32
  }
  func.func @transform_3(%arg0: i32) -> (i32, i32, i32) {
    %c0_i32 = arith.constant 0 : i32
    %c0_i32_0 = arith.constant 0 : i32
    %c0_i32_1 = arith.constant 0 : i32
    return %arg0, %c0_i32, %c0_i32_0 : i32, i32, i32
  }
  func.func @transform_4(%arg0: i32) -> (i32, i32, i32) {
    %c0_i32 = arith.constant 0 : i32
    %c0_i32_0 = arith.constant 0 : i32
    %c0_i32_1 = arith.constant 0 : i32
    %c0_i32_2 = arith.constant 0 : i32
    return %c0_i32, %c0_i32_0, %c0_i32_1 : i32, i32, i32
  }
  func.func @transform_5(%arg0: i32) -> (i32, i32, i32) {
    %c0_i32 = arith.constant 0 : i32
    %c0_i32_0 = arith.constant 0 : i32
    %c0_i32_1 = arith.constant 0 : i32
    return %arg0, %c0_i32, %c0_i32_0 : i32, i32, i32
  }
}

</mosaic_0001>

<bundles_post_ra>
// kernel: discriminator_forward.8
= control target key start
LH: loop header
LB: loop body
LE: loop exit
PB: predicated region body
PF: predicated region fallthrough
CT: control target
= control target key end

     0   :  { %s169_s0 = inlined_call_operand.vmem [shape: bf16[40,128], index: 0, kind: input, shape index: {}]   ;;  %s170_s1 = inlined_call_operand.vmem [shape: f32[1,128], index: 1, kind: input, shape index: {}]   ;;  %s171_s2 = inlined_call_operand.vmem [shape: f32[1,128], index: 2, kind: input, shape index: {}]   ;;  %s172_s3 = inlined_call_operand.vmem [shape: bf16[40,128], index: 3, kind: output, shape index: {}]  }
   0x1   :  { %v106_v0 = vld [vmem:[%s169_s0] sm:$0xff]   ;;  %v123_v4 = vld [vmem:[%s169_s0 + $0x8] sm:$0xff]   ;;  %v18_v5 = vld [vmem:[%s169_s0 + $0x10] sm:$0xf] }
   0x2   :  { %v93_v1 = vld [vmem:[%s170_s1] ss:$0 sm:$0xff]  ;;  %v107_v2 = vunpack.c.l.bf16 %v106_v0  ;;  %v108_v3 = vunpack.c.h.bf16 %v106_v0  ;;  %v111_v7 = vunpack.c.l.bf16 %v123_v4  ;;  %v112_v8 = vunpack.c.h.bf16 %v123_v4 }
   0x3   :  { %v94_v6 = vld [vmem:[%s171_s2] ss:$0 sm:$0xff]  ;;  %v23_v9 = vunpack.c.l.bf16 %v18_v5 }
   0x4   :  { %v31_v10 = vmul.f32 %v107_v2, %v93_v1  ;;  %v32_v11 = vmul.f32 %v108_v3, %v93_v1  ;;  %v33_v12 = vmul.f32 %v111_v7, %v93_v1  ;;  %v34_v13 = vmul.f32 %v112_v8, %v93_v1 }
   0x5   :  { %v35_v14 = vmul.f32 %v93_v1, %v23_v9 }
   0x6   :  { %v43_v15 = vadd.f32 %v94_v6, %v31_v10  ;;  %v44_v16 = vadd.f32 %v94_v6, %v32_v11  ;;  %v45_v17 = vadd.f32 %v94_v6, %v33_v12  ;;  %v46_v18 = vadd.f32 %v94_v6, %v34_v13 }
   0x7   :  { %v47_v19 = vadd.f32 %v94_v6, %v35_v14 }
   0x8   :  { %vm48_vm0 = vcmp.gt.f32.partialorder %v43_v15, 0.0  ;;  %vm49_vm1 = vcmp.gt.f32.partialorder %v44_v16, 0.0  ;;  %v53_v20 = vmul.f32 0.2, %v43_v15  ;;  %v54_v21 = vmul.f32 0.2, %v44_v16 }
   0x9   :  { %vm50_vm2 = vcmp.gt.f32.partialorder %v45_v17, 0.0  ;;  %vm51_vm3 = vcmp.gt.f32.partialorder %v46_v18, 0.0  ;;  %v55_v22 = vmul.f32 0.2, %v45_v17  ;;  %v56_v23 = vmul.f32 0.2, %v46_v18 }
   0xa   :  { %v58_v24 = vsel %vm48_vm0, %v43_v15, %v53_v20  ;;  %v59_v25 = vsel %vm49_vm1, %v44_v16, %v54_v21  ;;  %vm52_vm4 = vcmp.gt.f32.partialorder %v47_v19, 0.0  ;;  %v57_v26 = vmul.f32 0.2, %v47_v19 }
   0xb   :  { %v116_v27 = vpack.c.bf16 %v59_v25, %v58_v24  ;;  %v60_v28 = vsel %vm50_vm2, %v45_v17, %v55_v22  ;;  %v61_v29 = vsel %vm51_vm3, %v46_v18, %v56_v23 }
   0xc   :  { %v121_v30 = vpack.c.bf16 %v61_v29, %v60_v28  ;;  %v62_v31 = vsel %vm52_vm4, %v47_v19, %v57_v26 }
   0xd   :  { %117 = vst [vmem:[%s172_s3] sm:$0xff] %v116_v27   ;;  %v104_v32 = vpack.c.bf16 %v62_v31, %v62_v31 }
   0xe   :  { %124 = vst [vmem:[%s172_s3 + $0x8] sm:$0xff] %v121_v30  }
   0xf   :  { %88 = vst [vmem:[%s172_s3 + $0x10] sm:$0xf] %v104_v32 }

// kernel: discriminator_forward.7
= control target key start
LH: loop header
LB: loop body
LE: loop exit
PB: predicated region body
PF: predicated region fallthrough
CT: control target
= control target key end

     0   :  { %s2134_s27 = smov 0   ;;  %s2372_s0 = inlined_call_operand.vmem [shape: f32[20,1], index: 0, kind: input, shape index: {}]   ;;  %s2373_s1 = inlined_call_operand.vmem [shape: bf16[2,26,8], index: 1, kind: input, shape index: {}]   ;;  %s2374_s2 = inlined_call_operand.vmem [shape: bf16[2,26,8], index: 2, kind: input, shape index: {}]   ;;  %s2375_s3 = inlined_call_operand.vmem [shape: bf16[2,26,8], index: 3, kind: input, shape index: {}]   ;;  %s2376_s4 = inlined_call_operand.vmem [shape: bf16[2,26,8], index: 4, kind: input, shape index: {}]   ;;  %s2377_s5 = inlined_call_operand.vmem [shape: bf16[16,8,128], index: 5, kind: input, shape index: {}]   ;;  %s2378_s6 = inlined_call_operand.vmem [shape: bf16[2,20,128], index: 6, kind: output, shape index: {0}]   ;;  %s2379_s7 = inlined_call_operand.vmem [shape: f32[2,1,128], index: 7, kind: output, shape index: {1}]   ;;  %s2380_s8 = inlined_call_operand.vmem [shape: f32[2,1,128], index: 8, kind: output, shape index: {2}]  }
   0x1 LB: > { %s1747_s28 = sadd.s32 4294967295, %s2086_s27   ;;  %p1751_p0 = scmp.ge.s32.totalorder %s2086_s27, 1  ;;  %s2086_s27 = sphi %s2134_s27, %s19_s27  }
   0x2   : > { %p297_p1 = scmp.lt.s32.totalorder %s2086_s27, 3 }
   0x4   : > { %p298_p2 = pnand %p1751_p0, %p297_p1 }
   0x5   : > { %v1761_v0 = vld [vmem:[%s2377_s5 + $0x4] sm:$0xf] (!%p298_p2)  ;;  %vm418_vm0 = vcmask (!%p298_p2), 1043456   ;;  %p352_p3 = scmp.lt.s32.totalorder (!%p298_p2), %s1747_s28, 1  ;;  %v1792_v2 = vld [vmem:[%s2377_s5 + $0x20] sm:$0xf] (!%p298_p2) }
   0x6   : > { %301 = sbr.rel (%p298_p2) target bundleno = 350 (0x15e), region = 44  ;;  %2040 = vmatprep.subr.msk.bf16.mxu1 (!%p298_p2), %vm418_vm0, %v1761_v0  ;;  %v420_v1 = vsel (!%p298_p2), %vm418_vm0, %v1761_v0, 0  ;;  %v400_v3 = vld [vmem:[%s2377_s5] sm:$0xf] (!%p298_p2)  ;;  %2048 = vmatprep.subr.msk.bf16.mxu0 (!%p298_p2), %vm418_vm0, %v1792_v2  ;;  %v1001_v4 = vsel (!%p298_p2), %vm418_vm0, %v1792_v2, 0  ;;  %v2088_v6 = vmov (!%p298_p2), 0  }
   0x7   : > { %1886 = vmatpush3.bf16.msra.mxu1 (!%p298_p2), %v420_v1  ;;  %v1796_v5 = vld [vmem:[%s2377_s5 + $0x24] sm:$0xf] (!%p298_p2)  ;;  %1934 = vmatpush3.bf16.msra.mxu0 (!%p298_p2), %v1001_v4  ;;  %vm411_vm1 = vcmask (!%p298_p2), 64512   ;;  %v485_v9 = vsel (!%p298_p2), %vm418_vm0, %v400_v3, 0  ;;  %v1770_v18 = vld [vmem:[%s2377_s5 + $0x8] sm:$0xf] (!%p298_p2) }
   0x8   : > { %2041 = vmatprep.subr.msk.bf16.mxu1 (!%p298_p2), %vm418_vm0, %v400_v3  ;;  %2049 = vmatprep.subr.msk.bf16.mxu0 (!%p298_p2), %vm418_vm0, %v1796_v5  ;;  %v1562_v7 = vld [vmem:[%s2372_s0] sm:$0xff] (!%p298_p2)  ;;  %vm981_vm2 = vsmask.f32 (!%p298_p2), 5376  ;;  %v1563_v44 = vld [vmem:[%s2372_s0 + $0x8] sm:$0xff] (!%p298_p2)  ;;  %v1078_v46 = vsel (!%p298_p2), %vm418_vm0, %v1796_v5, 0  ;;  %v558_v49 = vsel (!%p298_p2), %vm418_vm0, %v1770_v18, 0 }
   0x9   : > { %2066 = vset.pattern.permute.xlu0 (!%p298_p2), %v2088_v6  ;;  %2067 = vset.pattern.permute.xlu1 (!%p298_p2), %v2088_v6  ;;  %vm537_vm3 = vsmask.f32 (!%p298_p2), 7424  ;;  %v1800_v48 = vld [vmem:[%s2377_s5 + $0x28] sm:$0xf] (!%p298_p2)  ;;  %v1564_v51 = vld [vmem:[%s2372_s0 + $0x10] sm:$0xf] (!%p298_p2) }
   0xa   : > { %1567 = vperm.xlu0 (!%p298_p2), %2066, %v1562_v7   ;;  %v1773_v52 = vld [vmem:[%s2377_s5 + $0xc] sm:$0xf] (!%p298_p2)  ;;  %1577 = vperm.xlu1 (!%p298_p2), %2067, %v1564_v51   ;;  %vm1133_vm4 = vcmask (!%p298_p2), 1044480   ;;  %v1144_v60 = vsel (!%p298_p2), %vm418_vm0, %v1800_v48, 0  ;;  %v1776_v2 = vld [vmem:[%s2377_s5 + $0x10] sm:$0xf] (!%p298_p2) }
   0xb   : > { %v1803_v63 = vld [vmem:[%s2377_s5 + $0x2c] sm:$0xf] (!%p298_p2)  ;;  %v633_v0 = vsel (!%p298_p2), %vm418_vm0, %v1773_v52, 0 }
   0xd   : > { %s2382_s28 = smov (!%p352_p3, %s1747_s28), 1 }
   0xe   : > { %s2162_s15 = sshll.u32 %s2382_s28, 4  ;;  %1572 = vperm.xlu0 %2066, %v1563_v44   ;;  %s2056_s18 = smul.u32 12, %s2382_s28 }
   0xf   : > { %s361_s20 = scalar_lea.vmem %s2374_s2, %s2162_s15  ;;  %s356_s23 = scalar_lea.vmem %s2373_s1, %s2162_s15 }
  0x10   : > { %v2176_v8 = vld [vmem:[%s361_s20] sm:$0xff]   ;;  %v390_v10 = vld [vmem:[%s361_s20 + $0x8] sm:$0xf]  ;;  %v391_v11 = vld [vmem:[%s361_s20 + $0xc] sm:$0x1]  ;;  %s2198_s30 = scalar_lea.vmem %s2375_s3, %s2162_s15  ;;  %s2215_s11 = scalar_lea.vmem %s2376_s4, %s2162_s15 }
  0x11   : > { %1887 = vmatprep.mubr.msk.bf16.mxu1 %vm411_vm1, %v2176_v8  ;;  %v2181_v12 = vcombine.low %v390_v10, %v390_v10  ;;  %v2183_v13 = vcombine.low %v390_v10, %v391_v11  ;;  %v386_v14 = vld [vmem:[%s356_s23 + $0x8] sm:$0xf]  ;;  %v387_v15 = vld [vmem:[%s356_s23 + $0xc] sm:$0x1]  ;;  %v2185_v16 = vld [vmem:[%s356_s23] sm:$0xff]   ;;  %v613_v19 = vshrl.u32 %v2176_v8, 16  ;;  %s376_s21 = scalar_lea.vmem %s2378_s6, %s2056_s18  ;;  %s379_s24 = scalar_lea.vmem %s2379_s7, %s2382_s28 }
  0x12   : > { %v2187_v17 = vcombine.low %v386_v14, %v387_v15  ;;  %v615_v20 = vshll.u32 %v2176_v8, 16  ;;  %v1767_v21 = vcombine.low %v386_v14, %v386_v14  ;;  %v538_v24 = vshrl.u32 %v2185_v16, 16  ;;  %v394_v3 = vld [vmem:[%s2198_s30 + $0x8] sm:$0xf]  ;;  %v395_v4 = vld [vmem:[%s2198_s30 + $0xc] sm:$0x1]  ;;  %s382_s29 = scalar_lea.vmem %s2380_s8, %s2382_s28 }
  0x13   : > { %1888 = vmatmul.mubr.msk.bf16.vlgmr.msra.gmra.mrb[0].mxu1 %vm411_vm1, %v2181_v12  ;;  %v1063_v22 = vshrl.u32 %v2183_v13, 16  ;;  %v1066_v23 = vshll.u32 %v2183_v13, 16  ;;  %v540_v25 = vshll.u32 %v2185_v16, 16  ;;  %v1059_v28 = vrot.slane %v613_v19, 2  ;;  %v2263_v5 = vld [vmem:[%s2198_s30] sm:$0xff]  }
  0x14   : > { %v986_v26 = vshrl.u32 %v2187_v17, 16  ;;  %v989_v27 = vshll.u32 %v2187_v17, 16  ;;  %1892 = vmatpush3.bf16.msra.mxu1 %v485_v9  ;;  %1893 = vmatprep.mubr.msk.bf16.mxu1 %vm411_vm1, %v2185_v16  ;;  %v1060_v29 = vrot.slane %v615_v20, 3  ;;  %v982_v32 = vrot.slane %v538_v24, 2 }
  0x15   : > { %2042 = vmatprep.subr.msk.bf16.mxu1 %vm418_vm0, %v1770_v18  ;;  %v1065_v30 = vrot.slane %v1063_v22, 2  ;;  %v1068_v31 = vrot.slane %v1066_v23, 3  ;;  %v983_v33 = vrot.slane %v540_v25, 3  ;;  %v542_v38 = vrot.slane %v540_v25, 1  ;;  %v399_v25 = vld [vmem:[%s2215_s11 + $0xc] sm:$0x1] }
  0x16   : > { %v988_v34 = vrot.slane %v986_v26, 2  ;;  %v991_v35 = vrot.slane %v989_v27, 3  ;;  %v1061_v36 = vor.u32 %v1060_v29, %v1059_v28  ;;  %v544_v39 = vshll.u32 %v1767_v21, 16  ;;  %v2293_v26 = vld [vmem:[%s2215_s11] sm:$0xff]  }
  0x17   : > { %v1069_v37 = vor.u32 %v1068_v31, %v1065_v30  ;;  %v984_v40 = vor.u32 %v983_v33, %v982_v32  ;;  %v543_v42 = vor.u32 %v542_v38, %v538_v24  ;;  %v617_v53 = vrot.slane %v615_v20, 1  ;;  %v398_v24 = vld [vmem:[%s2215_s11 + $0x8] sm:$0xf] }
  0x18   : > { %v992_v41 = vor.u32 %v991_v35, %v988_v34  ;;  %v546_v43 = vrot.slane %v544_v39, 1  ;;  %v619_v54 = vshll.u32 %v2181_v12, 16  ;;  %v1134_v55 = vrot.slane %v2185_v16, 3  ;;  %v1786_v39 = vld [vmem:[%s2377_s5 + $0x18] sm:$0xf] }
  0x19   : > { %v1070_v47 = vsel %vm981_vm2, %v1061_v36, %v1069_v37  ;;  %v1135_v56 = vrot.slane %v2187_v17, 3  ;;  %v548_v57 = vshrl.u32 %v1767_v21, 16  ;;  %v618_v58 = vor.u32 %v617_v53, %v613_v19  ;;  %v1781_v19 = vld [vmem:[%s2377_s5 + $0x14] sm:$0xf]  ;;  %v1814_v53 = vld [vmem:[%s2377_s5 + $0x38] sm:$0xf] }
  0x1a   : > { %v993_v45 = vsel %vm981_vm2, %v984_v40, %v992_v41  ;;  %v547_v50 = vsel %vm537_vm3, %v543_v42, %v546_v43  ;;  %v621_v59 = vrot.slane %v619_v54, 1  ;;  %v1199_v6 = vrot.slane %v2176_v8, 3 }
  0x1b   : > { %1935 = vmatprep.mubr.msk.bf16.mxu0 %vm411_vm1, %v993_v45  ;;  %v1136_v61 = vsel %vm1133_vm4, %v1134_v55, %v1135_v56  ;;  %v550_v62 = vor.u32 %v548_v57, %v546_v43  ;;  %v1200_v7 = vrot.slane %v2183_v13, 3  ;;  %v2267_v9 = vcombine.low %v394_v3, %v395_v4  ;;  %v1806_v13 = vld [vmem:[%s2377_s5 + $0x30] sm:$0xf] }
  0x1c   : > { %1936 = vmatmul.mubr.msk.bf16.vlgmr.msra.gmra.mrb[0].mxu0 %vm411_vm1, %v992_v41  ;;  %v622_v1 = vsel %vm537_vm3, %v618_v58, %v621_v59  ;;  %v623_v10 = vshrl.u32 %v2181_v12, 16  ;;  %v1209_v11 = vsel %vm418_vm0, %v1803_v63, 0  ;;  %v828_v14 = vshrl.u32 %v2263_v5, 16 }
  0x1d   : > { %1940 = vmatpush3.bf16.msra.mxu0 %v1078_v46  ;;  %1941 = vmatprep.mubr.msk.bf16.mxu0 %vm411_vm1, %v1070_v47  ;;  %v1201_v15 = vsel %vm1133_vm4, %v1199_v6, %v1200_v7  ;;  %v830_v16 = vshll.u32 %v2263_v5, 16  ;;  %v1271_v17 = vshrl.u32 %v2267_v9, 16  ;;  %v1274_v8 = vshll.u32 %v2267_v9, 16 }
  0x1e   : > { %2050 = vmatprep.subr.msk.bf16.mxu0 %vm418_vm0, %v1800_v48  ;;  %v625_v18 = vor.u32 %v623_v10, %v621_v59  ;;  %v703_v12 = vsel %vm418_vm0, %v1776_v2, 0  ;;  %v1267_v20 = vrot.slane %v828_v14, 2  ;;  %v2295_v29 = vcombine.low %v398_v24, %v399_v25 }
  0x1f   : > { %1894 = vmatmul.mubr.msk.bf16.vlgmr.msra.gmra.mrb[0].mxu1 %vm411_vm1, %v1767_v21  ;;  %v1268_v21 = vrot.slane %v830_v16, 3  ;;  %v1273_v22 = vrot.slane %v1271_v17, 2  ;;  %v1276_v23 = vrot.slane %v1274_v8, 3  ;;  %v1286_v30 = vsel %vm418_vm0, %v1806_v13, 0 }
  0x20   : > { %1898 = vmatpush3.bf16.msra.mxu1 %v558_v49  ;;  %1899 = vmatprep.mubr.msk.bf16.mxu1 %vm411_vm1, %v547_v50  ;;  %v903_v31 = vshrl.u32 %v2293_v26, 16  ;;  %v905_v33 = vshll.u32 %v2293_v26, 16  ;;  %v1348_v34 = vshrl.u32 %v2295_v29, 16  ;;  %v1351_v35 = vshll.u32 %v2295_v29, 16 }
  0x21   : > { %2043 = vmatprep.subr.msk.bf16.mxu1 %vm418_vm0, %v1773_v52  ;;  %v1269_v27 = vor.u32 %v1268_v21, %v1267_v20  ;;  %v1277_v28 = vor.u32 %v1276_v23, %v1273_v22  ;;  %v1778_v36 = vcombine.low %v394_v3, %v394_v3  ;;  %v773_v38 = vsel %vm418_vm0, %v1781_v19, 0  ;;  %v1817_v3 = vld [vmem:[%s2377_s5 + $0x3c] sm:$0xf] }
  0x22   : > { %v1344_v40 = vrot.slane %v903_v31, 2  ;;  %v1345_v41 = vrot.slane %v905_v33, 3  ;;  %v1350_v42 = vrot.slane %v1348_v34, 2  ;;  %v1353_v43 = vrot.slane %v1351_v35, 3 }
  0x23   : > { %v1278_v32 = vsel %vm981_vm2, %v1269_v27, %v1277_v28  ;;  %v832_v44 = vrot.slane %v830_v16, 1  ;;  %v834_v45 = vshll.u32 %v1778_v36, 16  ;;  %v1783_v52 = vcombine.low %v398_v24, %v398_v24 }
  0x24   : > { %v1346_v46 = vor.u32 %v1345_v41, %v1344_v40  ;;  %v1354_v47 = vor.u32 %v1353_v43, %v1350_v42  ;;  %v848_v54 = vsel %vm418_vm0, %v1786_v39, 0  ;;  %v907_v57 = vrot.slane %v905_v33, 1 }
  0x25   : > { %v833_v48 = vor.u32 %v832_v44, %v828_v14  ;;  %v836_v49 = vrot.slane %v834_v45, 1  ;;  %v909_v58 = vshll.u32 %v1783_v52, 16  ;;  %v1418_v59 = vrot.slane %v2263_v5, 3 }
  0x26   : > { %v1355_v51 = vsel %vm981_vm2, %v1346_v46, %v1354_v47  ;;  %v1483_v6 = vrot.slane %v2293_v26, 3  ;;  %v1493_v10 = vsel %vm418_vm0, %v1817_v3, 0 }
  0x27   : > { %v837_v55 = vsel %vm537_vm3, %v833_v48, %v836_v49 }
  0x28   : > { %1942 = vmatmul.mubr.msk.bf16.vlgmr.msra.gmra.mrb[0].mxu0 %vm411_vm1, %v1069_v37  ;;  %v1810_v37 = vld [vmem:[%s2377_s5 + $0x34] sm:$0xf] }
  0x29   : > { %1946 = vmatpush3.bf16.msra.mxu0 %v1144_v60  ;;  %1947 = vmatprep.mubr.msk.bf16.mxu0 %vm411_vm1, %v1136_v61  ;;  %v1363_v50 = vsel %vm418_vm0, %v1810_v37, 0  ;;  %v1419_v60 = vrot.slane %v2267_v9, 3  ;;  %v838_v61 = vshrl.u32 %v1778_v36, 16  ;;  %v913_v9 = vshrl.u32 %v1783_v52, 16 }
  0x2a   : > { %2051 = vmatprep.subr.msk.bf16.mxu0 %vm418_vm0, %v1803_v63  ;;  %v911_v63 = vrot.slane %v909_v58, 1 }
  0x2b   : > { %1900 = vmatmul.mubr.msk.bf16.vlgmr.msra.gmra.mrb[0].mxu1 %vm411_vm1, %v550_v62  ;;  %v908_v62 = vor.u32 %v907_v57, %v903_v31 }
  0x2c   : > { %1904 = vmatpush3.bf16.msra.mxu1 %v633_v0  ;;  %1905 = vmatprep.mubr.msk.bf16.mxu1 %vm411_vm1, %v622_v1  ;;  %v1428_v0 = vsel %vm418_vm0, %v1814_v53, 0  ;;  %v1420_v1 = vsel %vm1133_vm4, %v1418_v59, %v1419_v60  ;;  %v915_v14 = vor.u32 %v913_v9, %v911_v63 }
  0x2d   : > { %2044 = vmatprep.subr.msk.bf16.mxu1 %vm418_vm0, %v1776_v2  ;;  %v840_v2 = vor.u32 %v838_v61, %v836_v49 }
  0x34   : > { %1948 = vmatmul.mubr.msk.bf16.vlgmr.msra.gmra.mrb[0].mxu0 %vm411_vm1, %v1135_v56  ;;  %v1789_v56 = vld [vmem:[%s2377_s5 + $0x1c] sm:$0xf] }
  0x35   : > { %1952 = vmatpush3.bf16.msra.mxu0 %v1209_v11  ;;  %1953 = vmatprep.mubr.msk.bf16.mxu0 %vm411_vm1, %v1201_v15  ;;  %v923_v4 = vsel %vm418_vm0, %v1789_v56, 0 }
  0x36   : > { %2052 = vmatprep.subr.msk.bf16.mxu0 %vm418_vm0, %v1806_v13 }
  0x37   : > { %1906 = vmatmul.mubr.msk.bf16.vlgmr.msra.gmra.mrb[0].mxu1 %vm411_vm1, %v625_v18 }
  0x38   : > { %1910 = vmatpush3.bf16.msra.mxu1 %v703_v12  ;;  %1911 = vmatprep.mubr.msk.bf16.mxu1 %vm411_vm1, %v2263_v5  ;;  %v912_v5 = vsel %vm537_vm3, %v908_v62, %v911_v63 }
  0x39   : > { %2045 = vmatprep.subr.msk.bf16.mxu1 %vm418_vm0, %v1781_v19 }
  0x40   : > { %1954 = vmatmul.mubr.msk.bf16.vlgmr.msra.gmra.mrb[0].mxu0 %vm411_vm1, %v1200_v7  ;;  %v1484_v7 = vrot.slane %v2295_v29, 3 }
  0x41   : > { %1958 = vmatpush3.bf16.msra.mxu0 %v1286_v30  ;;  %1959 = vmatprep.mubr.msk.bf16.mxu0 %vm411_vm1, %v1278_v32 }
  0x42   : > { %2053 = vmatprep.subr.msk.bf16.mxu0 %vm418_vm0, %v1810_v37  ;;  %v1485_v11 = vsel %vm1133_vm4, %v1483_v6, %v1484_v7 }
  0x43   : > { %1912 = vmatmul.mubr.msk.bf16.vlgmr.msra.gmra.mrb[0].mxu1 %vm411_vm1, %v1778_v36 }
  0x44   : > { %1916 = vmatpush3.bf16.msra.mxu1 %v773_v38  ;;  %1917 = vmatprep.mubr.msk.bf16.mxu1 %vm411_vm1, %v2293_v26 }
  0x45   : > { %2046 = vmatprep.subr.msk.bf16.mxu1 %vm418_vm0, %v1786_v39 }
  0x4c   : > { %1960 = vmatmul.mubr.msk.bf16.vlgmr.msra.gmra.mrb[0].mxu0 %vm411_vm1, %v1277_v28 }
  0x4d   : > { %1964 = vmatpush3.bf16.msra.mxu0 %v1363_v50  ;;  %1965 = vmatprep.mubr.msk.bf16.mxu0 %vm411_vm1, %v1355_v51 }
  0x4e   : > { %2054 = vmatprep.subr.msk.bf16.mxu0 %vm418_vm0, %v1814_v53 }
  0x4f   : > { %1918 = vmatmul.mubr.msk.bf16.vlgmr.msra.gmra.mrb[0].mxu1 %vm411_vm1, %v1783_v52 }
  0x50   : > { %1922 = vmatpush3.bf16.msra.mxu1 %v848_v54  ;;  %1923 = vmatprep.mubr.msk.bf16.mxu1 %vm411_vm1, %v837_v55 }
  0x51   : > { %2047 = vmatprep.subr.msk.bf16.mxu1 %vm418_vm0, %v1789_v56 }
  0x58   : > { %1966 = vmatmul.mubr.msk.bf16.vlgmr.msra.gmra.mrb[0].mxu0 %vm411_vm1, %v1354_v47 }
  0x59   : > { %1970 = vmatpush3.bf16.msra.mxu0 %v1428_v0  ;;  %1971 = vmatprep.mubr.msk.bf16.mxu0 %vm411_vm1, %v1420_v1 }
  0x5a   : > { %2055 = vmatprep.subr.msk.bf16.mxu0 %vm418_vm0, %v1817_v3 }
  0x5b   : > { %1924 = vmatmul.mubr.msk.bf16.vlgmr.msra.gmra.mrb[0].mxu1 %vm411_vm1, %v840_v2 }
  0x5c   : > { %1928 = vmatpush3.bf16.msra.mxu1 %v923_v4  ;;  %1929 = vmatprep.mubr.msk.bf16.mxu1 %vm411_vm1, %v912_v5 }
  0x64   : > { %1972 = vmatmul.mubr.msk.bf16.vlgmr.msra.gmra.mrb[0].mxu0 %vm411_vm1, %v1419_v60 }
  0x65   : > { %1976 = vmatpush3.bf16.msra.mxu0 %v1493_v10  ;;  %1977 = vmatprep.mubr.msk.bf16.mxu0 %vm411_vm1, %v1485_v11 }
  0x67   : > { %1930 = vmatmul.mubr.msk.bf16.vlgmr.msra.gmra.mrb[0].mxu1 %vm411_vm1, %v915_v14 }
  0x70   : > { %1978 = vmatmul.mubr.msk.bf16.vlgmr.msra.gmra.mrb[0].mxu0 %vm411_vm1, %v1484_v7 }
  0x89   : > { %v1568_v18 = vpop.permute.xlu0 %1567  ;;  %v1578_v12 = vpop.permute.xlu1 %1577 }
  0x8d   : > { %v1573_v28 = vpop.permute.xlu0 %1572 }
 0x13a   : > { %v1931_v15 = vpop.f32.mrb[0].mxu1 }
 0x13b   : > { %v959_v16 = vpop.f32.mrb[1].mxu1 }
 0x13c   : > { %v1932_v17 = vpop.f32.mrb[2].mxu1 }
 0x13d   : > { %v962_v8 = vpop.f32.mrb[3].mxu1 }
 0x143   : > { %v1979_v13 = vpop.f32.mrb[0].mxu0 }
 0x144   : > { %v1981_v19 = vadd.f32 %v1979_v13, %v1931_v15  ;;  %v1529_v20 = vpop.f32.mrb[1].mxu0 }
 0x145   : > { %v1982_v21 = vadd.f32 %v1529_v20, %v959_v16  ;;  %v1980_v22 = vpop.f32.mrb[2].mxu0 }
 0x146   : > { %v1831_v23 = vpack.c.bf16 %v1981_v19, %v1981_v19  ;;  %v1582_v24 = vmul.f32 %v1981_v19, %v1578_v12  ;;  %v1532_v25 = vpop.f32.mrb[3].mxu0 }
 0x147   : > { %v1580_v26 = vmul.f32 %v1982_v21, %v1568_v18  ;;  %v1983_v27 = vadd.f32 %v1532_v25, %v962_v8 }
 0x148   : > { %1561 = vst [vmem:[%s376_s21 + $0x8] sm:$0x3] %v1831_v23  ;;  %v1595_v31 = vmul.f32 %v1981_v19, %v1582_v24  ;;  %v1584_v35 = vsel %vm418_vm0, %v1582_v24, 0.0 }
 0x149   : > { %v1835_v29 = vpack.c.bf16 %v1983_v27, %v1982_v21  ;;  %v1581_v30 = vmul.f32 %v1983_v27, %v1573_v28  ;;  %v1593_v32 = vmul.f32 %v1982_v21, %v1580_v26 }
 0x14a   : > { %v1597_v38 = vsel %vm418_vm0, %v1595_v31, 0.0 }
 0x14b   : > { %1836 = vst [vmem:[%s376_s21] sm:$0xff] %v1835_v29   ;;  %v1583_v33 = vadd.f32 %v1581_v30, %v1580_v26  ;;  %v1594_v34 = vmul.f32 %v1983_v27, %v1581_v30 }
 0x14d   : > { %v1585_v36 = vadd.f32 %v1584_v35, %v1583_v33  ;;  %v1596_v37 = vadd.f32 %v1594_v34, %v1593_v32 }
 0x14f   : > { %v1586_v39 = vrot.slane %v1585_v36, 4  ;;  %v1598_v40 = vadd.f32 %v1597_v38, %v1596_v37 }
 0x151   : > { %v1587_v41 = vadd.f32 %v1586_v39, %v1585_v36  ;;  %v1599_v42 = vrot.slane %v1598_v40, 4 }
 0x153   : > { %v1588_v43 = vrot.slane %v1587_v41, 2  ;;  %v1600_v44 = vadd.f32 %v1599_v42, %v1598_v40 }
 0x155   : > { %v1589_v45 = vadd.f32 %v1588_v43, %v1587_v41  ;;  %v1601_v46 = vrot.slane %v1600_v44, 2 }
 0x157   : > { %v1590_v47 = vrot.slane %v1589_v45, 1  ;;  %v1602_v48 = vadd.f32 %v1601_v46, %v1600_v44 }
 0x159   : > { %v1591_v49 = vadd.f32 %v1590_v47, %v1589_v45  ;;  %v1603_v50 = vrot.slane %v1602_v48, 1 }
 0x15b   : > { %1592 = vst [vmem:[%s379_s24] sm:$0x1] %v1591_v49  ;;  %v1604_v51 = vadd.f32 %v1603_v50, %v1602_v48 }
 0x15d   : > { %1605 = vst [vmem:[%s382_s29] sm:$0x1] %v1604_v51 }
 0x15e PF: > { %s19_s27 = sadd.s32 1, %s2086_s27  }
 0x15f   : > { %p16_p4 = scmp.ge.s32.totalorder %s19_s27, 4  }
 0x161   :  { %18 = sbr.rel (!%p16_p4) target bundleno = 1 (0x1), region = 122 }

// kernel: discriminator_forward.6
= control target key start
LH: loop header
LB: loop body
LE: loop exit
PB: predicated region body
PF: predicated region fallthrough
CT: control target
= control target key end

     0   :  { %s3584_s18 = smov 0   ;;  %s4352_s0 = inlined_call_operand.vmem [shape: bf16[2,82,8], index: 0, kind: input, shape index: {}]   ;;  %s4353_s1 = inlined_call_operand.vmem [shape: bf16[2,82,8], index: 1, kind: input, shape index: {}]   ;;  %s4354_s2 = inlined_call_operand.vmem [shape: bf16[2,82,8], index: 2, kind: input, shape index: {}]   ;;  %s4355_s3 = inlined_call_operand.vmem [shape: bf16[2,82,8], index: 3, kind: input, shape index: {}]   ;;  %s4356_s4 = inlined_call_operand.vmem [shape: bf16[16,8,128], index: 4, kind: input, shape index: {}]   ;;  %s4357_s5 = inlined_call_operand.vmem [shape: bf16[2,72,128], index: 5, kind: output, shape index: {}]  }
   0x1 LB: > { %s2559_s19 = sadd.s32 4294967295, %s3550_s18   ;;  %p2563_p0 = scmp.ge.s32.totalorder %s3550_s18, 1  ;;  %s3550_s18 = sphi %s3584_s18, %s15_s18  }
   0x2   : > { %p217_p1 = scmp.lt.s32.totalorder %s3550_s18, 3 }
   0x4   : > { %p218_p2 = pnand %p2563_p0, %p217_p1 }
   0x5   : > { %v2569_v0 = vld [vmem:[%s4356_s4 + $0x4] sm:$0xf] (!%p218_p2)  ;;  %vm372_vm0 = vcmask (!%p218_p2), 1043456   ;;  %p260_p3 = scmp.lt.s32.totalorder (!%p218_p2), %s2559_s19, 1  ;;  %v3552_v1 = vmov (!%p218_p2), 0.0   ;;  %vm3553_vm1 = vmmov (!%p218_p2), 0  }
   0x6   : > { %221 = sbr.rel (%p218_p2) target bundleno = 560 (0x230), region = 40  ;;  %2847 = vmatprep.subr.bf16.mxu1 (!%p218_p2), %v3552_v1  ;;  %v374_v2 = vsel (!%p218_p2), %vm372_vm0, %v2569_v0, 0  ;;  %2849 = vmatprep.mubr.msk.bf16.mxu1 (!%p218_p2), %vm3553_vm1, %v3552_v1  ;;  %v2640_v3 = vld [vmem:[%s4356_s4 + $0x20] sm:$0xf] (!%p218_p2)  ;;  %vm356_vm2 = vcmask (!%p218_p2), 64512   ;;  %vm1662_vm4 = vcmask (!%p218_p2), 1046528  }
   0x7   : > { %2848 = vmatpush3.bf16.msra.mxu1 (!%p218_p2), %v374_v2  ;;  %3023 = vmatprep.subr.bf16.mxu0 (!%p218_p2), %v3552_v1  ;;  %v1430_v4 = vsel (!%p218_p2), %vm372_vm0, %v2640_v3, 0  ;;  %v330_v5 = vld [vmem:[%s4356_s4] sm:$0xf] (!%p218_p2)  ;;  %v2651_v25 = vld [vmem:[%s4356_s4 + $0x24] sm:$0xf] (!%p218_p2) }
   0x8   : > { %3024 = vmatpush3.bf16.msra.mxu0 (!%p218_p2), %v1430_v4  ;;  %2869 = vmatprep.subr.bf16.mxu1 (!%p218_p2), %v3552_v1  ;;  %v487_v8 = vsel (!%p218_p2), %vm372_vm0, %v330_v5, 0  ;;  %vm566_vm3 = vsmask.f32 (!%p218_p2), 7424  ;;  %v1577_v31 = vsel (!%p218_p2), %vm372_vm0, %v2651_v25, 0 }
   0x9   : > { %3025 = vmatprep.mubr.msk.bf16.mxu0 (!%p218_p2), %vm3553_vm1, %v3552_v1  ;;  %3045 = vmatprep.subr.bf16.mxu0 (!%p218_p2), %v3552_v1 }
   0xd   : > { %s4359_s19 = smov (!%p260_p3, %s2559_s19), 1 }
   0xe   : > { %s3608_s24 = smul.u32 44, %s4359_s19 }
   0xf   : > { %s3489_s17 = smul.u32 36, %s4359_s19 }
  0x10   : > { %s3620_s29 = scalar_lea.vmem %s4353_s1, %s3608_s24  ;;  %s3626_s7 = scalar_lea.vmem %s4352_s0, %s3608_s24 }
  0x11   : > { %v297_v6 = vld [vmem:[%s3620_s29] sm:$0xf]  ;;  %v3630_v7 = vld [vmem:[%s3620_s29 + $0x4] sm:$0xf]  ;;  %v3640_v11 = vld [vmem:[%s3626_s7 + $0x8] sm:$0xf]  ;;  %s3930_s25 = scalar_lea.vmem %s4354_s2, %s3608_s24  ;;  %s4342_s22 = scalar_lea.vmem %s4357_s5, %s3489_s17 }
  0x12   : > { %v3634_v9 = vcombine.low %v297_v6, %v3630_v7  ;;  %v3637_v10 = vld [vmem:[%s3626_s7 + $0x4] sm:$0xf]  ;;  %v3643_v12 = vld [vmem:[%s3626_s7 + $0xc] sm:$0xf]  ;;  %v3646_v13 = vld [vmem:[%s3626_s7 + $0x10] sm:$0xf] }
  0x13   : > { %v2641_v14 = vcombine.low %v3637_v10, %v3640_v11  ;;  %v3654_v15 = vcombine.low %v3643_v12, %v3646_v13  ;;  %v3657_v16 = vld [vmem:[%s3626_s7 + $0x14] sm:$0xf]  ;;  %v3660_v17 = vld [vmem:[%s3626_s7 + $0x18] sm:$0xf]  ;;  %v299_v20 = vld [vmem:[%s3620_s29 + $0x8] sm:$0xf] }
  0x14   : > { %2850 = vmatmul.mubr.msk.bf16.vlgmr.msra.gmra.mrb[0].mxu1 %vm356_vm2, %v3634_v9  ;;  %v300_v21 = vld [vmem:[%s3620_s29 + $0xc] sm:$0xf]  ;;  %v3668_v22 = vcombine.low %v3657_v16, %v3660_v17  ;;  %v3681_v32 = vld [vmem:[%s3626_s7 + $0x1c] sm:$0xf]  ;;  %v3684_v33 = vld [vmem:[%s3626_s7 + $0x20] sm:$0xf]  ;;  %v3734_v5 = vcombine.low %v3630_v7, %v299_v20 }
  0x15   : > { %2853 = vmatprep.mubr.msk.bf16.mxu1 %vm3553_vm1, %v3552_v1  ;;  %2870 = vmatpush3.bf16.msra.mxu1 %v487_v8  ;;  %v1376_v18 = vshrl.u32 %v2641_v14, 16  ;;  %v1378_v19 = vshll.u32 %v2641_v14, 16  ;;  %v1383_v23 = vshll.u32 %v3654_v15, 16  ;;  %v3675_v27 = vcombine.low %v299_v20, %v300_v21  ;;  %v301_v37 = vld [vmem:[%s3620_s29 + $0x10] sm:$0xf] }
  0x16   : > { %2891 = vmatprep.subr.bf16.mxu1 %v3552_v1  ;;  %v1387_v29 = vshrl.u32 %v3654_v15, 16  ;;  %v1391_v30 = vshll.u32 %v3668_v22, 16  ;;  %v302_v38 = vld [vmem:[%s3620_s29 + $0x14] sm:$0xf]  ;;  %v2644_v39 = vcombine.low %v3681_v32, %v3684_v33  ;;  %v1395_v42 = vshrl.u32 %v3668_v22, 16 }
  0x17   : > { %v1380_v24 = vrot.slane %v1378_v19, 1  ;;  %v1385_v26 = vrot.slane %v1383_v23, 1  ;;  %v3699_v40 = vcombine.low %v301_v37, %v302_v38  ;;  %v295_v44 = vld [vmem:[%s3626_s7 + $0x24] sm:$0xf]  ;;  %v296_v45 = vld [vmem:[%s3626_s7 + $0x28] sm:$0x1]  ;;  %v3736_v6 = vcombine.low %v300_v21, %v301_v37 }
  0x18   : > { %v1393_v36 = vrot.slane %v1391_v30, 1  ;;  %v1399_v43 = vshll.u32 %v2644_v39, 16  ;;  %v708_v46 = vshll.u32 %v3634_v9, 16  ;;  %v712_v47 = vshll.u32 %v3675_v27, 16  ;;  %v303_v48 = vld [vmem:[%s3620_s29 + $0x18] sm:$0xf] }
  0x19   : > { %v1381_v28 = vor.u32 %v1380_v24, %v1376_v18  ;;  %v1389_v35 = vor.u32 %v1387_v29, %v1385_v26  ;;  %v3711_v49 = vcombine.low %v295_v44, %v296_v45  ;;  %v304_v52 = vld [vmem:[%s3620_s29 + $0x1c] sm:$0xf]  ;;  %v1663_v53 = vrot.slane %v2641_v14, 1  ;;  %v305_v8 = vld [vmem:[%s3620_s29 + $0x20] sm:$0xf] }
  0x1a   : > { %v1397_v50 = vor.u32 %v1395_v42, %v1393_v36  ;;  %v1401_v51 = vrot.slane %v1399_v43, 1  ;;  %v1664_v54 = vrot.slane %v3654_v15, 1  ;;  %v706_v55 = vshrl.u32 %v3634_v9, 16  ;;  %v306_v20 = vld [vmem:[%s3620_s29 + $0x24] sm:$0xf] }
  0x1b   : > { %v1386_v34 = vsel %vm566_vm3, %v1381_v28, %v1385_v26  ;;  %v1394_v41 = vsel %vm566_vm3, %v1389_v35, %v1393_v36  ;;  %v710_v56 = vrot.slane %v708_v46, 1  ;;  %v1666_v58 = vrot.slane %v3668_v22, 1  ;;  %v307_v21 = vld [vmem:[%s3620_s29 + $0x28] sm:$0x1] }
  0x1c   : > { %3026 = vmatmul.mubr.msk.bf16.vlgmr.msra.gmra.mrb[0].mxu0 %vm356_vm2, %v1386_v34  ;;  %2854 = vmatmul.mubr.msk.bf16.gmra.mrb[4].mxu1 %vm356_vm2, %v3675_v27  ;;  %v3721_v57 = vsel %vm1662_vm4, %v1663_v53, %v1664_v54  ;;  %v2573_v59 = vcombine.low %v303_v48, %v304_v52  ;;  %v1403_v60 = vshrl.u32 %v2644_v39, 16  ;;  %v1407_v61 = vshll.u32 %v3711_v49, 16 }
  0x1d   : > { %3046 = vmatpush3.bf16.msra.mxu0 %v1577_v31  ;;  %3029 = vmatprep.mubr.msk.bf16.mxu0 %vm3553_vm1, %v3552_v1  ;;  %v714_v62 = vrot.slane %v712_v47, 1  ;;  %v1402_v63 = vsel %vm566_vm3, %v1397_v50, %v1401_v51  ;;  %v3727_v0 = vsel %vm1662_vm4, %v1664_v54, %v1666_v58  ;;  %v1668_v2 = vrot.slane %v2644_v39, 1  ;;  %v286_v54 = vld [vmem:[%s3626_s7] sm:$0xf]  ;;  %s4026_s7 = scalar_lea.vmem %s4355_s3, %s3608_s24 }
  0x1e   : > { %2857 = vmatprep.mubr.msk.bf16.mxu1 %vm3553_vm1, %v3552_v1  ;;  %3067 = vmatprep.subr.bf16.mxu0 %v3552_v1  ;;  %v3730_v3 = vcombine.low %v3684_v33, %v295_v44  ;;  %v1670_v4 = vrot.slane %v3711_v49, 1  ;;  %v711_v14 = vor.u32 %v710_v56, %v706_v55  ;;  %v1405_v15 = vor.u32 %v1403_v60, %v1401_v51 }
  0x1f   : > { %v3740_v9 = vsel %vm1662_vm4, %v1666_v58, %v1668_v2  ;;  %v1409_v18 = vrot.slane %v1407_v61, 1  ;;  %v3749_v7 = vcombine.low %v302_v38, %v303_v48  ;;  %v1773_v23 = vrot.slane %v3734_v5, 1  ;;  %v2590_v61 = vld [vmem:[%s4356_s4 + $0x8] sm:$0xf] }
  0x20   : > { %v3747_v19 = vsel %vm1662_vm4, %v1668_v2, %v1670_v4  ;;  %v3758_v22 = vsel %vm566_vm3, %v711_v14, %v714_v62  ;;  %v1774_v24 = vrot.slane %v3736_v6, 1  ;;  %v3762_v25 = vcombine.low %v304_v52, %v305_v8 }
  0x21   : > { %v2574_v26 = vcombine.low %v305_v8, %v305_v8  ;;  %v716_v28 = vshrl.u32 %v3675_v27, 16  ;;  %v719_v29 = vshll.u32 %v3699_v40, 16  ;;  %v1776_v31 = vrot.slane %v3749_v7, 1 }
  0x22   : > { %v3767_v30 = vsel %vm1662_vm4, %v1773_v23, %v1774_v24  ;;  %v723_v34 = vshrl.u32 %v3699_v40, 16  ;;  %v726_v35 = vshll.u32 %v2573_v59, 16  ;;  %v1410_v36 = vsel %vm566_vm3, %v1405_v15, %v1409_v18 }
  0x23   : > { %v3772_v37 = vcombine.low %v306_v20, %v307_v21  ;;  %v718_v38 = vor.u32 %v716_v28, %v714_v62  ;;  %v721_v39 = vrot.slane %v719_v29, 1  ;;  %v1778_v42 = vrot.slane %v3762_v25, 1 }
  0x24   : > { %3030 = vmatmul.mubr.msk.bf16.gmra.mrb[4].mxu0 %vm356_vm2, %v1394_v41  ;;  %2858 = vmatmul.mubr.msk.bf16.gmra.mrb[8].mxu1 %vm356_vm2, %v3699_v40  ;;  %v3775_v41 = vsel %vm1662_vm4, %v1774_v24, %v1776_v31  ;;  %v728_v27 = vrot.slane %v726_v35, 1  ;;  %v3778_v43 = vcombine.low %v305_v8, %v306_v20  ;;  %v730_v45 = vshrl.u32 %v2573_v59, 16 }
  0x25   : > { %3033 = vmatprep.mubr.msk.bf16.mxu0 %vm3553_vm1, %v3552_v1  ;;  %2861 = vmatprep.mubr.msk.bf16.mxu1 %vm3553_vm1, %v3552_v1  ;;  %v3781_v44 = vsel %vm566_vm3, %v718_v38, %v721_v39  ;;  %v725_v40 = vor.u32 %v723_v34, %v721_v39  ;;  %v1780_v46 = vrot.slane %v3772_v37, 1  ;;  %v3785_v47 = vsel %vm1662_vm4, %v1776_v31, %v1778_v42 }
  0x26   : > { %v734_v48 = vshll.u32 %v3778_v43, 16  ;;  %v1411_v50 = vshrl.u32 %v3711_v49, 16  ;;  %v732_v52 = vor.u32 %v730_v45, %v728_v27  ;;  %v1525_v55 = vshll.u32 %v3734_v5, 16  ;;  %v2674_v49 = vld [vmem:[%s4356_s4 + $0x30] sm:$0xf] }
  0x27   : > { %v3792_v51 = vsel %vm566_vm3, %v725_v40, %v728_v27  ;;  %v3797_v53 = vsel %vm1662_vm4, %v1778_v42, %v1780_v46  ;;  %v1523_v62 = vshrl.u32 %v3734_v5, 16  ;;  %v1530_v2 = vshll.u32 %v3736_v6, 16  ;;  %v2662_v5 = vld [vmem:[%s4356_s4 + $0x28] sm:$0xf] }
  0x28   : > { %v3805_v56 = vrot.slane %v734_v48, 1  ;;  %v1413_v60 = vor.u32 %v1411_v50, %v1409_v18  ;;  %v618_v8 = vsel %vm372_vm0, %v2590_v61, 0  ;;  %v2581_v15 = vcombine.low %v3640_v11, %v3643_v12  ;;  %v2597_v48 = vld [vmem:[%s4356_s4 + $0xc] sm:$0xf] }
  0x29   : > { %v1532_v14 = vrot.slane %v1530_v2, 1  ;;  %v1534_v20 = vshrl.u32 %v3736_v6, 16  ;;  %v1538_v21 = vshll.u32 %v3749_v7, 16  ;;  %v1688_v23 = vsel %vm372_vm0, %v2662_v5, 0  ;;  %v2668_v61 = vld [vmem:[%s4356_s4 + $0x2c] sm:$0xf] }
  0x2a   : > { %v3809_v58 = vsel %vm566_vm3, %v732_v52, %v3805_v56  ;;  %v2582_v11 = vcombine.low %v3646_v13, %v3657_v16  ;;  %v1542_v6 = vshrl.u32 %v3749_v7, 16  ;;  %v1546_v28 = vshll.u32 %v3762_v25, 16 }
  0x2b   : > { %v1536_v24 = vor.u32 %v1534_v20, %v1532_v14  ;;  %v2583_v13 = vcombine.low %v3660_v17, %v3681_v32  ;;  %v1550_v7 = vshrl.u32 %v3762_v25, 16  ;;  %v1554_v34 = vshll.u32 %v3772_v37, 16 }
  0x2c   : > { %3034 = vmatmul.mubr.msk.bf16.gmra.mrb[8].mxu0 %vm356_vm2, %v1402_v63  ;;  %2862 = vmatmul.mubr.msk.bf16.gmra.mrb[12].mxu1 %vm356_vm2, %v2573_v59  ;;  %v2580_v59 = vcombine.low %v286_v54, %v3637_v10  ;;  %v1527_v63 = vrot.slane %v1525_v55, 1  ;;  %v1548_v31 = vrot.slane %v1546_v28, 1  ;;  %v2584_v17 = vcombine.low %v3684_v33, %v3684_v33 }
  0x2d   : > { %3037 = vmatprep.mubr.msk.bf16.mxu0 %vm3553_vm1, %v3552_v1  ;;  %2865 = vmatprep.mubr.msk.bf16.mxu1 %vm3553_vm1, %v3552_v1  ;;  %v573_v32 = vshll.u32 %v2581_v15, 16  ;;  %v1558_v42 = vshrl.u32 %v3772_v37, 16  ;;  %v577_v52 = vshrl.u32 %v2581_v15, 16  ;;  %v580_v54 = vshll.u32 %v2582_v11, 16  ;;  %v4054_v37 = vld [vmem:[%s4026_s7 + $0x18] sm:$0xf] }
  0x2e   : > { %v1528_v10 = vor.u32 %v1527_v63, %v1523_v62  ;;  %v1552_v35 = vor.u32 %v1550_v7, %v1548_v31  ;;  %v569_v38 = vshll.u32 %v2580_v59, 16  ;;  %v567_v39 = vshrl.u32 %v2580_v59, 16 }
  0x2f   : > { %v575_v40 = vrot.slane %v573_v32, 1  ;;  %v757_v55 = vsel %vm372_vm0, %v2597_v48, 0  ;;  %v584_v63 = vshrl.u32 %v2582_v11, 16  ;;  %v587_v2 = vshll.u32 %v2583_v13, 16  ;;  %v4030_v32 = vld [vmem:[%s4026_s7 + $0x10] sm:$0xf] }
  0x30   : > { %v1533_v18 = vsel %vm566_vm3, %v1528_v10, %v1532_v14  ;;  %v571_v27 = vrot.slane %v569_v38, 1 }
  0x31   : > { %v589_v14 = vrot.slane %v587_v2, 1  ;;  %v4078_v2 = vld [vmem:[%s3930_s25 + $0x20] sm:$0xf] }
  0x32   : > { %v572_v45 = vor.u32 %v571_v27, %v567_v39 }
  0x34   : > { %3038 = vmatmul.mubr.msk.bf16.gmra.mrb[12].mxu0 %vm356_vm2, %v1410_v36  ;;  %2866 = vmatmul.mubr.msk.bf16.gmra.mrb[16].mxu1 %vm356_vm2, %v2574_v26  ;;  %v1540_v26 = vrot.slane %v1538_v21, 1  ;;  %v1556_v36 = vrot.slane %v1554_v34, 1  ;;  %v576_v50 = vsel %vm566_vm3, %v572_v45, %v575_v40 }
  0x35   : > { %3041 = vmatprep.mubr.msk.bf16.mxu0 %vm3553_vm1, %v3552_v1  ;;  %2871 = vmatprep.mubr.msk.bf16.mxu1 %vm3553_vm1, %v3552_v1 }
  0x36   : > { %v1541_v12 = vsel %vm566_vm3, %v1536_v24, %v1540_v26  ;;  %v1544_v29 = vor.u32 %v1542_v6, %v1540_v26  ;;  %v1557_v25 = vsel %vm566_vm3, %v1552_v35, %v1556_v36  ;;  %v1560_v33 = vor.u32 %v1558_v42, %v1556_v36  ;;  %v3952_v6 = vld [vmem:[%s3930_s25 + $0x1c] sm:$0xf]  ;;  %v311_v35 = vld [vmem:[%s3930_s25 + $0xc] sm:$0xf]  ;;  %v2615_v36 = vld [vmem:[%s4356_s4 + $0x14] sm:$0xf] }
  0x37   : > { %v1005_v27 = vsel %vm372_vm0, %v2615_v36, 0  ;;  %v2626_v36 = vld [vmem:[%s4356_s4 + $0x18] sm:$0xf] }
  0x38   : > { %v1549_v16 = vsel %vm566_vm3, %v1544_v29, %v1548_v31  ;;  %v1945_v31 = vsel %vm372_vm0, %v2674_v49, 0  ;;  %v320_v49 = vld [vmem:[%s4026_s7 + $0x4] sm:$0xf] }
  0x3c   : > { %3042 = vmatmul.mubr.msk.bf16.gmra.mrb[16].mxu0 %vm356_vm2, %v1413_v60  ;;  %2872 = vmatmul.mubr.msk.bf16.vlgmr.msra.gmra.mrb[0].mxu1 %vm356_vm2, %v2580_v59  ;;  %v579_v59 = vor.u32 %v577_v52, %v575_v40  ;;  %v582_v60 = vrot.slane %v580_v54, 1 }
  0x3d   : > { %3047 = vmatprep.mubr.msk.bf16.mxu0 %vm3553_vm1, %v3552_v1  ;;  %2875 = vmatprep.mubr.msk.bf16.mxu1 %vm3553_vm1, %v3552_v1 }
  0x3e   : > { %2892 = vmatpush3.bf16.msra.mxu1 %v618_v8  ;;  %v583_v62 = vsel %vm566_vm3, %v579_v59, %v582_v60  ;;  %v1798_v8 = vsel %vm372_vm0, %v2668_v61, 0  ;;  %v586_v10 = vor.u32 %v584_v63, %v582_v60 }
  0x3f   : > { %2913 = vmatprep.subr.bf16.mxu1 %v3552_v1 }
  0x40   : > { %v590_v5 = vsel %vm566_vm3, %v586_v10, %v589_v14 }
  0x44   : > { %3048 = vmatmul.mubr.msk.bf16.vlgmr.msra.gmra.mrb[0].mxu0 %vm356_vm2, %v1533_v18  ;;  %2876 = vmatmul.mubr.msk.bf16.gmra.mrb[4].mxu1 %vm356_vm2, %v2581_v15  ;;  %v591_v15 = vshrl.u32 %v2583_v13, 16  ;;  %v595_v18 = vshll.u32 %v3730_v3, 16 }
  0x45   : > { %3068 = vmatpush3.bf16.msra.mxu0 %v1688_v23  ;;  %3051 = vmatprep.mubr.msk.bf16.mxu0 %vm3553_vm1, %v3552_v1 }
  0x46   : > { %2879 = vmatprep.mubr.msk.bf16.mxu1 %vm3553_vm1, %v3552_v1  ;;  %3089 = vmatprep.subr.bf16.mxu0 %v3552_v1  ;;  %v597_v20 = vrot.slane %v595_v18, 1  ;;  %v4094_v18 = vcombine.low %v3952_v6, %v4078_v2 }
  0x4c   : > { %3052 = vmatmul.mubr.msk.bf16.gmra.mrb[4].mxu0 %vm356_vm2, %v1541_v12  ;;  %2880 = vmatmul.mubr.msk.bf16.gmra.mrb[8].mxu1 %vm356_vm2, %v2582_v11  ;;  %v314_v12 = vld [vmem:[%s3930_s25 + $0x18] sm:$0xf] }
  0x4d   : > { %3055 = vmatprep.mubr.msk.bf16.mxu0 %vm3553_vm1, %v3552_v1  ;;  %2883 = vmatprep.mubr.msk.bf16.mxu1 %vm3553_vm1, %v3552_v1  ;;  %v3955_v28 = vcombine.low %v314_v12, %v3952_v6 }
  0x4f   : > { %v1113_v29 = vshll.u32 %v3955_v28, 16 }
  0x54   : > { %3056 = vmatmul.mubr.msk.bf16.gmra.mrb[8].mxu0 %vm356_vm2, %v1549_v16  ;;  %2884 = vmatmul.mubr.msk.bf16.gmra.mrb[12].mxu1 %vm356_vm2, %v2583_v13  ;;  %v3967_v16 = vrot.slane %v1113_v29, 1  ;;  %v2609_v29 = vcombine.low %v4078_v2, %v4078_v2 }
  0x55   : > { %3059 = vmatprep.mubr.msk.bf16.mxu0 %vm3553_vm1, %v3552_v1  ;;  %2887 = vmatprep.mubr.msk.bf16.mxu1 %vm3553_vm1, %v3552_v1 }
  0x5c   : > { %3060 = vmatmul.mubr.msk.bf16.gmra.mrb[12].mxu0 %vm356_vm2, %v1557_v25  ;;  %2888 = vmatmul.mubr.msk.bf16.gmra.mrb[16].mxu1 %vm356_vm2, %v2584_v17  ;;  %v4033_v25 = vld [vmem:[%s4026_s7 + $0x14] sm:$0xf] }
  0x5d   : > { %3063 = vmatprep.mubr.msk.bf16.mxu0 %vm3553_vm1, %v3552_v1  ;;  %2893 = vmatprep.mubr.msk.bf16.mxu1 %vm3553_vm1, %v3552_v1  ;;  %v4037_v39 = vcombine.low %v4030_v32, %v4033_v25 }
  0x5f   : > { %v1245_v42 = vshll.u32 %v4037_v39, 16 }
  0x61   : > { %v4069_v54 = vrot.slane %v1245_v42, 1 }
  0x64   : > { %3064 = vmatmul.mubr.msk.bf16.gmra.mrb[16].mxu0 %vm356_vm2, %v1560_v33  ;;  %2894 = vmatmul.mubr.msk.bf16.vlgmr.msra.gmra.mrb[0].mxu1 %vm356_vm2, %v576_v50  ;;  %v2685_v50 = vld [vmem:[%s4356_s4 + $0x34] sm:$0xf] }
  0x65   : > { %3069 = vmatprep.mubr.msk.bf16.mxu0 %vm3553_vm1, %v3552_v1  ;;  %2897 = vmatprep.mubr.msk.bf16.mxu1 %vm3553_vm1, %v3552_v1  ;;  %v2092_v63 = vsel %vm372_vm0, %v2685_v50, 0 }
  0x66   : > { %2914 = vmatpush3.bf16.msra.mxu1 %v757_v55  ;;  %v1249_v55 = vshrl.u32 %v4037_v39, 16 }
  0x67   : > { %2935 = vmatprep.subr.bf16.mxu1 %v3552_v1 }
  0x6c   : > { %3070 = vmatmul.mubr.msk.bf16.vlgmr.msra.gmra.mrb[0].mxu0 %vm356_vm2, %v3721_v57  ;;  %2898 = vmatmul.mubr.msk.bf16.gmra.mrb[4].mxu1 %vm356_vm2, %v583_v62  ;;  %v593_v57 = vor.u32 %v591_v15, %v589_v14 }
  0x6d   : > { %3090 = vmatpush3.bf16.msra.mxu0 %v1798_v8  ;;  %3073 = vmatprep.mubr.msk.bf16.mxu0 %vm3553_vm1, %v3552_v1  ;;  %v1251_v8 = vor.u32 %v1249_v55, %v4069_v54 }
  0x6e   : > { %2901 = vmatprep.mubr.msk.bf16.mxu1 %vm3553_vm1, %v3552_v1  ;;  %3111 = vmatprep.subr.bf16.mxu0 %v3552_v1  ;;  %v598_v21 = vsel %vm566_vm3, %v593_v57, %v597_v20 }
  0x74   : > { %3074 = vmatmul.mubr.msk.bf16.gmra.mrb[4].mxu0 %vm356_vm2, %v3727_v0  ;;  %2902 = vmatmul.mubr.msk.bf16.gmra.mrb[8].mxu1 %vm356_vm2, %v590_v5  ;;  %v599_v0 = vshrl.u32 %v3730_v3, 16  ;;  %v2604_v3 = vld [vmem:[%s4356_s4 + $0x10] sm:$0xf] }
  0x75   : > { %3077 = vmatprep.mubr.msk.bf16.mxu0 %vm3553_vm1, %v3552_v1  ;;  %2905 = vmatprep.mubr.msk.bf16.mxu1 %vm3553_vm1, %v3552_v1  ;;  %v881_v26 = vsel %vm372_vm0, %v2604_v3, 0 }
  0x76   : > { %v601_v23 = vor.u32 %v599_v0, %v597_v20  ;;  %v4103_v0 = vld [vmem:[%s3930_s25 + $0x24] sm:$0xf] }
  0x7c   : > { %3078 = vmatmul.mubr.msk.bf16.gmra.mrb[8].mxu0 %vm356_vm2, %v3740_v9  ;;  %2906 = vmatmul.mubr.msk.bf16.gmra.mrb[12].mxu1 %vm356_vm2, %v598_v21  ;;  %v312_v9 = vld [vmem:[%s3930_s25 + $0x10] sm:$0xf]  ;;  %v1914_v21 = vshll.u32 %v4094_v18, 16 }
  0x7d   : > { %3081 = vmatprep.mubr.msk.bf16.mxu0 %vm3553_vm1, %v3552_v1  ;;  %2909 = vmatprep.mubr.msk.bf16.mxu1 %vm3553_vm1, %v3552_v1 }
  0x84   : > { %3082 = vmatmul.mubr.msk.bf16.gmra.mrb[12].mxu0 %vm356_vm2, %v3747_v19  ;;  %2910 = vmatmul.mubr.msk.bf16.gmra.mrb[16].mxu1 %vm356_vm2, %v601_v23  ;;  %v3934_v19 = vld [vmem:[%s3930_s25 + $0x14] sm:$0xf]  ;;  %v318_v23 = vld [vmem:[%s3930_s25 + $0x28] sm:$0x1] }
  0x85   : > { %3085 = vmatprep.mubr.msk.bf16.mxu0 %vm3553_vm1, %v3552_v1  ;;  %2915 = vmatprep.mubr.msk.bf16.mxu1 %vm3553_vm1, %v3552_v1  ;;  %v3937_v24 = vcombine.low %v312_v9, %v3934_v19  ;;  %v4051_v33 = vcombine.low %v3934_v19, %v314_v12  ;;  %v4114_v19 = vcombine.low %v4103_v0, %v318_v23 }
  0x87   : > { %v1106_v11 = vshll.u32 %v3937_v24, 16  ;;  %v1906_v62 = vshll.u32 %v4051_v33, 16  ;;  %v1910_v20 = vshrl.u32 %v4051_v33, 16  ;;  %v1922_v12 = vshll.u32 %v4114_v19, 16 }
  0x89   : > { %v1908_v15 = vrot.slane %v1906_v62, 1  ;;  %v1924_v6 = vrot.slane %v1922_v12, 1 }
  0x8b   : > { %v1912_v3 = vor.u32 %v1910_v20, %v1908_v15  ;;  %v329_v20 = vld [vmem:[%s4026_s7 + $0x28] sm:$0x1] }
  0x8c   : > { %3086 = vmatmul.mubr.msk.bf16.gmra.mrb[16].mxu0 %vm356_vm2, %v1670_v4  ;;  %2916 = vmatmul.mubr.msk.bf16.vlgmr.msra.gmra.mrb[0].mxu1 %vm356_vm2, %v3758_v22  ;;  %v3961_v4 = vrot.slane %v1106_v11, 1  ;;  %v1110_v22 = vshrl.u32 %v3937_v24, 16  ;;  %v1918_v11 = vshrl.u32 %v4094_v18, 16 }
  0x8d   : > { %3091 = vmatprep.mubr.msk.bf16.mxu0 %vm3553_vm1, %v3552_v1  ;;  %2919 = vmatprep.mubr.msk.bf16.mxu1 %vm3553_vm1, %v3552_v1 }
  0x8e   : > { %2936 = vmatpush3.bf16.msra.mxu1 %v881_v26  ;;  %v1112_v13 = vor.u32 %v1110_v22, %v3961_v4  ;;  %v321_v22 = vld [vmem:[%s4026_s7 + $0x8] sm:$0xf] }
  0x8f   : > { %2957 = vmatprep.subr.bf16.mxu1 %v3552_v1 }
  0x90   : > { %v3975_v7 = vsel %vm566_vm3, %v1112_v13, %v3967_v16  ;;  %v4131_v13 = vcombine.low %v320_v49, %v321_v22 }
  0x94   : > { %3092 = vmatmul.mubr.msk.bf16.vlgmr.msra.gmra.mrb[0].mxu0 %vm356_vm2, %v3767_v30  ;;  %2920 = vmatmul.mubr.msk.bf16.gmra.mrb[4].mxu1 %vm356_vm2, %v3781_v44  ;;  %v738_v30 = vshrl.u32 %v3778_v43, 16  ;;  %v310_v44 = vld [vmem:[%s3930_s25 + $0x8] sm:$0xf]  ;;  %v308_v43 = vld [vmem:[%s3930_s25] sm:$0xf] }
  0x95   : > { %3112 = vmatpush3.bf16.msra.mxu0 %v1945_v31  ;;  %3095 = vmatprep.mubr.msk.bf16.mxu0 %vm3553_vm1, %v3552_v1  ;;  %v4067_v52 = vcombine.low %v310_v44, %v311_v35 }
  0x96   : > { %2923 = vmatprep.mubr.msk.bf16.mxu1 %vm3553_vm1, %v3552_v1  ;;  %3133 = vmatprep.subr.bf16.mxu0 %v3552_v1 }
  0x9c   : > { %3096 = vmatmul.mubr.msk.bf16.gmra.mrb[4].mxu0 %vm356_vm2, %v3775_v41  ;;  %2924 = vmatmul.mubr.msk.bf16.gmra.mrb[8].mxu1 %vm356_vm2, %v3792_v51  ;;  %v309_v41 = vld [vmem:[%s3930_s25 + $0x4] sm:$0xf]  ;;  %v740_v51 = vor.u32 %v738_v30, %v3805_v56  ;;  %v322_v30 = vld [vmem:[%s4026_s7 + $0xc] sm:$0xf] }
  0x9d   : > { %3099 = vmatprep.mubr.msk.bf16.mxu0 %vm3553_vm1, %v3552_v1  ;;  %2927 = vmatprep.mubr.msk.bf16.mxu1 %vm3553_vm1, %v3552_v1  ;;  %v4002_v34 = vcombine.low %v309_v41, %v310_v44  ;;  %v4016_v56 = vcombine.low %v308_v43, %v309_v41  ;;  %v1926_v41 = vshrl.u32 %v4114_v19, 16  ;;  %v319_v44 = vld [vmem:[%s4026_s7] sm:$0xf]  ;;  %v4169_v50 = vcombine.low %v321_v22, %v322_v30 }
  0x9f   : > { %v1928_v43 = vor.u32 %v1926_v41, %v1924_v6  ;;  %v1095_v12 = vshll.u32 %v4016_v56, 16  ;;  %v1093_v22 = vshrl.u32 %v4016_v56, 16 }
  0xa4   : > { %3100 = vmatmul.mubr.msk.bf16.gmra.mrb[8].mxu0 %vm356_vm2, %v3785_v47  ;;  %2928 = vmatmul.mubr.msk.bf16.gmra.mrb[12].mxu1 %vm356_vm2, %v3809_v58  ;;  %v4013_v47 = vcombine.low %v311_v35, %v312_v9  ;;  %v1893_v58 = vshll.u32 %v4002_v34, 16  ;;  %v1916_v9 = vrot.slane %v1914_v21, 1  ;;  %v2040_v35 = vshll.u32 %v4131_v13, 16 }
  0xa5   : > { %3103 = vmatprep.mubr.msk.bf16.mxu0 %vm3553_vm1, %v3552_v1  ;;  %2931 = vmatprep.mubr.msk.bf16.mxu1 %vm3553_vm1, %v3552_v1 }
  0xa6   : > { %v1895_v38 = vrot.slane %v1893_v58, 1  ;;  %v1898_v17 = vshll.u32 %v4013_v47, 16  ;;  %v1902_v61 = vshrl.u32 %v4013_v47, 16  ;;  %v1917_v26 = vsel %vm566_vm3, %v1912_v3, %v1916_v9 }
  0xa7   : > { %v4146_v58 = vcombine.low %v319_v44, %v320_v49 }
  0xa8   : > { %v1900_v45 = vrot.slane %v1898_v17, 1 }
  0xaa   : > { %v1904_v5 = vor.u32 %v1902_v61, %v1900_v45 }
  0xac   : > { %3104 = vmatmul.mubr.msk.bf16.gmra.mrb[12].mxu0 %vm356_vm2, %v3797_v53  ;;  %2932 = vmatmul.mubr.msk.bf16.gmra.mrb[16].mxu1 %vm356_vm2, %v740_v51  ;;  %v1891_v53 = vshrl.u32 %v4002_v34, 16  ;;  %v1909_v57 = vsel %vm566_vm3, %v1904_v5, %v1908_v15  ;;  %v4143_v51 = vcombine.low %v322_v30, %v4030_v32 }
  0xad   : > { %3107 = vmatprep.mubr.msk.bf16.mxu0 %vm3553_vm1, %v3552_v1  ;;  %2937 = vmatprep.mubr.msk.bf16.mxu1 %vm3553_vm1, %v3552_v1 }
  0xae   : > { %v1896_v40 = vor.u32 %v1895_v38, %v1891_v53  ;;  %v2038_v53 = vshrl.u32 %v4131_v13, 16  ;;  %v2042_v38 = vrot.slane %v2040_v35, 1  ;;  %v2045_v17 = vshll.u32 %v4143_v51, 16 }
  0xb0   : > { %v1901_v60 = vsel %vm566_vm3, %v1896_v40, %v1900_v45  ;;  %v2043_v32 = vor.u32 %v2042_v38, %v2038_v53  ;;  %v2047_v42 = vrot.slane %v2045_v17, 1  ;;  %v4163_v40 = vcombine.low %v4033_v25, %v4054_v37  ;;  %v2696_v45 = vld [vmem:[%s4356_s4 + $0x38] sm:$0xf] }
  0xb1   : > { %v2202_v25 = vsel %vm372_vm0, %v2696_v45, 0  ;;  %v2177_v53 = vrot.slane %v4002_v34, 1  ;;  %v2178_v38 = vrot.slane %v4013_v47, 1  ;;  %v2180_v34 = vrot.slane %v4051_v33, 1 }
  0xb2   : > { %v2048_v55 = vsel %vm566_vm3, %v2043_v32, %v2047_v42  ;;  %v2057_v5 = vshrl.u32 %v4163_v40, 16  ;;  %v2627_v47 = vcombine.low %v4078_v2, %v4103_v0  ;;  %v1117_v45 = vshrl.u32 %v3955_v28, 16 }
  0xb3   : > { %v2182_v33 = vrot.slane %v4094_v18, 1  ;;  %v2184_v18 = vrot.slane %v4114_v19, 1 }
  0xb4   : > { %3108 = vmatmul.mubr.msk.bf16.gmra.mrb[16].mxu0 %vm356_vm2, %v1780_v46  ;;  %2938 = vmatmul.mubr.msk.bf16.vlgmr.msra.gmra.mrb[0].mxu1 %vm356_vm2, %v4016_v56  ;;  %v4057_v46 = vld [vmem:[%s4026_s7 + $0x1c] sm:$0xf]  ;;  %v1119_v2 = vor.u32 %v1117_v45, %v3967_v16  ;;  %v1234_v16 = vshll.u32 %v4146_v58, 16 }
  0xb5   : > { %3113 = vmatprep.mubr.msk.bf16.mxu0 %vm3553_vm1, %v3552_v1  ;;  %2941 = vmatprep.mubr.msk.bf16.mxu1 %vm3553_vm1, %v3552_v1  ;;  %v4061_v48 = vcombine.low %v4054_v37, %v4057_v46  ;;  %v4176_v37 = vld [vmem:[%s4026_s7 + $0x20] sm:$0xf]  ;;  %v2633_v56 = vld [vmem:[%s4356_s4 + $0x1c] sm:$0xf] }
  0xb6   : > { %2958 = vmatpush3.bf16.msra.mxu1 %v1005_v27  ;;  %v1144_v27 = vsel %vm372_vm0, %v2626_v36, 0  ;;  %v1283_v36 = vsel %vm372_vm0, %v2633_v56, 0 }
  0xb7   : > { %2979 = vmatprep.subr.bf16.mxu1 %v3552_v1  ;;  %v1252_v59 = vshll.u32 %v4061_v48, 16 }
  0xb9   : > { %v4081_v10 = vrot.slane %v1252_v59, 1  ;;  %v2049_v59 = vshrl.u32 %v4143_v51, 16 }
  0xbb   : > { %v4088_v14 = vsel %vm566_vm3, %v1251_v8, %v4081_v10  ;;  %v2051_v61 = vor.u32 %v2049_v59, %v2047_v42  ;;  %v2183_v59 = vsel %vm1662_vm4, %v2180_v34, %v2182_v33 }
  0xbc   : > { %3114 = vmatmul.mubr.msk.bf16.vlgmr.msra.gmra.mrb[0].mxu0 %vm356_vm2, %v1901_v60  ;;  %2942 = vmatmul.mubr.msk.bf16.gmra.mrb[4].mxu1 %vm356_vm2, %v4067_v52  ;;  %v2053_v60 = vshll.u32 %v4163_v40, 16 }
  0xbd   : > { %3134 = vmatpush3.bf16.msra.mxu0 %v2092_v63  ;;  %3117 = vmatprep.mubr.msk.bf16.mxu0 %vm3553_vm1, %v3552_v1  ;;  %v4185_v63 = vcombine.low %v4057_v46, %v4176_v37 }
  0xbe   : > { %2945 = vmatprep.mubr.msk.bf16.mxu1 %vm3553_vm1, %v3552_v1  ;;  %3155 = vmatprep.subr.bf16.mxu0 %v3552_v1  ;;  %v2055_v62 = vrot.slane %v2053_v60, 1 }
  0xbf   : > { %v2061_v15 = vshll.u32 %v4185_v63, 16 }
  0xc0   : > { %v2056_v8 = vsel %vm566_vm3, %v2051_v61, %v2055_v62  ;;  %v2059_v46 = vor.u32 %v2057_v5, %v2055_v62  ;;  %v2185_v61 = vsel %vm1662_vm4, %v2182_v33, %v2184_v18  ;;  %v1232_v62 = vshrl.u32 %v4146_v58, 16 }
  0xc1   : > { %v2063_v21 = vrot.slane %v2061_v15, 1 }
  0xc3   : > { %v2064_v3 = vsel %vm566_vm3, %v2059_v46, %v2063_v21  ;;  %v2288_v46 = vrot.slane %v4143_v51, 1 }
  0xc4   : > { %3118 = vmatmul.mubr.msk.bf16.gmra.mrb[4].mxu0 %vm356_vm2, %v1909_v57  ;;  %2946 = vmatmul.mubr.msk.bf16.gmra.mrb[8].mxu1 %vm356_vm2, %v3937_v24  ;;  %v1920_v24 = vor.u32 %v1918_v11, %v1916_v9  ;;  %v4194_v57 = vld [vmem:[%s4026_s7 + $0x24] sm:$0xf]  ;;  %v2065_v9 = vshrl.u32 %v4185_v63, 16 }
  0xc5   : > { %3121 = vmatprep.mubr.msk.bf16.mxu0 %vm3553_vm1, %v3552_v1  ;;  %2949 = vmatprep.mubr.msk.bf16.mxu1 %vm3553_vm1, %v3552_v1  ;;  %v4205_v23 = vcombine.low %v4194_v57, %v329_v20  ;;  %v1242_v20 = vshrl.u32 %v4169_v50, 16  ;;  %v2634_v51 = vcombine.low %v4176_v37, %v4194_v57 }
  0xc6   : > { %v1925_v31 = vsel %vm566_vm3, %v1920_v24, %v1924_v6  ;;  %v2620_v24 = vcombine.low %v4176_v37, %v4176_v37  ;;  %v1099_v6 = vshll.u32 %v4067_v52, 16 }
  0xc8   : > { %v1101_v30 = vrot.slane %v1099_v6, 1 }
  0xcc   : > { %3122 = vmatmul.mubr.msk.bf16.gmra.mrb[8].mxu0 %vm356_vm2, %v1917_v26  ;;  %2950 = vmatmul.mubr.msk.bf16.gmra.mrb[12].mxu1 %vm356_vm2, %v3955_v28  ;;  %v2069_v26 = vshll.u32 %v4205_v23, 16 }
  0xcd   : > { %3125 = vmatprep.mubr.msk.bf16.mxu0 %vm3553_vm1, %v3552_v1  ;;  %2953 = vmatprep.mubr.msk.bf16.mxu1 %vm3553_vm1, %v3552_v1 }
  0xce   : > { %v2071_v11 = vrot.slane %v2069_v26, 1  ;;  %v1256_v26 = vshrl.u32 %v4061_v48, 16 }
  0xd0   : > { %v1258_v37 = vor.u32 %v1256_v26, %v4081_v10 }
  0xd4   : > { %3126 = vmatmul.mubr.msk.bf16.gmra.mrb[12].mxu0 %vm356_vm2, %v1925_v31  ;;  %2954 = vmatmul.mubr.msk.bf16.gmra.mrb[16].mxu1 %vm356_vm2, %v2609_v29  ;;  %v1097_v29 = vrot.slane %v1095_v12, 1  ;;  %v2073_v31 = vshrl.u32 %v4205_v23, 16 }
  0xd5   : > { %3129 = vmatprep.mubr.msk.bf16.mxu0 %vm3553_vm1, %v3552_v1  ;;  %2959 = vmatprep.mubr.msk.bf16.mxu1 %vm3553_vm1, %v3552_v1 }
  0xd6   : > { %v1098_v41 = vor.u32 %v1097_v29, %v1093_v22  ;;  %v2075_v44 = vor.u32 %v2073_v31, %v2071_v11 }
  0xd8   : > { %v1102_v35 = vsel %vm566_vm3, %v1098_v41, %v1101_v30 }
  0xdc   : > { %3130 = vmatmul.mubr.msk.bf16.gmra.mrb[16].mxu0 %vm356_vm2, %v1928_v43  ;;  %2960 = vmatmul.mubr.msk.bf16.vlgmr.msra.gmra.mrb[0].mxu1 %vm356_vm2, %v4146_v58  ;;  %v1103_v43 = vshrl.u32 %v4067_v52, 16  ;;  %v2702_v52 = vld [vmem:[%s4356_s4 + $0x3c] sm:$0xf]  ;;  %v2287_v58 = vrot.slane %v4131_v13, 1  ;;  %v2290_v13 = vrot.slane %v4163_v40, 1  ;;  %v2292_v40 = vrot.slane %v4185_v63, 1 }
  0xdd   : > { %3135 = vmatprep.mubr.msk.bf16.mxu0 %vm3553_vm1, %v3552_v1  ;;  %2963 = vmatprep.mubr.msk.bf16.mxu1 %vm3553_vm1, %v3552_v1  ;;  %v2312_v42 = vsel %vm372_vm0, %v2702_v52, 0  ;;  %v2294_v63 = vrot.slane %v4205_v23, 1 }
  0xde   : > { %2980 = vmatpush3.bf16.msra.mxu1 %v1144_v27  ;;  %v1105_v17 = vor.u32 %v1103_v43, %v1101_v30  ;;  %v2179_v27 = vsel %vm1662_vm4, %v2177_v53, %v2178_v38 }
  0xdf   : > { %3001 = vmatprep.subr.bf16.mxu1 %v3552_v1  ;;  %v2295_v10 = vsel %vm1662_vm4, %v2292_v40, %v2294_v63 }
  0xe0   : > { %v1109_v32 = vsel %vm566_vm3, %v1105_v17, %v3961_v4  ;;  %v2181_v4 = vsel %vm1662_vm4, %v2178_v38, %v2180_v34 }
  0xe4   : > { %3136 = vmatmul.mubr.msk.bf16.vlgmr.msra.gmra.mrb[0].mxu0 %vm356_vm2, %v2048_v55  ;;  %2964 = vmatmul.mubr.msk.bf16.gmra.mrb[4].mxu1 %vm356_vm2, %v4169_v50  ;;  %v1121_v55 = vshll.u32 %v2627_v47, 16 }
  0xe5   : > { %3156 = vmatpush3.bf16.msra.mxu0 %v2202_v25  ;;  %3139 = vmatprep.mubr.msk.bf16.mxu0 %vm3553_vm1, %v3552_v1  ;;  %v1238_v25 = vshll.u32 %v4169_v50, 16 }
  0xe6   : > { %2967 = vmatprep.mubr.msk.bf16.mxu1 %vm3553_vm1, %v3552_v1  ;;  %3177 = vmatprep.subr.bf16.mxu0 %v3552_v1  ;;  %v1123_v0 = vrot.slane %v1121_v55, 1 }
  0xe7   : > { %v1240_v5 = vrot.slane %v1238_v25, 1 }
  0xe8   : > { %v1124_v28 = vsel %vm566_vm3, %v1119_v2, %v1123_v0 }
  0xec   : > { %3140 = vmatmul.mubr.msk.bf16.gmra.mrb[4].mxu0 %vm356_vm2, %v2056_v8  ;;  %2968 = vmatmul.mubr.msk.bf16.gmra.mrb[8].mxu1 %vm356_vm2, %v4037_v39  ;;  %v2067_v39 = vor.u32 %v2065_v9, %v2063_v21  ;;  %v1236_v8 = vrot.slane %v1234_v16, 1  ;;  %v1244_v21 = vor.u32 %v1242_v20, %v1240_v5  ;;  %v2291_v9 = vsel %vm1662_vm4, %v2288_v46, %v2290_v13 }
  0xed   : > { %3143 = vmatprep.mubr.msk.bf16.mxu0 %vm3553_vm1, %v3552_v1  ;;  %2971 = vmatprep.mubr.msk.bf16.mxu1 %vm3553_vm1, %v3552_v1 }
  0xee   : > { %v2072_v49 = vsel %vm566_vm3, %v2067_v39, %v2071_v11  ;;  %v1237_v19 = vor.u32 %v1236_v8, %v1232_v62  ;;  %v1248_v50 = vsel %vm566_vm3, %v1244_v21, %v4069_v54  ;;  %v1260_v54 = vshll.u32 %v2634_v51, 16 }
  0xef   : > { %v2293_v39 = vsel %vm1662_vm4, %v2290_v13, %v2292_v40 }
  0xf0   : > { %v1241_v15 = vsel %vm566_vm3, %v1237_v19, %v1240_v5  ;;  %v1262_v57 = vrot.slane %v1260_v54, 1 }
  0xf4   : > { %3144 = vmatmul.mubr.msk.bf16.gmra.mrb[8].mxu0 %vm356_vm2, %v2064_v3  ;;  %2972 = vmatmul.mubr.msk.bf16.gmra.mrb[12].mxu1 %vm356_vm2, %v4061_v48  ;;  %v2289_v3 = vsel %vm1662_vm4, %v2287_v58, %v2288_v46  ;;  %v1263_v48 = vsel %vm566_vm3, %v1258_v37, %v1262_v57 }
  0xf5   : > { %3147 = vmatprep.mubr.msk.bf16.mxu0 %vm3553_vm1, %v3552_v1  ;;  %2975 = vmatprep.mubr.msk.bf16.mxu1 %vm3553_vm1, %v3552_v1 }
  0xfc   : > { %3148 = vmatmul.mubr.msk.bf16.gmra.mrb[12].mxu0 %vm356_vm2, %v2072_v49  ;;  %2976 = vmatmul.mubr.msk.bf16.gmra.mrb[16].mxu1 %vm356_vm2, %v2620_v24 }
  0xfd   : > { %3151 = vmatprep.mubr.msk.bf16.mxu0 %vm3553_vm1, %v3552_v1  ;;  %2981 = vmatprep.mubr.msk.bf16.mxu1 %vm3553_vm1, %v3552_v1 }
 0x104   : > { %3152 = vmatmul.mubr.msk.bf16.gmra.mrb[16].mxu0 %vm356_vm2, %v2075_v44  ;;  %2982 = vmatmul.mubr.msk.bf16.vlgmr.msra.gmra.mrb[0].mxu1 %vm356_vm2, %v1102_v35 }
 0x105   : > { %3157 = vmatprep.mubr.msk.bf16.mxu0 %vm3553_vm1, %v3552_v1  ;;  %2985 = vmatprep.mubr.msk.bf16.mxu1 %vm3553_vm1, %v3552_v1 }
 0x106   : > { %3002 = vmatpush3.bf16.msra.mxu1 %v1283_v36 }
 0x10c   : > { %3158 = vmatmul.mubr.msk.bf16.vlgmr.msra.gmra.mrb[0].mxu0 %vm356_vm2, %v2179_v27  ;;  %2986 = vmatmul.mubr.msk.bf16.gmra.mrb[4].mxu1 %vm356_vm2, %v1109_v32 }
 0x10d   : > { %3178 = vmatpush3.bf16.msra.mxu0 %v2312_v42  ;;  %3161 = vmatprep.mubr.msk.bf16.mxu0 %vm3553_vm1, %v3552_v1 }
 0x10e   : > { %2989 = vmatprep.mubr.msk.bf16.mxu1 %vm3553_vm1, %v3552_v1 }
 0x114   : > { %3162 = vmatmul.mubr.msk.bf16.gmra.mrb[4].mxu0 %vm356_vm2, %v2181_v4  ;;  %2990 = vmatmul.mubr.msk.bf16.gmra.mrb[8].mxu1 %vm356_vm2, %v3975_v7  ;;  %v1125_v7 = vshrl.u32 %v2627_v47, 16 }
 0x115   : > { %3165 = vmatprep.mubr.msk.bf16.mxu0 %vm3553_vm1, %v3552_v1  ;;  %2993 = vmatprep.mubr.msk.bf16.mxu1 %vm3553_vm1, %v3552_v1 }
 0x116   : > { %v1127_v60 = vor.u32 %v1125_v7, %v1123_v0 }
 0x11c   : > { %3166 = vmatmul.mubr.msk.bf16.gmra.mrb[8].mxu0 %vm356_vm2, %v2183_v59  ;;  %2994 = vmatmul.mubr.msk.bf16.gmra.mrb[12].mxu1 %vm356_vm2, %v1124_v28 }
 0x11d   : > { %3169 = vmatprep.mubr.msk.bf16.mxu0 %vm3553_vm1, %v3552_v1  ;;  %2997 = vmatprep.mubr.msk.bf16.mxu1 %vm3553_vm1, %v3552_v1 }
 0x124   : > { %3170 = vmatmul.mubr.msk.bf16.gmra.mrb[12].mxu0 %vm356_vm2, %v2185_v61  ;;  %2998 = vmatmul.mubr.msk.bf16.gmra.mrb[16].mxu1 %vm356_vm2, %v1127_v60 }
 0x125   : > { %3173 = vmatprep.mubr.msk.bf16.mxu0 %vm3553_vm1, %v3552_v1  ;;  %3003 = vmatprep.mubr.msk.bf16.mxu1 %vm3553_vm1, %v3552_v1 }
 0x12c   : > { %3174 = vmatmul.mubr.msk.bf16.gmra.mrb[16].mxu0 %vm356_vm2, %v2184_v18  ;;  %3004 = vmatmul.mubr.msk.bf16.vlgmr.msra.gmra.mrb[0].mxu1 %vm356_vm2, %v1241_v15 }
 0x12d   : > { %3179 = vmatprep.mubr.msk.bf16.mxu0 %vm3553_vm1, %v3552_v1  ;;  %3007 = vmatprep.mubr.msk.bf16.mxu1 %vm3553_vm1, %v3552_v1 }
 0x134   : > { %3180 = vmatmul.mubr.msk.bf16.vlgmr.msra.gmra.mrb[0].mxu0 %vm356_vm2, %v2289_v3  ;;  %3008 = vmatmul.mubr.msk.bf16.gmra.mrb[4].mxu1 %vm356_vm2, %v1248_v50 }
 0x135   : > { %3183 = vmatprep.mubr.msk.bf16.mxu0 %vm3553_vm1, %v3552_v1  ;;  %3011 = vmatprep.mubr.msk.bf16.mxu1 %vm3553_vm1, %v3552_v1 }
 0x13c   : > { %3184 = vmatmul.mubr.msk.bf16.gmra.mrb[4].mxu0 %vm356_vm2, %v2291_v9  ;;  %3012 = vmatmul.mubr.msk.bf16.gmra.mrb[8].mxu1 %vm356_vm2, %v4088_v14  ;;  %v1264_v14 = vshrl.u32 %v2634_v51, 16 }
 0x13d   : > { %3187 = vmatprep.mubr.msk.bf16.mxu0 %vm3553_vm1, %v3552_v1  ;;  %3015 = vmatprep.mubr.msk.bf16.mxu1 %vm3553_vm1, %v3552_v1 }
 0x13e   : > { %v1266_v11 = vor.u32 %v1264_v14, %v1262_v57 }
 0x144   : > { %3188 = vmatmul.mubr.msk.bf16.gmra.mrb[8].mxu0 %vm356_vm2, %v2293_v39  ;;  %3016 = vmatmul.mubr.msk.bf16.gmra.mrb[12].mxu1 %vm356_vm2, %v1263_v48 }
 0x145   : > { %3191 = vmatprep.mubr.msk.bf16.mxu0 %vm3553_vm1, %v3552_v1  ;;  %3019 = vmatprep.mubr.msk.bf16.mxu1 %vm3553_vm1, %v3552_v1 }
 0x14c   : > { %3192 = vmatmul.mubr.msk.bf16.gmra.mrb[12].mxu0 %vm356_vm2, %v2295_v10  ;;  %3020 = vmatmul.mubr.msk.bf16.gmra.mrb[16].mxu1 %vm356_vm2, %v1266_v11 }
 0x14d   : > { %3195 = vmatprep.mubr.msk.bf16.mxu0 %vm3553_vm1, %v3552_v1 }
 0x154   : > { %3196 = vmatmul.mubr.msk.bf16.gmra.mrb[16].mxu0 %vm356_vm2, %v2294_v63 }
 0x1ff   : > { %v1319_v12 = vpop.f32.mrb[0].mxu1 }
 0x200   : > { %v3005_v24 = vpop.f32.mrb[1].mxu1 }
 0x201   : > { %v1322_v6 = vpop.f32.mrb[2].mxu1 }
 0x202   : > { %v3006_v49 = vpop.f32.mrb[3].mxu1 }
 0x207   : > { %v2348_v22 = vpop.f32.mrb[0].mxu0  ;;  %v1327_v29 = vpop.f32.mrb[4].mxu1 }
 0x208   : > { %v3199_v23 = vadd.f32 %v2348_v22, %v1319_v12  ;;  %v3181_v31 = vpop.f32.mrb[1].mxu0  ;;  %v3009_v30 = vpop.f32.mrb[5].mxu1 }
 0x209   : > { %v2351_v41 = vpop.f32.mrb[2].mxu0  ;;  %v1330_v44 = vpop.f32.mrb[6].mxu1 }
 0x20a   : > { %v2404_v56 = vmul.f32 0.2, %v3199_v23  ;;  %v3200_v35 = vadd.f32 %v2351_v41, %v1322_v6  ;;  %v3182_v43 = vpop.f32.mrb[3].mxu0  ;;  %v3010_v36 = vpop.f32.mrb[7].mxu1  ;;  %vm2395_vm5 = vcmp.gt.f32.partialorder %v3199_v23, 0.0 }
 0x20c   : > { %vm2396_vm6 = vcmp.gt.f32.partialorder %v3200_v35, 0.0  ;;  %v2405_v1 = vmul.f32 0.2, %v3200_v35  ;;  %v2413_v53 = vsel %vm2395_vm5, %v3199_v23, %v2404_v56 }
 0x20e   : > { %v2414_v38 = vsel %vm2396_vm6, %v3200_v35, %v2405_v1 }
 0x20f   : > { %v2731_v17 = vpack.c.bf16 %v2414_v38, %v2413_v53  ;;  %v2356_v52 = vpop.f32.mrb[4].mxu0  ;;  %v1335_v27 = vpop.f32.mrb[8].mxu1 }
 0x210   : > { %v3201_v32 = vadd.f32 %v2356_v52, %v1327_v29  ;;  %v3185_v42 = vpop.f32.mrb[5].mxu0  ;;  %v3013_v34 = vpop.f32.mrb[9].mxu1 }
 0x211   : > { %2732 = vst [vmem:[%s4342_s22] sm:$0xff] %v2731_v17   ;;  %v2359_v47 = vpop.f32.mrb[6].mxu0  ;;  %v1338_v4 = vpop.f32.mrb[10].mxu1 }
 0x212   : > { %v2406_v45 = vmul.f32 0.2, %v3201_v32  ;;  %v3202_v55 = vadd.f32 %v2359_v47, %v1330_v44  ;;  %v3186_v33 = vpop.f32.mrb[7].mxu0  ;;  %v3014_v2 = vpop.f32.mrb[11].mxu1  ;;  %vm2397_vm7 = vcmp.gt.f32.partialorder %v3201_v32, 0.0 }
 0x214   : > { %vm2398_vm8 = vcmp.gt.f32.partialorder %v3202_v55, 0.0  ;;  %v2407_v0 = vmul.f32 0.2, %v3202_v55  ;;  %v2415_v59 = vsel %vm2397_vm7, %v3201_v32, %v2406_v45 }
 0x216   : > { %v2416_v28 = vsel %vm2398_vm8, %v3202_v55, %v2407_v0 }
 0x217   : > { %v2736_v7 = vpack.c.bf16 %v2416_v28, %v2415_v59  ;;  %v2364_v18 = vpop.f32.mrb[8].mxu0  ;;  %v1343_v16 = vpop.f32.mrb[12].mxu1 }
 0x218   : > { %v3203_v60 = vadd.f32 %v2364_v18, %v1335_v27  ;;  %v3189_v25 = vpop.f32.mrb[9].mxu0  ;;  %v3017_v61 = vpop.f32.mrb[13].mxu1 }
 0x219   : > { %2748 = vst [vmem:[%s4342_s22 + $0x8] sm:$0xff] %v2736_v7   ;;  %v2367_v62 = vpop.f32.mrb[10].mxu0  ;;  %v1346_v8 = vpop.f32.mrb[14].mxu1 }
 0x21a   : > { %v2408_v5 = vmul.f32 0.2, %v3203_v60  ;;  %v3204_v19 = vadd.f32 %v2367_v62, %v1338_v4  ;;  %v3190_v15 = vpop.f32.mrb[11].mxu0  ;;  %v3018_v20 = vpop.f32.mrb[15].mxu1  ;;  %vm2399_vm9 = vcmp.gt.f32.partialorder %v3203_v60, 0.0 }
 0x21c   : > { %vm2400_vm10 = vcmp.gt.f32.partialorder %v3204_v19, 0.0  ;;  %v2409_v58 = vmul.f32 0.2, %v3204_v19  ;;  %v2417_v46 = vsel %vm2399_vm9, %v3203_v60, %v2408_v5 }
 0x21e   : > { %v2418_v21 = vsel %vm2400_vm10, %v3204_v19, %v2409_v58 }
 0x21f   : > { %v2741_v3 = vpack.c.bf16 %v2418_v21, %v2417_v46  ;;  %v2372_v50 = vpop.f32.mrb[12].mxu0  ;;  %v1351_v13 = vpop.f32.mrb[16].mxu1 }
 0x220   : > { %v3205_v51 = vadd.f32 %v2372_v50, %v1343_v16  ;;  %v3193_v9 = vpop.f32.mrb[13].mxu0  ;;  %v3021_v26 = vpop.f32.mrb[17].mxu1 }
 0x221   : > { %2749 = vst [vmem:[%s4342_s22 + $0x10] sm:$0xff] %v2741_v3   ;;  %v2375_v54 = vpop.f32.mrb[14].mxu0  ;;  %v1354_v40 = vpop.f32.mrb[18].mxu1 }
 0x222   : > { %v2410_v37 = vmul.f32 0.2, %v3205_v51  ;;  %v3206_v57 = vadd.f32 %v2375_v54, %v1346_v8  ;;  %v3194_v39 = vpop.f32.mrb[15].mxu0  ;;  %v3022_v48 = vpop.f32.mrb[19].mxu1  ;;  %vm2401_vm11 = vcmp.gt.f32.partialorder %v3205_v51, 0.0 }
 0x224   : > { %vm2402_vm12 = vcmp.gt.f32.partialorder %v3206_v57, 0.0  ;;  %v2411_v14 = vmul.f32 0.2, %v3206_v57  ;;  %v2419_v63 = vsel %vm2401_vm11, %v3205_v51, %v2410_v37 }
 0x226   : > { %v2420_v11 = vsel %vm2402_vm12, %v3206_v57, %v2411_v14 }
 0x227   : > { %v2746_v10 = vpack.c.bf16 %v2420_v11, %v2419_v63  ;;  %v2380_v12 = vpop.f32.mrb[16].mxu0 }
 0x228   : > { %v3207_v24 = vadd.f32 %v2380_v12, %v1351_v13  ;;  %v3197_v6 = vpop.f32.mrb[17].mxu0 }
 0x229   : > { %2750 = vst [vmem:[%s4342_s22 + $0x18] sm:$0xff] %v2746_v10   ;;  %v2383_v49 = vpop.f32.mrb[18].mxu0 }
 0x22a   : > { %vm2403_vm13 = vcmp.gt.f32.partialorder %v3207_v24, 0.0  ;;  %v2412_v22 = vmul.f32 0.2, %v3207_v24  ;;  %v3198_v29 = vpop.f32.mrb[19].mxu0 }
 0x22c   : > { %v2421_v23 = vsel %vm2403_vm13, %v3207_v24, %v2412_v22 }
 0x22d   : > { %v2727_v31 = vpack.c.bf16 %v2421_v23, %v2421_v23 }
 0x22f   : > { %2467 = vst [vmem:[%s4342_s22 + $0x20] sm:$0xf] %v2727_v31 }
 0x230 PF: > { %s15_s18 = sadd.s32 1, %s3550_s18  }
 0x231   : > { %p12_p4 = scmp.ge.s32.totalorder %s15_s18, 4  }
 0x233   :  { %14 = sbr.rel (!%p12_p4) target bundleno = 1 (0x1), region = 94 }

// kernel: discriminator_forward.10
= control target key start
LH: loop header
LB: loop body
LE: loop exit
PB: predicated region body
PF: predicated region fallthrough
CT: control target
= control target key end

     0   :  { %s103_s0 = inlined_call_operand.vmem [shape: bf16[16,128], index: 0, kind: input, shape index: {}]   ;;  %s104_s1 = inlined_call_operand.vmem [shape: f32[1,128], index: 1, kind: input, shape index: {}]   ;;  %s105_s2 = inlined_call_operand.vmem [shape: f32[1,128], index: 2, kind: input, shape index: {}]   ;;  %s106_s3 = inlined_call_operand.vmem [shape: bf16[16,128], index: 3, kind: output, shape index: {}]  }
   0x1   :  { %v63_v0 = vld [vmem:[%s103_s0] sm:$0xff]  }
   0x2   :  { %v56_v1 = vld [vmem:[%s104_s1] ss:$0 sm:$0xff]  ;;  %v64_v2 = vunpack.c.l.bf16 %v63_v0  ;;  %v65_v3 = vunpack.c.h.bf16 %v63_v0 }
   0x3   :  { %v57_v4 = vld [vmem:[%s105_s2] ss:$0 sm:$0xff] }
   0x4   :  { %v25_v5 = vmul.f32 %v64_v2, %v56_v1  ;;  %v26_v6 = vmul.f32 %v65_v3, %v56_v1 }
   0x6   :  { %v34_v7 = vadd.f32 %v57_v4, %v25_v5  ;;  %v35_v8 = vadd.f32 %v57_v4, %v26_v6 }
   0x8   :  { %vm36_vm0 = vcmp.gt.f32.partialorder %v34_v7, 0.0  ;;  %vm37_vm1 = vcmp.gt.f32.partialorder %v35_v8, 0.0  ;;  %v38_v9 = vmul.f32 0.2, %v34_v7  ;;  %v39_v10 = vmul.f32 0.2, %v35_v8 }
   0xa   :  { %v40_v11 = vsel %vm36_vm0, %v34_v7, %v38_v9  ;;  %v41_v12 = vsel %vm37_vm1, %v35_v8, %v39_v10 }
   0xb   :  { %v69_v13 = vpack.c.bf16 %v41_v12, %v40_v11 }
   0xd   :  { %70 = vst [vmem:[%s106_s3] sm:$0xff] %v69_v13  }

// kernel: discriminator_forward.9
= control target key start
LH: loop header
LB: loop body
LE: loop exit
PB: predicated region body
PF: predicated region fallthrough
CT: control target
= control target key end

     0   :  { %s1857_s27 = smov 0   ;;  %s2016_s0 = inlined_call_operand.vmem [shape: f32[6,1], index: 0, kind: input, shape index: {}]   ;;  %s2017_s1 = inlined_call_operand.vmem [shape: bf16[2,10,16], index: 1, kind: input, shape index: {}]   ;;  %s2018_s2 = inlined_call_operand.vmem [shape: bf16[2,10,16], index: 2, kind: input, shape index: {}]   ;;  %s2019_s3 = inlined_call_operand.vmem [shape: bf16[2,10,16], index: 3, kind: input, shape index: {}]   ;;  %s2020_s4 = inlined_call_operand.vmem [shape: bf16[2,10,16], index: 4, kind: input, shape index: {}]   ;;  %s2021_s5 = inlined_call_operand.vmem [shape: bf16[16,16,128], index: 5, kind: input, shape index: {}]   ;;  %s2022_s6 = inlined_call_operand.vmem [shape: bf16[2,6,128], index: 6, kind: output, shape index: {0}]   ;;  %s2023_s7 = inlined_call_operand.vmem [shape: f32[2,1,128], index: 7, kind: output, shape index: {1}]   ;;  %s2024_s8 = inlined_call_operand.vmem [shape: f32[2,1,128], index: 8, kind: output, shape index: {2}]  }
   0x1 LB: > { %s1490_s28 = sadd.s32 4294967295, %s1807_s27   ;;  %p1494_p0 = scmp.ge.s32.totalorder %s1807_s27, 1  ;;  %s1807_s27 = sphi %s1857_s27, %s19_s27  }
   0x2   : > { %p297_p1 = scmp.lt.s32.totalorder %s1807_s27, 3 }
   0x4   : > { %p298_p2 = pnand %p1494_p0, %p297_p1 }
   0x5   : > { %v1777_v0 = vld [vmem:[%s2021_s5 + $0x8] sm:$0xff] (!%p298_p2)   ;;  %v1809_v1 = vmov (!%p298_p2), 0.0   ;;  %p351_p3 = scmp.lt.s32.totalorder (!%p298_p2), %s1490_s28, 1  ;;  %v1781_v2 = vld [vmem:[%s2021_s5 + $0x40] sm:$0xff] (!%p298_p2)   ;;  %vm1810_vm0 = vmmov (!%p298_p2), 0   ;;  %vm401_vm1 = vcmask (!%p298_p2), 130048  }
   0x6   : > { %301 = sbr.rel (%p298_p2) target bundleno = 341 (0x155), region = 44  ;;  %1612 = vmatprep.subr.bf16.mxu1 (!%p298_p2), %v1809_v1  ;;  %1660 = vmatprep.subr.bf16.mxu0 (!%p298_p2), %v1809_v1  ;;  %v1782_v3 = vld [vmem:[%s2021_s5] sm:$0xff] (!%p298_p2)   ;;  %v1811_v4 = vmov (!%p298_p2), 0   ;;  %v1784_v15 = vld [vmem:[%s2021_s5 + $0x48] sm:$0xff] (!%p298_p2)   ;;  %v1785_v20 = vld [vmem:[%s2021_s5 + $0x10] sm:$0xff] (!%p298_p2)   ;;  %vm1333_vm2 = vcmask (!%p298_p2), 1045504  }
   0x7   : > { %1613 = vmatpush3.bf16.msra.mxu1 (!%p298_p2), %v1777_v0  ;;  %1614 = vmatprep.mubr.msk.bf16.mxu1 (!%p298_p2), %vm1810_vm0, %v1809_v1  ;;  %v1326_v24 = vld [vmem:[%s2016_s0] sm:$0x3f] (!%p298_p2)  ;;  %v1786_v28 = vld [vmem:[%s2021_s5 + $0x50] sm:$0xff] (!%p298_p2)   ;;  %v1787_v31 = vld [vmem:[%s2021_s5 + $0x18] sm:$0xff] (!%p298_p2)  }
   0x8   : > { %1661 = vmatpush3.bf16.msra.mxu0 (!%p298_p2), %v1781_v2  ;;  %1618 = vmatprep.subr.bf16.mxu1 (!%p298_p2), %v1809_v1  ;;  %v1788_v36 = vld [vmem:[%s2021_s5 + $0x58] sm:$0xff] (!%p298_p2)   ;;  %v1789_v38 = vld [vmem:[%s2021_s5 + $0x20] sm:$0xff] (!%p298_p2)   ;;  %v1793_v46 = vld [vmem:[%s2021_s5 + $0x28] sm:$0xff] (!%p298_p2)  }
   0x9   : > { %1662 = vmatprep.mubr.msk.bf16.mxu0 (!%p298_p2), %vm1810_vm0, %v1809_v1  ;;  %1666 = vmatprep.subr.bf16.mxu0 (!%p298_p2), %v1809_v1  ;;  %v1790_v43 = vld [vmem:[%s2021_s5 + $0x60] sm:$0xff] (!%p298_p2)   ;;  %v1794_v53 = vld [vmem:[%s2021_s5 + $0x68] sm:$0xff] (!%p298_p2)   ;;  %v1797_v57 = vld [vmem:[%s2021_s5 + $0x30] sm:$0xff] (!%p298_p2)  }
   0xa   : > { %1776 = vset.pattern.permute.xlu0 (!%p298_p2), %v1811_v4  ;;  %v1798_v0 = vld [vmem:[%s2021_s5 + $0x70] sm:$0xff] (!%p298_p2)   ;;  %v1799_v4 = vld [vmem:[%s2021_s5 + $0x38] sm:$0xff] (!%p298_p2)  }
   0xb   : > { %1329 = vperm.xlu0 (!%p298_p2), %1776, %v1326_v24  }
   0xd   : > { %s2026_s28 = smov (!%p351_p3, %s1490_s28), 1 }
   0xe   : > { %s1882_s11 = sshll.u32 %s2026_s28, 3  ;;  %s1503_s15 = sshll.u32 %s2026_s28, 2 }
   0xf   : > { %s355_s16 = scalar_lea.vmem %s2017_s1, %s1882_s11  ;;  %s360_s19 = scalar_lea.vmem %s2018_s2, %s1882_s11 }
  0x10   : > { %v382_v5 = vld [vmem:[%s355_s16] sm:$0xf]  ;;  %v383_v6 = vld [vmem:[%s355_s16 + $0x4] sm:$0x1]  ;;  %s365_s17 = scalar_lea.vmem %s2019_s3, %s1882_s11  ;;  %s370_s24 = scalar_lea.vmem %s2020_s4, %s1882_s11 }
  0x11   : > { %v384_v7 = vld [vmem:[%s360_s19] sm:$0xf]  ;;  %v1540_v8 = vcombine.low %v382_v5, %v383_v6  ;;  %v385_v9 = vld [vmem:[%s360_s19 + $0x4] sm:$0x1]  ;;  %v1512_v17 = vcombine.low %v382_v5, %v382_v5  ;;  %s374_s18 = scalar_lea.vmem %s2022_s6, %s1503_s15  ;;  %s377_s21 = scalar_lea.vmem %s2023_s7, %s2026_s28 }
  0x12   : > { %1615 = vmatmul.mubr.msk.bf16.vlgmr.msra.gmra.mrb[0].mxu1 %vm401_vm1, %v384_v7  ;;  %v1545_v12 = vcombine.low %v384_v7, %v385_v9  ;;  %v1517_v29 = vcombine.low %v384_v7, %v384_v7  ;;  %v386_v39 = vld [vmem:[%s365_s17] sm:$0xf]  ;;  %v387_v40 = vld [vmem:[%s365_s17 + $0x4] sm:$0x1]  ;;  %v1800_v9 = vld [vmem:[%s2021_s5 + $0x78] sm:$0xff]  }
  0x13   : > { %1619 = vmatpush3.bf16.msra.mxu1 %v1782_v3  ;;  %1620 = vmatprep.mubr.msk.bf16.mxu1 %vm1810_vm0, %v1809_v1  ;;  %v859_v10 = vshrl.u32 %v1540_v8, 16  ;;  %v862_v11 = vshll.u32 %v1540_v8, 16  ;;  %v503_v23 = vshll.u32 %v1512_v17, 16  ;;  %v501_v26 = vshrl.u32 %v1512_v17, 16  ;;  %v388_v49 = vld [vmem:[%s370_s24] sm:$0xf] }
  0x14   : > { %1624 = vmatprep.subr.bf16.mxu1 %v1809_v1  ;;  %v923_v18 = vshrl.u32 %v1545_v12, 16  ;;  %v926_v19 = vshll.u32 %v1545_v12, 16  ;;  %v566_v32 = vshll.u32 %v1517_v29, 16  ;;  %v564_v33 = vshrl.u32 %v1517_v29, 16  ;;  %v389_v50 = vld [vmem:[%s370_s24 + $0x4] sm:$0x1]  ;;  %s380_s24 = scalar_lea.vmem %s2024_s8, %s2026_s28 }
  0x15   : > { %v861_v13 = vrot.slane %v859_v10, 1  ;;  %v864_v14 = vrot.slane %v862_v11, 2  ;;  %v505_v27 = vrot.slane %v503_v23, 1  ;;  %v983_v35 = vrot.slane %v1540_v8, 2 }
  0x16   : > { %v925_v21 = vrot.slane %v923_v18, 1  ;;  %v928_v22 = vrot.slane %v926_v19, 2  ;;  %v568_v34 = vrot.slane %v566_v32, 1  ;;  %v1037_v41 = vrot.slane %v1545_v12, 2 }
  0x17   : > { %v865_v16 = vor.u32 %v864_v14, %v861_v13  ;;  %v506_v30 = vor.u32 %v505_v27, %v501_v26  ;;  %v1558_v42 = vcombine.low %v386_v39, %v387_v40  ;;  %v1563_v52 = vcombine.low %v388_v49, %v389_v50 }
  0x18   : > { %v929_v25 = vor.u32 %v928_v22, %v925_v21  ;;  %v569_v37 = vor.u32 %v568_v34, %v564_v33  ;;  %v1530_v54 = vcombine.low %v386_v39, %v386_v39  ;;  %v1535_v2 = vcombine.low %v388_v49, %v388_v49 }
  0x19   : > { %1663 = vmatmul.mubr.msk.bf16.vlgmr.msra.gmra.mrb[0].mxu0 %vm401_vm1, %v865_v16  ;;  %v1095_v44 = vshrl.u32 %v1558_v42, 16  ;;  %v1098_v45 = vshll.u32 %v1558_v42, 16  ;;  %v1159_v55 = vshrl.u32 %v1563_v52, 16  ;;  %v1162_v56 = vshll.u32 %v1563_v52, 16 }
  0x1a   : > { %1667 = vmatpush3.bf16.msra.mxu0 %v1784_v15  ;;  %1668 = vmatprep.mubr.msk.bf16.mxu0 %vm1810_vm0, %v1809_v1  ;;  %v735_v58 = vshll.u32 %v1530_v54, 16  ;;  %v733_v61 = vshrl.u32 %v1530_v54, 16  ;;  %v796_v6 = vshrl.u32 %v1535_v2, 16  ;;  %v1219_v8 = vrot.slane %v1558_v42, 2 }
  0x1b   : > { %1672 = vmatprep.subr.bf16.mxu0 %v1809_v1  ;;  %v1097_v47 = vrot.slane %v1095_v44, 1  ;;  %v1100_v48 = vrot.slane %v1098_v45, 2  ;;  %v1161_v59 = vrot.slane %v1159_v55, 1  ;;  %v1164_v60 = vrot.slane %v1162_v56, 2 }
  0x1c   : > { %v737_v62 = vrot.slane %v735_v58, 1  ;;  %v1273_v11 = vrot.slane %v1563_v52, 2 }
  0x1d   : > { %v1101_v51 = vor.u32 %v1100_v48, %v1097_v47  ;;  %v1165_v63 = vor.u32 %v1164_v60, %v1161_v59 }
  0x1e   : > { %1621 = vmatmul.mubr.msk.bf16.vlgmr.msra.gmra.mrb[0].mxu1 %vm401_vm1, %v382_v5  ;;  %v738_v3 = vor.u32 %v737_v62, %v733_v61  ;;  %v798_v5 = vshll.u32 %v1535_v2, 16 }
  0x1f   : > { %1625 = vmatpush3.bf16.msra.mxu1 %v1785_v20  ;;  %1626 = vmatprep.mubr.msk.bf16.mxu1 %vm1810_vm0, %v1809_v1 }
  0x20   : > { %1630 = vmatprep.subr.bf16.mxu1 %v1809_v1  ;;  %v800_v7 = vrot.slane %v798_v5, 1 }
  0x22   : > { %v801_v10 = vor.u32 %v800_v7, %v796_v6 }
  0x25   : > { %1669 = vmatmul.mubr.msk.bf16.vlgmr.msra.gmra.mrb[0].mxu0 %vm401_vm1, %v929_v25 }
  0x26   : > { %1673 = vmatpush3.bf16.msra.mxu0 %v1786_v28  ;;  %1674 = vmatprep.mubr.msk.bf16.mxu0 %vm1810_vm0, %v1809_v1 }
  0x27   : > { %1678 = vmatprep.subr.bf16.mxu0 %v1809_v1 }
  0x2a   : > { %1627 = vmatmul.mubr.msk.bf16.vlgmr.msra.gmra.mrb[0].mxu1 %vm401_vm1, %v506_v30 }
  0x2b   : > { %1631 = vmatpush3.bf16.msra.mxu1 %v1787_v31  ;;  %1632 = vmatprep.mubr.msk.bf16.mxu1 %vm1810_vm0, %v1809_v1 }
  0x2c   : > { %1636 = vmatprep.subr.bf16.mxu1 %v1809_v1 }
  0x31   : > { %1675 = vmatmul.mubr.msk.bf16.vlgmr.msra.gmra.mrb[0].mxu0 %vm401_vm1, %v983_v35 }
  0x32   : > { %1679 = vmatpush3.bf16.msra.mxu0 %v1788_v36  ;;  %1680 = vmatprep.mubr.msk.bf16.mxu0 %vm1810_vm0, %v1809_v1 }
  0x33   : > { %1684 = vmatprep.subr.bf16.mxu0 %v1809_v1 }
  0x36   : > { %1633 = vmatmul.mubr.msk.bf16.vlgmr.msra.gmra.mrb[0].mxu1 %vm401_vm1, %v569_v37 }
  0x37   : > { %1637 = vmatpush3.bf16.msra.mxu1 %v1789_v38  ;;  %1638 = vmatprep.mubr.msk.bf16.mxu1 %vm1810_vm0, %v1809_v1 }
  0x38   : > { %1642 = vmatprep.subr.bf16.mxu1 %v1809_v1 }
  0x3d   : > { %1681 = vmatmul.mubr.msk.bf16.vlgmr.msra.gmra.mrb[0].mxu0 %vm401_vm1, %v1037_v41 }
  0x3e   : > { %1685 = vmatpush3.bf16.msra.mxu0 %v1790_v43  ;;  %1686 = vmatprep.mubr.msk.bf16.mxu0 %vm1810_vm0, %v1809_v1 }
  0x3f   : > { %1690 = vmatprep.subr.bf16.mxu0 %v1809_v1 }
  0x42   : > { %1639 = vmatmul.mubr.msk.bf16.vlgmr.msra.gmra.mrb[0].mxu1 %vm401_vm1, %v386_v39 }
  0x43   : > { %1643 = vmatpush3.bf16.msra.mxu1 %v1793_v46  ;;  %1644 = vmatprep.mubr.msk.bf16.mxu1 %vm1810_vm0, %v1809_v1 }
  0x44   : > { %1648 = vmatprep.subr.bf16.mxu1 %v1809_v1 }
  0x49   : > { %1687 = vmatmul.mubr.msk.bf16.vlgmr.msra.gmra.mrb[0].mxu0 %vm401_vm1, %v1101_v51 }
  0x4a   : > { %1691 = vmatpush3.bf16.msra.mxu0 %v1794_v53  ;;  %1692 = vmatprep.mubr.msk.bf16.mxu0 %vm1810_vm0, %v1809_v1 }
  0x4b   : > { %1696 = vmatprep.subr.bf16.mxu0 %v1809_v1 }
  0x4e   : > { %1645 = vmatmul.mubr.msk.bf16.vlgmr.msra.gmra.mrb[0].mxu1 %vm401_vm1, %v388_v49 }
  0x4f   : > { %1649 = vmatpush3.bf16.msra.mxu1 %v1797_v57  ;;  %1650 = vmatprep.mubr.msk.bf16.mxu1 %vm1810_vm0, %v1809_v1 }
  0x50   : > { %1654 = vmatprep.subr.bf16.mxu1 %v1809_v1 }
  0x55   : > { %1693 = vmatmul.mubr.msk.bf16.vlgmr.msra.gmra.mrb[0].mxu0 %vm401_vm1, %v1165_v63 }
  0x56   : > { %1697 = vmatpush3.bf16.msra.mxu0 %v1798_v0  ;;  %1698 = vmatprep.mubr.msk.bf16.mxu0 %vm1810_vm0, %v1809_v1 }
  0x57   : > { %1702 = vmatprep.subr.bf16.mxu0 %v1809_v1 }
  0x5a   : > { %1651 = vmatmul.mubr.msk.bf16.vlgmr.msra.gmra.mrb[0].mxu1 %vm401_vm1, %v738_v3 }
  0x5b   : > { %1655 = vmatpush3.bf16.msra.mxu1 %v1799_v4  ;;  %1656 = vmatprep.mubr.msk.bf16.mxu1 %vm1810_vm0, %v1809_v1 }
  0x61   : > { %1699 = vmatmul.mubr.msk.bf16.vlgmr.msra.gmra.mrb[0].mxu0 %vm401_vm1, %v1219_v8 }
  0x62   : > { %1703 = vmatpush3.bf16.msra.mxu0 %v1800_v9  ;;  %1704 = vmatprep.mubr.msk.bf16.mxu0 %vm1810_vm0, %v1809_v1 }
  0x66   : > { %1657 = vmatmul.mubr.msk.bf16.vlgmr.msra.gmra.mrb[0].mxu1 %vm401_vm1, %v801_v10 }
  0x6d   : > { %1705 = vmatmul.mubr.msk.bf16.vlgmr.msra.gmra.mrb[0].mxu0 %vm401_vm1, %v1273_v11 }
  0x8a   : > { %v1330_v17 = vpop.permute.xlu0 %1329 }
 0x139   : > { %v845_v12 = vpop.f32.mrb[0].mxu1 }
 0x13a   : > { %v1658_v13 = vpop.f32.mrb[1].mxu1 }
 0x13b   : > { %v848_v14 = vpop.f32.mrb[2].mxu1 }
 0x13c   : > { %v1659_v15 = vpop.f32.mrb[3].mxu1 }
 0x140   : > { %v1317_v16 = vpop.f32.mrb[0].mxu0 }
 0x141   : > { %v1708_v18 = vadd.f32 %v1317_v16, %v845_v12  ;;  %v1706_v19 = vpop.f32.mrb[1].mxu0 }
 0x142   : > { %v1320_v1 = vpop.f32.mrb[2].mxu0 }
 0x143   : > { %v1324_v20 = vpack.c.bf16 %v1708_v18, %v1708_v18  ;;  %v1332_v21 = vmul.f32 %v1708_v18, %v1330_v17  ;;  %v1707_v22 = vpop.f32.mrb[3].mxu0 }
 0x145   : > { %1325 = vst [vmem:[%s374_s18] sm:$0x7] %v1324_v20  ;;  %v1334_v23 = vsel %vm1333_vm2, %v1332_v21, 0.0  ;;  %v1342_v24 = vmul.f32 %v1708_v18, %v1332_v21 }
 0x146   : > { %v1335_v25 = vrot.slane %v1334_v23, 4 }
 0x147   : > { %v1343_v26 = vsel %vm1333_vm2, %v1342_v24, 0.0 }
 0x148   : > { %v1336_v27 = vadd.f32 %v1335_v25, %v1334_v23  ;;  %v1344_v28 = vrot.slane %v1343_v26, 4 }
 0x14a   : > { %v1337_v29 = vrot.slane %v1336_v27, 2  ;;  %v1345_v30 = vadd.f32 %v1344_v28, %v1343_v26 }
 0x14c   : > { %v1338_v31 = vadd.f32 %v1337_v29, %v1336_v27  ;;  %v1346_v32 = vrot.slane %v1345_v30, 2 }
 0x14e   : > { %v1339_v33 = vrot.slane %v1338_v31, 1  ;;  %v1347_v34 = vadd.f32 %v1346_v32, %v1345_v30 }
 0x150   : > { %v1340_v35 = vadd.f32 %v1339_v33, %v1338_v31  ;;  %v1348_v36 = vrot.slane %v1347_v34, 1 }
 0x152   : > { %1341 = vst [vmem:[%s377_s21] sm:$0x1] %v1340_v35  ;;  %v1349_v37 = vadd.f32 %v1348_v36, %v1347_v34 }
 0x154   : > { %1350 = vst [vmem:[%s380_s24] sm:$0x1] %v1349_v37 }
 0x155 PF: > { %s19_s27 = sadd.s32 1, %s1807_s27  }
 0x156   : > { %p16_p4 = scmp.ge.s32.totalorder %s19_s27, 4  }
 0x158   :  { %18 = sbr.rel (!%p16_p4) target bundleno = 1 (0x1), region = 122 }

// kernel: discriminator_forward.11
= control target key start
LH: loop header
LB: loop body
LE: loop exit
PB: predicated region body
PF: predicated region fallthrough
CT: control target
= control target key end

     0   :  { %s1850_s18 = smov 0   ;;  %s2062_s0 = inlined_call_operand.vmem [shape: bf16[2,5,32], index: 0, kind: input, shape index: {}]   ;;  %s2063_s1 = inlined_call_operand.vmem [shape: bf16[2,5,32], index: 1, kind: input, shape index: {}]   ;;  %s2064_s2 = inlined_call_operand.vmem [shape: bf16[2,5,32], index: 2, kind: input, shape index: {}]   ;;  %s2065_s3 = inlined_call_operand.vmem [shape: bf16[2,5,32], index: 3, kind: input, shape index: {}]   ;;  %s2066_s4 = inlined_call_operand.vmem [shape: bf16[16,32,128], index: 4, kind: input, shape index: {}]   ;;  %s2067_s5 = inlined_call_operand.vmem [shape: f32[2,2,128], index: 5, kind: output, shape index: {}]  }
   0x1 LB: > { %s1402_s19 = sadd.s32 4294967295, %s1816_s18   ;;  %p1406_p0 = scmp.ge.s32.totalorder %s1816_s18, 1  ;;  %s1816_s18 = sphi %s1850_s18, %s15_s18  }
   0x2   : > { %p213_p1 = scmp.lt.s32.totalorder %s1816_s18, 3 }
   0x4   : > { %p214_p2 = pnand %p1406_p0, %p213_p1 }
   0x5   : > { %v1770_v0 = vld [vmem:[%s2066_s4 + $0x10] sm:$0xff] (!%p214_p2)   ;;  %v1818_v1 = vmov (!%p214_p2), 0.0   ;;  %v1771_v2 = vld [vmem:[%s2066_s4 + $0x80] sm:$0xff] (!%p214_p2)   ;;  %v1772_v3 = vld [vmem:[%s2066_s4 + $0x18] sm:$0xff] (!%p214_p2)   ;;  %vm1819_vm0 = vmmov (!%p214_p2), 0   ;;  %p251_p3 = scmp.lt.s32.totalorder (!%p214_p2), %s1402_s19, 1 }
   0x6   : > { %217 = sbr.rel (%p214_p2) target bundleno = 346 (0x15a), region = 40  ;;  %1575 = vmatprep.subr.bf16.mxu1 (!%p214_p2), %v1818_v1  ;;  %1639 = vmatprep.subr.bf16.mxu0 (!%p214_p2), %v1818_v1  ;;  %v1773_v4 = vld [vmem:[%s2066_s4 + $0x88] sm:$0xff] (!%p214_p2)   ;;  %vm297_vm1 = vcmask (!%p214_p2), 261120   ;;  %v1775_v5 = vld [vmem:[%s2066_s4] sm:$0xff] (!%p214_p2)   ;;  %v1777_v9 = vld [vmem:[%s2066_s4 + $0x90] sm:$0xff] (!%p214_p2)  }
   0x7   : > { %1576 = vmatpush3.bf16.msra.mxu1 (!%p214_p2), %v1770_v0  ;;  %1579 = vmatprep.mubr.msk.bf16.mxu1 (!%p214_p2), %vm1819_vm0, %v1818_v1  ;;  %v1778_v10 = vld [vmem:[%s2066_s4 + $0x8] sm:$0xff] (!%p214_p2)   ;;  %v1779_v12 = vld [vmem:[%s2066_s4 + $0x98] sm:$0xff] (!%p214_p2)   ;;  %v1780_v14 = vld [vmem:[%s2066_s4 + $0x20] sm:$0xff] (!%p214_p2)  }
   0x8   : > { %1640 = vmatpush3.bf16.msra.mxu0 (!%p214_p2), %v1771_v2  ;;  %1577 = vmatprep.subr.bf16.mxu1 (!%p214_p2), %v1818_v1  ;;  %v1781_v17 = vld [vmem:[%s2066_s4 + $0xa0] sm:$0xff] (!%p214_p2)   ;;  %v1782_v18 = vld [vmem:[%s2066_s4 + $0x28] sm:$0xff] (!%p214_p2)   ;;  %v1784_v25 = vld [vmem:[%s2066_s4 + $0x30] sm:$0xff] (!%p214_p2)  }
   0x9   : > { %1641 = vmatprep.subr.bf16.mxu0 (!%p214_p2), %v1818_v1  ;;  %1643 = vmatprep.mubr.msk.bf16.mxu0 (!%p214_p2), %vm1819_vm0, %v1818_v1  ;;  %v1783_v21 = vld [vmem:[%s2066_s4 + $0xa8] sm:$0xff] (!%p214_p2)   ;;  %v1785_v27 = vld [vmem:[%s2066_s4 + $0xb0] sm:$0xff] (!%p214_p2)   ;;  %v1786_v29 = vld [vmem:[%s2066_s4 + $0x38] sm:$0xff] (!%p214_p2)  }
   0xa   : > { %v1787_v32 = vld [vmem:[%s2066_s4 + $0xb8] sm:$0xff] (!%p214_p2)   ;;  %v1788_v36 = vld [vmem:[%s2066_s4 + $0x40] sm:$0xff] (!%p214_p2)   ;;  %v1790_v39 = vld [vmem:[%s2066_s4 + $0x48] sm:$0xff] (!%p214_p2)  }
   0xb   : > { %1578 = vmatpush3.bf16.msra.mxu1 (!%p214_p2), %v1772_v3  ;;  %v1789_v38 = vld [vmem:[%s2066_s4 + $0xc0] sm:$0xff] (!%p214_p2)   ;;  %v1791_v40 = vld [vmem:[%s2066_s4 + $0xc8] sm:$0xff] (!%p214_p2)   ;;  %v1793_v43 = vld [vmem:[%s2066_s4 + $0x50] sm:$0xff] (!%p214_p2)  }
   0xc   : > { %1642 = vmatpush3.bf16.msra.mxu0 (!%p214_p2), %v1773_v4  ;;  %1583 = vmatprep.subr.bf16.mxu1 (!%p214_p2), %v1818_v1  ;;  %v1794_v45 = vld [vmem:[%s2066_s4 + $0xd0] sm:$0xff] (!%p214_p2)   ;;  %v1795_v46 = vld [vmem:[%s2066_s4 + $0x58] sm:$0xff] (!%p214_p2)   ;;  %v1798_v50 = vld [vmem:[%s2066_s4 + $0x60] sm:$0xff] (!%p214_p2)  }
   0xd   : > { %s2069_s19 = smov (!%p251_p3, %s1402_s19), 1  ;;  %1647 = vmatprep.subr.bf16.mxu0 %v1818_v1  ;;  %v1796_v47 = vld [vmem:[%s2066_s4 + $0xd8] sm:$0xff]   ;;  %v1799_v53 = vld [vmem:[%s2066_s4 + $0xe0] sm:$0xff]   ;;  %v1800_v54 = vld [vmem:[%s2066_s4 + $0x68] sm:$0xff]  }
   0xe   : > { %s1881_s28 = sshll.u32 %s2069_s19, 2  ;;  %v1801_v57 = vld [vmem:[%s2066_s4 + $0xe8] sm:$0xff]   ;;  %v1802_v61 = vld [vmem:[%s2066_s4 + $0x70] sm:$0xff]   ;;  %v1804_v2 = vld [vmem:[%s2066_s4 + $0x78] sm:$0xff]   ;;  %s1411_s30 = sshll.u32 %s2069_s19, 1 }
   0xf   : > { %s254_s8 = scalar_lea.vmem %s2062_s0, %s1881_s28  ;;  %s258_s11 = scalar_lea.vmem %s2063_s1, %s1881_s28  ;;  %v1803_v0 = vld [vmem:[%s2066_s4 + $0xf0] sm:$0xff]  }
  0x10   : > { %v272_v6 = vld [vmem:[%s254_s8] sm:$0x7]  ;;  %s262_s22 = scalar_lea.vmem %s2064_s2, %s1881_s28  ;;  %s266_s9 = scalar_lea.vmem %s2065_s3, %s1881_s28 }
  0x11   : > { %v273_v7 = vld [vmem:[%s258_s11] sm:$0x7]  ;;  %v1426_v8 = vcombine.low %v272_v6, %v272_v6  ;;  %s270_s8 = scalar_lea.vmem %s2067_s5, %s1411_s30 }
  0x12   : > { %1580 = vmatmul.mubr.msk.bf16.vlgmr.msra.gmra.mrb[0].mxu1 %vm297_vm1, %v273_v7  ;;  %v1434_v13 = vcombine.low %v273_v7, %v273_v7  ;;  %v274_v41 = vld [vmem:[%s262_s22] sm:$0x7] }
  0x13   : > { %1584 = vmatpush3.bf16.msra.mxu1 %v1775_v5  ;;  %1587 = vmatprep.mubr.msk.bf16.mxu1 %vm1819_vm0, %v1818_v1  ;;  %v807_v11 = vrot.slane %v1426_v8, 1  ;;  %v407_v16 = vshll.u32 %v1426_v8, 16  ;;  %v405_v19 = vshrl.u32 %v1426_v8, 16  ;;  %v1456_v42 = vcombine.low %v274_v41, %v274_v41  ;;  %v275_v48 = vld [vmem:[%s266_s9] sm:$0x7]  ;;  %v1805_v5 = vld [vmem:[%s2066_s4 + $0xf8] sm:$0xff]  }
  0x14   : > { %1585 = vmatprep.subr.bf16.mxu1 %v1818_v1  ;;  %v869_v15 = vrot.slane %v1434_v13, 1  ;;  %v478_v26 = vshll.u32 %v1434_v13, 16  ;;  %v476_v30 = vshrl.u32 %v1434_v13, 16  ;;  %v1464_v49 = vcombine.low %v275_v48, %v275_v48 }
  0x15   : > { %1644 = vmatmul.mubr.msk.bf16.vlgmr.msra.gmra.mrb[0].mxu0 %vm297_vm1, %v807_v11  ;;  %v409_v20 = vrot.slane %v407_v16, 1  ;;  %v931_v23 = vrot.slane %v405_v19, 1  ;;  %v932_v24 = vrot.slane %v407_v16, 2  ;;  %v1059_v44 = vrot.slane %v1456_v42, 1 }
  0x16   : > { %1648 = vmatpush3.bf16.msra.mxu0 %v1777_v9  ;;  %1651 = vmatprep.mubr.msk.bf16.mxu0 %vm1819_vm0, %v1818_v1  ;;  %v480_v31 = vrot.slane %v478_v26, 1  ;;  %v995_v34 = vrot.slane %v476_v30, 1  ;;  %v996_v35 = vrot.slane %v478_v26, 2  ;;  %v671_v51 = vshll.u32 %v1456_v42, 16 }
  0x17   : > { %1586 = vmatpush3.bf16.msra.mxu1 %v1778_v10  ;;  %1649 = vmatprep.subr.bf16.mxu0 %v1818_v1  ;;  %v410_v22 = vor.u32 %v409_v20, %v405_v19  ;;  %v933_v28 = vor.u32 %v932_v24, %v931_v23  ;;  %v1121_v52 = vrot.slane %v1464_v49, 1  ;;  %v669_v55 = vshrl.u32 %v1456_v42, 16 }
  0x18   : > { %1591 = vmatprep.subr.bf16.mxu1 %v1818_v1  ;;  %v481_v33 = vor.u32 %v480_v31, %v476_v30  ;;  %v997_v37 = vor.u32 %v996_v35, %v995_v34  ;;  %v673_v56 = vrot.slane %v671_v51, 1  ;;  %v1184_v59 = vrot.slane %v671_v51, 2 }
  0x19   : > { %v1183_v58 = vrot.slane %v669_v55, 1  ;;  %v742_v62 = vshll.u32 %v1464_v49, 16  ;;  %v740_v3 = vshrl.u32 %v1464_v49, 16 }
  0x1a   : > { %1650 = vmatpush3.bf16.msra.mxu0 %v1779_v12  ;;  %v674_v60 = vor.u32 %v673_v56, %v669_v55 }
  0x1b   : > { %1655 = vmatprep.subr.bf16.mxu0 %v1818_v1  ;;  %v1185_v63 = vor.u32 %v1184_v59, %v1183_v58  ;;  %v744_v4 = vrot.slane %v742_v62, 1  ;;  %v1248_v7 = vrot.slane %v742_v62, 2 }
  0x1d   : > { %v745_v8 = vor.u32 %v744_v4, %v740_v3 }
  0x1e   : > { %1588 = vmatmul.mubr.msk.bf16.vlgmr.msra.gmra.mrb[0].mxu1 %vm297_vm1, %v272_v6  ;;  %v1247_v6 = vrot.slane %v740_v3, 1 }
  0x1f   : > { %1592 = vmatpush3.bf16.msra.mxu1 %v1780_v14  ;;  %1595 = vmatprep.mubr.msk.bf16.mxu1 %vm1819_vm0, %v1818_v1 }
  0x20   : > { %1593 = vmatprep.subr.bf16.mxu1 %v1818_v1  ;;  %v1249_v9 = vor.u32 %v1248_v7, %v1247_v6 }
  0x21   : > { %1652 = vmatmul.mubr.msk.bf16.vlgmr.msra.gmra.mrb[0].mxu0 %vm297_vm1, %v869_v15 }
  0x22   : > { %1656 = vmatpush3.bf16.msra.mxu0 %v1781_v17  ;;  %1659 = vmatprep.mubr.msk.bf16.mxu0 %vm1819_vm0, %v1818_v1 }
  0x23   : > { %1594 = vmatpush3.bf16.msra.mxu1 %v1782_v18  ;;  %1657 = vmatprep.subr.bf16.mxu0 %v1818_v1 }
  0x24   : > { %1599 = vmatprep.subr.bf16.mxu1 %v1818_v1 }
  0x26   : > { %1658 = vmatpush3.bf16.msra.mxu0 %v1783_v21 }
  0x27   : > { %1663 = vmatprep.subr.bf16.mxu0 %v1818_v1 }
  0x2a   : > { %1596 = vmatmul.mubr.msk.bf16.vlgmr.msra.gmra.mrb[0].mxu1 %vm297_vm1, %v410_v22 }
  0x2b   : > { %1600 = vmatpush3.bf16.msra.mxu1 %v1784_v25  ;;  %1603 = vmatprep.mubr.msk.bf16.mxu1 %vm1819_vm0, %v1818_v1 }
  0x2c   : > { %1601 = vmatprep.subr.bf16.mxu1 %v1818_v1 }
  0x2d   : > { %1660 = vmatmul.mubr.msk.bf16.vlgmr.msra.gmra.mrb[0].mxu0 %vm297_vm1, %v933_v28 }
  0x2e   : > { %1664 = vmatpush3.bf16.msra.mxu0 %v1785_v27  ;;  %1667 = vmatprep.mubr.msk.bf16.mxu0 %vm1819_vm0, %v1818_v1 }
  0x2f   : > { %1602 = vmatpush3.bf16.msra.mxu1 %v1786_v29  ;;  %1665 = vmatprep.subr.bf16.mxu0 %v1818_v1 }
  0x30   : > { %1607 = vmatprep.subr.bf16.mxu1 %v1818_v1 }
  0x32   : > { %1666 = vmatpush3.bf16.msra.mxu0 %v1787_v32 }
  0x33   : > { %1671 = vmatprep.subr.bf16.mxu0 %v1818_v1 }
  0x36   : > { %1604 = vmatmul.mubr.msk.bf16.vlgmr.msra.gmra.mrb[0].mxu1 %vm297_vm1, %v481_v33 }
  0x37   : > { %1608 = vmatpush3.bf16.msra.mxu1 %v1788_v36  ;;  %1611 = vmatprep.mubr.msk.bf16.mxu1 %vm1819_vm0, %v1818_v1 }
  0x38   : > { %1609 = vmatprep.subr.bf16.mxu1 %v1818_v1 }
  0x39   : > { %1668 = vmatmul.mubr.msk.bf16.vlgmr.msra.gmra.mrb[0].mxu0 %vm297_vm1, %v997_v37 }
  0x3a   : > { %1672 = vmatpush3.bf16.msra.mxu0 %v1789_v38  ;;  %1675 = vmatprep.mubr.msk.bf16.mxu0 %vm1819_vm0, %v1818_v1 }
  0x3b   : > { %1610 = vmatpush3.bf16.msra.mxu1 %v1790_v39  ;;  %1673 = vmatprep.subr.bf16.mxu0 %v1818_v1 }
  0x3c   : > { %1615 = vmatprep.subr.bf16.mxu1 %v1818_v1 }
  0x3e   : > { %1674 = vmatpush3.bf16.msra.mxu0 %v1791_v40 }
  0x3f   : > { %1679 = vmatprep.subr.bf16.mxu0 %v1818_v1 }
  0x42   : > { %1612 = vmatmul.mubr.msk.bf16.vlgmr.msra.gmra.mrb[0].mxu1 %vm297_vm1, %v274_v41 }
  0x43   : > { %1616 = vmatpush3.bf16.msra.mxu1 %v1793_v43  ;;  %1619 = vmatprep.mubr.msk.bf16.mxu1 %vm1819_vm0, %v1818_v1 }
  0x44   : > { %1617 = vmatprep.subr.bf16.mxu1 %v1818_v1 }
  0x45   : > { %1676 = vmatmul.mubr.msk.bf16.vlgmr.msra.gmra.mrb[0].mxu0 %vm297_vm1, %v1059_v44 }
  0x46   : > { %1680 = vmatpush3.bf16.msra.mxu0 %v1794_v45  ;;  %1683 = vmatprep.mubr.msk.bf16.mxu0 %vm1819_vm0, %v1818_v1 }
  0x47   : > { %1618 = vmatpush3.bf16.msra.mxu1 %v1795_v46  ;;  %1681 = vmatprep.subr.bf16.mxu0 %v1818_v1 }
  0x48   : > { %1623 = vmatprep.subr.bf16.mxu1 %v1818_v1 }
  0x4a   : > { %1682 = vmatpush3.bf16.msra.mxu0 %v1796_v47 }
  0x4b   : > { %1687 = vmatprep.subr.bf16.mxu0 %v1818_v1 }
  0x4e   : > { %1620 = vmatmul.mubr.msk.bf16.vlgmr.msra.gmra.mrb[0].mxu1 %vm297_vm1, %v275_v48 }
  0x4f   : > { %1624 = vmatpush3.bf16.msra.mxu1 %v1798_v50  ;;  %1627 = vmatprep.mubr.msk.bf16.mxu1 %vm1819_vm0, %v1818_v1 }
  0x50   : > { %1625 = vmatprep.subr.bf16.mxu1 %v1818_v1 }
  0x51   : > { %1684 = vmatmul.mubr.msk.bf16.vlgmr.msra.gmra.mrb[0].mxu0 %vm297_vm1, %v1121_v52 }
  0x52   : > { %1688 = vmatpush3.bf16.msra.mxu0 %v1799_v53  ;;  %1691 = vmatprep.mubr.msk.bf16.mxu0 %vm1819_vm0, %v1818_v1 }
  0x53   : > { %1626 = vmatpush3.bf16.msra.mxu1 %v1800_v54  ;;  %1689 = vmatprep.subr.bf16.mxu0 %v1818_v1 }
  0x54   : > { %1631 = vmatprep.subr.bf16.mxu1 %v1818_v1 }
  0x56   : > { %1690 = vmatpush3.bf16.msra.mxu0 %v1801_v57 }
  0x57   : > { %1695 = vmatprep.subr.bf16.mxu0 %v1818_v1 }
  0x5a   : > { %1628 = vmatmul.mubr.msk.bf16.vlgmr.msra.gmra.mrb[0].mxu1 %vm297_vm1, %v674_v60 }
  0x5b   : > { %1632 = vmatpush3.bf16.msra.mxu1 %v1802_v61  ;;  %1635 = vmatprep.mubr.msk.bf16.mxu1 %vm1819_vm0, %v1818_v1 }
  0x5c   : > { %1633 = vmatprep.subr.bf16.mxu1 %v1818_v1 }
  0x5d   : > { %1692 = vmatmul.mubr.msk.bf16.vlgmr.msra.gmra.mrb[0].mxu0 %vm297_vm1, %v1185_v63 }
  0x5e   : > { %1696 = vmatpush3.bf16.msra.mxu0 %v1803_v0  ;;  %1699 = vmatprep.mubr.msk.bf16.mxu0 %vm1819_vm0, %v1818_v1 }
  0x5f   : > { %1634 = vmatpush3.bf16.msra.mxu1 %v1804_v2  ;;  %1697 = vmatprep.subr.bf16.mxu0 %v1818_v1 }
  0x62   : > { %1698 = vmatpush3.bf16.msra.mxu0 %v1805_v5 }
  0x66   : > { %1636 = vmatmul.mubr.msk.bf16.vlgmr.msra.gmra.mrb[0].mxu1 %vm297_vm1, %v745_v8 }
  0x69   : > { %1700 = vmatmul.mubr.msk.bf16.vlgmr.msra.gmra.mrb[0].mxu0 %vm297_vm1, %v1249_v9 }
 0x139   : > { %v795_v10 = vpop.f32.mrb[0].mxu1 }
 0x13a   : > { %v1637_v11 = vpop.f32.mrb[1].mxu1 }
 0x13b   : > { %v798_v12 = vpop.f32.mrb[2].mxu1 }
 0x13c   : > { %v1638_v13 = vpop.f32.mrb[3].mxu1  ;;  %v1299_v14 = vpop.f32.mrb[0].mxu0 }
 0x13d   : > { %v1703_v15 = vadd.f32 %v1299_v14, %v795_v10  ;;  %v1701_v16 = vpop.f32.mrb[1].mxu0 }
 0x13e   : > { %v1302_v17 = vpop.f32.mrb[2].mxu0 }
 0x13f   : > { %v1524_v18 = vmul.f32 -1.442695, %v1703_v15  ;;  %v1702_v1 = vpop.f32.mrb[3].mxu0 }
 0x141   : > { %1806 = vpow2.f32 %v1524_v18 }
 0x14b   : > { %v1807_v19 = vpop.eup %1806 }
 0x14c   : > { %v1309_v20 = vadd.f32 1.0, %v1807_v19 }
 0x14e   : > { %1808 = vrcp.f32 %v1309_v20 }
 0x158   : > { %v1809_v21 = vpop.eup %1808 }
 0x159   : > { %1312 = vst [vmem:[%s270_s8] sm:$0x3] %v1809_v21 }
 0x15a PF: > { %s15_s18 = sadd.s32 1, %s1816_s18  }
 0x15b   : > { %p12_p4 = scmp.ge.s32.totalorder %s15_s18, 4  }
 0x15d   :  { %14 = sbr.rel (!%p12_p4) target bundleno = 1 (0x1), region = 94 }

</bundles_post_ra>
